<compile_context>
chip_gen: v5e
topology: v5e:2x2
jax: 0.10.0
libtpu: 0.0.40
codegen_flags: <defaults>
</compile_context>

<pallas_src>
import math
import functools

import jax
import jax.numpy as jnp
from jax.experimental import pallas as pl
from jax.experimental.pallas import tpu as pltpu


_VMEM_LIMIT_BYTES = 32 * 1024 * 1024  # safe on v5e/v6e (128 MiB) and v7x (64 MiB)
_LANE = 128


def _round_up(x: int, m: int) -> int:
    return ((x + m - 1) // m) * m


def make_pe_buffer(d_model: int, max_len: int) -> jnp.ndarray:
    """Sin/cos positional-encoding table, shape (max_len, d_model), f32."""
    position = jnp.arange(max_len, dtype=jnp.float32)[:, None]
    div_term = jnp.exp(
        jnp.arange(0, d_model, 2, dtype=jnp.float32) * (-math.log(10000.0) / d_model)
    )
    pe = jnp.zeros((max_len, d_model), dtype=jnp.float32)
    pe = pe.at[:, 0::2].set(jnp.sin(position * div_term))
    pe = pe.at[:, 1::2].set(jnp.cos(position * div_term[: d_model // 2]))
    return pe


# --------------------------------------------------------------------------- #
# Fused whole-model kernel (one batch element per grid step)
# --------------------------------------------------------------------------- #
def _layernorm_f32(y, g, b, eps):
    mu = jnp.mean(y, axis=-1, keepdims=True)
    d = y - mu
    var = jnp.mean(d * d, axis=-1, keepdims=True)
    return d * jax.lax.rsqrt(var + eps) * g + b


def _fused_forward_kernel(src_ref, w_in_ref, b_in_ref, pe_ref,
                          wqkv_ref, bqkv_ref, wo_ref, bo_ref,
                          ln1_g_ref, ln1_b_ref, w1_ref, b1_ref,
                          w2_ref, b2_ref, ln2_g_ref, ln2_b_ref,
                          w_out_ref, b_out_ref, o_ref,
                          *, num_layers, model_dim, eps, compute_dtype):
    D = model_dim
    cdt = compute_dtype
    sqrt_d = math.sqrt(D)
    inv_sqrt_d = 1.0 / sqrt_d

    # ---- input projection (K zero-padded to lane width) + sqrt(D) scale + PE
    x = jnp.dot(src_ref[...], w_in_ref[...], preferred_element_type=jnp.float32)
    x = (x + b_in_ref[...].astype(jnp.float32)) * sqrt_d
    x = x + pe_ref[...].astype(jnp.float32)
    # TODO(synk): positional-encoding dropout is eval-mode identity here.

    for l in range(num_layers):        # static unroll; weights stay in VMEM
        # --- self-attention block (nhead=1, post-norm), fused QKV matmul ---
        qkv = jnp.dot(x.astype(cdt), wqkv_ref[l],
                      preferred_element_type=jnp.float32)
        qkv = qkv + bqkv_ref[l].astype(jnp.float32)
        q = qkv[:, :D] * inv_sqrt_d          # fold scale into q (N*D, not N*N)
        k = qkv[:, D:2 * D]
        v = qkv[:, 2 * D:]
        s = jax.lax.dot_general(q.astype(cdt), k.astype(cdt),
                                (((1,), (1,)), ((), ())),
                                preferred_element_type=jnp.float32)     # (N, N)
        s = s - jnp.max(s, axis=-1, keepdims=True)
        p = jnp.exp(s)
        p = p * (1.0 / jnp.sum(p, axis=-1, keepdims=True))
        ctx = jnp.dot(p.astype(cdt), v.astype(cdt),
                      preferred_element_type=jnp.float32)
        attn = jnp.dot(ctx.astype(cdt), wo_ref[l],
                       preferred_element_type=jnp.float32)
        attn = attn + bo_ref[l].astype(jnp.float32)
        # TODO(synk): attention / residual dropouts are eval-mode identity.
        x = _layernorm_f32(x + attn, ln1_g_ref[l].astype(jnp.float32),
                           ln1_b_ref[l].astype(jnp.float32), eps)

        # --- feed-forward block ---
        h = jnp.dot(x.astype(cdt), w1_ref[l], preferred_element_type=jnp.float32)
        h = jnp.maximum(h + b1_ref[l].astype(jnp.float32), 0.0)
        ff = jnp.dot(h.astype(cdt), w2_ref[l], preferred_element_type=jnp.float32)
        ff = ff + b2_ref[l].astype(jnp.float32)
        x = _layernorm_f32(x + ff, ln2_g_ref[l].astype(jnp.float32),
                           ln2_b_ref[l].astype(jnp.float32), eps)

    # ---- output projection (N zero-padded to lane width) + sigmoid ----
    y = jnp.dot(x.astype(cdt), w_out_ref[...], preferred_element_type=jnp.float32)
    y = jax.nn.sigmoid(y + b_out_ref[...].astype(jnp.float32))
    o_ref[...] = y.astype(o_ref.dtype)       # lane-dense (N, 128) store


def pixel_transformer_forward(src, params, *, model_dim, training=False,
                              dropout=0.1, compute_dtype=jnp.float32):
    """src: (batch, num_pixels, input_dim) -> (batch, num_pixels, input_dim)."""
    del training, dropout   # eval-mode numerics (dropout = identity); see TODOs
    B, N, C = src.shape
    D = model_dim
    L = params["wqkv"].shape[0]
    F = params["w1"].shape[-1]
    cdt = compute_dtype

    # Lane-dense padding (zero rows/cols are numerically inert).
    Cp = _round_up(C, _LANE)         # padded K of the input projection
    Op = _round_up(C, _LANE)         # padded N of the output projection
    src_p = jnp.pad(src, ((0, 0), (0, 0), (0, Cp - C))).astype(cdt)
    w_in_p = jnp.pad(params["w_in"], ((0, Cp - C), (0, 0))).astype(cdt)
    w_out_p = jnp.pad(params["w_out"], ((0, 0), (0, Op - C))).astype(cdt)
    b_out_p = jnp.pad(params["b_out"], (0, Op - C)).reshape(1, Op)

    pe = params["pe"][:N].astype(jnp.float32)
    b_in = params["b_in"].reshape(1, D)
    wqkv = params["wqkv"].astype(cdt)
    bqkv = params["bqkv"].reshape(L, 1, 3 * D)
    wo = params["wo"].astype(cdt)
    bo = params["bo"].reshape(L, 1, D)
    w1 = params["w1"].astype(cdt)
    b1 = params["b1"].reshape(L, 1, F)
    w2 = params["w2"].astype(cdt)
    b2 = params["b2"].reshape(L, 1, D)
    ln1_g = params["ln1_g"].reshape(L, 1, D)
    ln1_b = params["ln1_b"].reshape(L, 1, D)
    ln2_g = params["ln2_g"].reshape(L, 1, D)
    ln2_b = params["ln2_b"].reshape(L, 1, D)

    def full(shape):
        # Whole-array block, resident across all grid steps.
        return pl.BlockSpec(shape, lambda b: (0,) * len(shape))

    kernel = functools.partial(_fused_forward_kernel, num_layers=L,
                               model_dim=D, eps=1e-5, compute_dtype=cdt)
    out = pl.pallas_call(
        kernel,
        out_shape=jax.ShapeDtypeStruct((B, N, Op), jnp.float32),
        grid_spec=pltpu.PrefetchScalarGridSpec(
            num_scalar_prefetch=0,
            grid=(B,),                                   # parallel over batch
            in_specs=[
                pl.BlockSpec((None, N, Cp), lambda b: (b, 0, 0)),   # src
                full((Cp, D)), full((1, D)), full((N, D)),          # w_in, b_in, pe
                full((L, D, 3 * D)), full((L, 1, 3 * D)),           # wqkv, bqkv
                full((L, D, D)), full((L, 1, D)),                   # wo, bo
                full((L, 1, D)), full((L, 1, D)),                   # ln1_g, ln1_b
                full((L, D, F)), full((L, 1, F)),                   # w1, b1
                full((L, F, D)), full((L, 1, D)),                   # w2, b2
                full((L, 1, D)), full((L, 1, D)),                   # ln2_g, ln2_b
                full((D, Op)), full((1, Op)),                       # w_out, b_out
            ],
            out_specs=pl.BlockSpec((None, N, Op), lambda b: (b, 0, 0)),
        ),
        compiler_params=pltpu.CompilerParams(
            dimension_semantics=("parallel",),
            vmem_limit_bytes=_VMEM_LIMIT_BYTES),
    )(src_p, w_in_p, b_in, pe, wqkv, bqkv, wo, bo, ln1_g, ln1_b,
      w1, b1, w2, b2, ln2_g, ln2_b, w_out_p, b_out_p)
    return out[:, :, :C].astype(src.dtype)


# --------------------------------------------------------------------------- #
# Parameters + pure-JAX reference
# --------------------------------------------------------------------------- #
def init_params(key, num_pixels, input_dim, model_dim, num_layers, dim_feedforward):
    def xavier(k, shape):
        lim = math.sqrt(6.0 / (shape[0] + shape[1]))
        return jax.random.uniform(k, shape, jnp.float32, -lim, lim)

    keys = jax.random.split(key, 2 + num_layers)
    wqkv, wo, w1, w2 = [], [], [], []
    for li in range(num_layers):
        lk = jax.random.split(keys[2 + li], 6)
        wq = xavier(lk[0], (model_dim, model_dim))
        wk = xavier(lk[1], (model_dim, model_dim))
        wv = xavier(lk[2], (model_dim, model_dim))
        wqkv.append(jnp.concatenate([wq, wk, wv], axis=1))
        wo.append(xavier(lk[3], (model_dim, model_dim)))
        w1.append(xavier(lk[4], (model_dim, dim_feedforward)))
        w2.append(xavier(lk[5], (dim_feedforward, model_dim)))
    L = num_layers
    return {
        "w_in": xavier(keys[0], (input_dim, model_dim)),
        "b_in": jnp.zeros((model_dim,), jnp.float32),
        "w_out": xavier(keys[1], (model_dim, input_dim)),
        "b_out": jnp.zeros((input_dim,), jnp.float32),
        "pe": make_pe_buffer(model_dim, num_pixels),
        "wqkv": jnp.stack(wqkv), "bqkv": jnp.zeros((L, 3 * model_dim), jnp.float32),
        "wo": jnp.stack(wo), "bo": jnp.zeros((L, model_dim), jnp.float32),
        "w1": jnp.stack(w1), "b1": jnp.zeros((L, dim_feedforward), jnp.float32),
        "w2": jnp.stack(w2), "b2": jnp.zeros((L, model_dim), jnp.float32),
        "ln1_g": jnp.ones((L, model_dim), jnp.float32),
        "ln1_b": jnp.zeros((L, model_dim), jnp.float32),
        "ln2_g": jnp.ones((L, model_dim), jnp.float32),
        "ln2_b": jnp.zeros((L, model_dim), jnp.float32),
    }


def _layernorm_ref(x, g, b, eps=1e-5):
    mu = jnp.mean(x, axis=-1, keepdims=True)
    var = jnp.mean((x - mu) ** 2, axis=-1, keepdims=True)
    return (x - mu) * jax.lax.rsqrt(var + eps) * g + b


def reference_forward(src, params, model_dim):
    D = model_dim
    B, N, _ = src.shape
    x = (src @ params["w_in"] + params["b_in"]) * math.sqrt(D)
    x = x + params["pe"][None, :N, :]
    L = params["wqkv"].shape[0]
    for l in range(L):
        qkv = x @ params["wqkv"][l] + params["bqkv"][l]
        q, k, v = qkv[..., :D], qkv[..., D:2 * D], qkv[..., 2 * D:]
        s = jnp.einsum("bnd,bmd->bnm", q, k) / math.sqrt(D)
        a = jax.nn.softmax(s, axis=-1)
        ctx = jnp.einsum("bnm,bmd->bnd", a, v)
        attn = ctx @ params["wo"][l] + params["bo"][l]
        x = _layernorm_ref(x + attn, params["ln1_g"][l], params["ln1_b"][l])
        h = jax.nn.relu(x @ params["w1"][l] + params["b1"][l])
        ff = h @ params["w2"][l] + params["b2"][l]
        x = _layernorm_ref(x + ff, params["ln2_g"][l], params["ln2_b"][l])
    return jax.nn.sigmoid(x @ params["w_out"] + params["b_out"])


# --------------------------------------------------------------------------- #
if __name__ == "__main__":
    BATCH, NUM_PIXELS, INPUT_DIM = 2, 64, 3
    MODEL_DIM, NUM_LAYERS, DIM_FF = 128, 2, 256

    key = jax.random.PRNGKey(0)
    pkey, xkey = jax.random.split(key)
    params = init_params(pkey, NUM_PIXELS, INPUT_DIM, MODEL_DIM, NUM_LAYERS, DIM_FF)
    src = jax.random.uniform(xkey, (BATCH, NUM_PIXELS, INPUT_DIM), jnp.float32)

    fwd = jax.jit(functools.partial(pixel_transformer_forward, model_dim=MODEL_DIM))
    out = jax.block_until_ready(fwd(src, params))
    assert out.shape == (BATCH, NUM_PIXELS, INPUT_DIM)
    assert bool(jnp.all(jnp.isfinite(out)))
    assert bool(jnp.all((out >= 0.0) & (out <= 1.0)))   # sigmoid output range

    with jax.default_matmul_precision("highest"):
        ref = reference_forward(src, params, MODEL_DIM)
    err = float(jnp.max(jnp.abs(out - ref)))
    assert err < 5e-2, f"mismatch vs reference: max abs err = {err}"

    print("KERNEL_OK")
</pallas_src>

<mosaic_0001>
module attributes {stable_mosaic.version = 11 : i64} {
  func.func @_fused_forward_kernel(%arg0: i32, %arg1: memref<1x64x128xf32, #tpu.memory_space<vmem>>, %arg2: memref<128x128xf32, #tpu.memory_space<vmem>>, %arg3: memref<1x128xf32, #tpu.memory_space<vmem>>, %arg4: memref<64x128xf32, #tpu.memory_space<vmem>>, %arg5: memref<2x128x384xf32, #tpu.memory_space<vmem>>, %arg6: memref<2x1x384xf32, #tpu.memory_space<vmem>>, %arg7: memref<2x128x128xf32, #tpu.memory_space<vmem>>, %arg8: memref<2x1x128xf32, #tpu.memory_space<vmem>>, %arg9: memref<2x1x128xf32, #tpu.memory_space<vmem>>, %arg10: memref<2x1x128xf32, #tpu.memory_space<vmem>>, %arg11: memref<2x128x256xf32, #tpu.memory_space<vmem>>, %arg12: memref<2x1x256xf32, #tpu.memory_space<vmem>>, %arg13: memref<2x256x128xf32, #tpu.memory_space<vmem>>, %arg14: memref<2x1x128xf32, #tpu.memory_space<vmem>>, %arg15: memref<2x1x128xf32, #tpu.memory_space<vmem>>, %arg16: memref<2x1x128xf32, #tpu.memory_space<vmem>>, %arg17: memref<128x128xf32, #tpu.memory_space<vmem>>, %arg18: memref<1x128xf32, #tpu.memory_space<vmem>>, %arg19: memref<1x64x128xf32, #tpu.memory_space<vmem>>) attributes {dimension_semantics = [#tpu.dimension_semantics<parallel>], iteration_bounds = array<i64: 2>, scalar_prefetch = 0 : i64, scratch_operands = 0 : i64, tpu.core_type = #tpu.core_type<tc>, window_params = [{transform_indices = @transform_0, window_bounds = array<i64: 1, 64, 128>}, {pipeline_mode = #tpu.pipeline_mode<synchronous>, transform_indices = @transform_1, window_bounds = array<i64: 128, 128>}, {pipeline_mode = #tpu.pipeline_mode<synchronous>, transform_indices = @transform_2, window_bounds = array<i64: 1, 128>}, {pipeline_mode = #tpu.pipeline_mode<synchronous>, transform_indices = @transform_3, window_bounds = array<i64: 64, 128>}, {pipeline_mode = #tpu.pipeline_mode<synchronous>, transform_indices = @transform_4, window_bounds = array<i64: 2, 128, 384>}, {pipeline_mode = #tpu.pipeline_mode<synchronous>, transform_indices = @transform_5, window_bounds = array<i64: 2, 1, 384>}, {pipeline_mode = #tpu.pipeline_mode<synchronous>, transform_indices = @transform_6, window_bounds = array<i64: 2, 128, 128>}, {pipeline_mode = #tpu.pipeline_mode<synchronous>, transform_indices = @transform_7, window_bounds = array<i64: 2, 1, 128>}, {pipeline_mode = #tpu.pipeline_mode<synchronous>, transform_indices = @transform_8, window_bounds = array<i64: 2, 1, 128>}, {pipeline_mode = #tpu.pipeline_mode<synchronous>, transform_indices = @transform_9, window_bounds = array<i64: 2, 1, 128>}, {pipeline_mode = #tpu.pipeline_mode<synchronous>, transform_indices = @transform_10, window_bounds = array<i64: 2, 128, 256>}, {pipeline_mode = #tpu.pipeline_mode<synchronous>, transform_indices = @transform_11, window_bounds = array<i64: 2, 1, 256>}, {pipeline_mode = #tpu.pipeline_mode<synchronous>, transform_indices = @transform_12, window_bounds = array<i64: 2, 256, 128>}, {pipeline_mode = #tpu.pipeline_mode<synchronous>, transform_indices = @transform_13, window_bounds = array<i64: 2, 1, 128>}, {pipeline_mode = #tpu.pipeline_mode<synchronous>, transform_indices = @transform_14, window_bounds = array<i64: 2, 1, 128>}, {pipeline_mode = #tpu.pipeline_mode<synchronous>, transform_indices = @transform_15, window_bounds = array<i64: 2, 1, 128>}, {pipeline_mode = #tpu.pipeline_mode<synchronous>, transform_indices = @transform_16, window_bounds = array<i64: 128, 128>}, {pipeline_mode = #tpu.pipeline_mode<synchronous>, transform_indices = @transform_17, window_bounds = array<i64: 1, 128>}, {transform_indices = @transform_18, window_bounds = array<i64: 1, 64, 128>}]} {
    %c0 = arith.constant 0 : index
    %c0_0 = arith.constant 0 : index
    %c0_1 = arith.constant 0 : index
    %0 = vector.load %arg1[%c0, %c0_0, %c0_1] : memref<1x64x128xf32, #tpu.memory_space<vmem>>, vector<1x64x128xf32>
    %1 = vector.shape_cast %0 : vector<1x64x128xf32> to vector<64x128xf32>
    %c0_2 = arith.constant 0 : index
    %c0_3 = arith.constant 0 : index
    %2 = vector.load %arg2[%c0_2, %c0_3] : memref<128x128xf32, #tpu.memory_space<vmem>>, vector<128x128xf32>
    %cst = arith.constant dense<0.000000e+00> : vector<64x128xf32>
    %3 = tpu.matmul %1, %2, %cst {dimension_numbers = #tpu.dot_dimension_numbers<[1], [0], [0], [1], [0, 0, 1, 1], [], []>} : vector<64x128xf32>, vector<128x128xf32>, vector<64x128xf32> -> vector<64x128xf32>
    %c0_4 = arith.constant 0 : index
    %c0_5 = arith.constant 0 : index
    %4 = vector.load %arg3[%c0_4, %c0_5] : memref<1x128xf32, #tpu.memory_space<vmem>>, vector<1x128xf32>
    %5 = vector.broadcast %4 : vector<1x128xf32> to vector<64x128xf32>
    %6 = arith.addf %3, %5 : vector<64x128xf32>
    %cst_6 = arith.constant 11.3137083 : f32
    %7 = vector.broadcast %cst_6 : f32 to vector<64x128xf32>
    %8 = arith.mulf %6, %7 : vector<64x128xf32>
    %c0_7 = arith.constant 0 : index
    %c0_8 = arith.constant 0 : index
    %9 = vector.load %arg4[%c0_7, %c0_8] : memref<64x128xf32, #tpu.memory_space<vmem>>, vector<64x128xf32>
    %10 = arith.addf %8, %9 : vector<64x128xf32>
    %c0_9 = arith.constant 0 : index
    %c0_10 = arith.constant 0 : index
    %c0_11 = arith.constant 0 : index
    %11 = vector.load %arg5[%c0_9, %c0_10, %c0_11] : memref<2x128x384xf32, #tpu.memory_space<vmem>>, vector<1x128x384xf32>
    %12 = vector.shape_cast %11 : vector<1x128x384xf32> to vector<128x384xf32>
    %cst_12 = arith.constant dense<0.000000e+00> : vector<64x384xf32>
    %13 = tpu.matmul %10, %12, %cst_12 {dimension_numbers = #tpu.dot_dimension_numbers<[1], [0], [0], [1], [0, 0, 1, 1], [], []>} : vector<64x128xf32>, vector<128x384xf32>, vector<64x384xf32> -> vector<64x384xf32>
    %c0_13 = arith.constant 0 : index
    %c0_14 = arith.constant 0 : index
    %c0_15 = arith.constant 0 : index
    %14 = vector.load %arg6[%c0_13, %c0_14, %c0_15] : memref<2x1x384xf32, #tpu.memory_space<vmem>>, vector<1x1x384xf32>
    %15 = vector.shape_cast %14 : vector<1x1x384xf32> to vector<1x384xf32>
    %16 = vector.broadcast %15 : vector<1x384xf32> to vector<64x384xf32>
    %17 = arith.addf %13, %16 : vector<64x384xf32>
    %18 = vector.extract_strided_slice %17 {offsets = [0, 0], sizes = [64, 128], strides = [1, 1]} : vector<64x384xf32> to vector<64x128xf32>
    %cst_16 = arith.constant 0.0883883461 : f32
    %19 = vector.broadcast %cst_16 : f32 to vector<64x128xf32>
    %20 = arith.mulf %18, %19 : vector<64x128xf32>
    %21 = vector.extract_strided_slice %17 {offsets = [0, 128], sizes = [64, 128], strides = [1, 1]} : vector<64x384xf32> to vector<64x128xf32>
    %22 = vector.extract_strided_slice %17 {offsets = [0, 256], sizes = [64, 128], strides = [1, 1]} : vector<64x384xf32> to vector<64x128xf32>
    %cst_17 = arith.constant dense<0.000000e+00> : vector<64x64xf32>
    %23 = tpu.matmul %20, %21, %cst_17 {dimension_numbers = #tpu.dot_dimension_numbers<[1], [1], [0], [0], [0, 0, 1, 0], [], []>} : vector<64x128xf32>, vector<64x128xf32>, vector<64x64xf32> -> vector<64x64xf32>
    %cst_18 = arith.constant dense<0xFF800000> : vector<64xf32>
    %24 = vector.multi_reduction <maximumf>, %23, %cst_18 [1] : vector<64x64xf32> to vector<64xf32>
    %25 = vector.shape_cast %24 : vector<64xf32> to vector<64x1xf32>
    %26 = vector.broadcast %25 : vector<64x1xf32> to vector<64x64xf32>
    %27 = arith.subf %23, %26 : vector<64x64xf32>
    %28 = math.exp %27 : vector<64x64xf32>
    %cst_19 = arith.constant dense<0.000000e+00> : vector<64xf32>
    %29 = vector.multi_reduction <add>, %28, %cst_19 [1] : vector<64x64xf32> to vector<64xf32>
    %30 = vector.shape_cast %29 : vector<64xf32> to vector<64x1xf32>
    %cst_20 = arith.constant 1.000000e+00 : f32
    %31 = vector.broadcast %cst_20 : f32 to vector<64x1xf32>
    %32 = arith.divf %31, %30 : vector<64x1xf32>
    %33 = vector.broadcast %32 : vector<64x1xf32> to vector<64x64xf32>
    %34 = arith.mulf %28, %33 : vector<64x64xf32>
    %cst_21 = arith.constant dense<0.000000e+00> : vector<64x128xf32>
    %35 = tpu.matmul %34, %22, %cst_21 {dimension_numbers = #tpu.dot_dimension_numbers<[1], [0], [0], [1], [0, 0, 1, 1], [], []>} : vector<64x64xf32>, vector<64x128xf32>, vector<64x128xf32> -> vector<64x128xf32>
    %c0_22 = arith.constant 0 : index
    %c0_23 = arith.constant 0 : index
    %c0_24 = arith.constant 0 : index
    %36 = vector.load %arg7[%c0_22, %c0_23, %c0_24] : memref<2x128x128xf32, #tpu.memory_space<vmem>>, vector<1x128x128xf32>
    %37 = vector.shape_cast %36 : vector<1x128x128xf32> to vector<128x128xf32>
    %cst_25 = arith.constant dense<0.000000e+00> : vector<64x128xf32>
    %38 = tpu.matmul %35, %37, %cst_25 {dimension_numbers = #tpu.dot_dimension_numbers<[1], [0], [0], [1], [0, 0, 1, 1], [], []>} : vector<64x128xf32>, vector<128x128xf32>, vector<64x128xf32> -> vector<64x128xf32>
    %c0_26 = arith.constant 0 : index
    %c0_27 = arith.constant 0 : index
    %c0_28 = arith.constant 0 : index
    %39 = vector.load %arg8[%c0_26, %c0_27, %c0_28] : memref<2x1x128xf32, #tpu.memory_space<vmem>>, vector<1x1x128xf32>
    %40 = vector.shape_cast %39 : vector<1x1x128xf32> to vector<1x128xf32>
    %41 = vector.broadcast %40 : vector<1x128xf32> to vector<64x128xf32>
    %42 = arith.addf %38, %41 : vector<64x128xf32>
    %43 = arith.addf %10, %42 : vector<64x128xf32>
    %c0_29 = arith.constant 0 : index
    %c0_30 = arith.constant 0 : index
    %c0_31 = arith.constant 0 : index
    %44 = vector.load %arg9[%c0_29, %c0_30, %c0_31] : memref<2x1x128xf32, #tpu.memory_space<vmem>>, vector<1x1x128xf32>
    %45 = vector.shape_cast %44 : vector<1x1x128xf32> to vector<1x128xf32>
    %c0_32 = arith.constant 0 : index
    %c0_33 = arith.constant 0 : index
    %c0_34 = arith.constant 0 : index
    %46 = vector.load %arg10[%c0_32, %c0_33, %c0_34] : memref<2x1x128xf32, #tpu.memory_space<vmem>>, vector<1x1x128xf32>
    %47 = vector.shape_cast %46 : vector<1x1x128xf32> to vector<1x128xf32>
    %cst_35 = arith.constant dense<0.000000e+00> : vector<64xf32>
    %48 = vector.multi_reduction <add>, %43, %cst_35 [1] : vector<64x128xf32> to vector<64xf32>
    %49 = vector.shape_cast %48 : vector<64xf32> to vector<64x1xf32>
    %cst_36 = arith.constant 1.280000e+02 : f32
    %50 = vector.broadcast %cst_36 : f32 to vector<64x1xf32>
    %51 = arith.divf %49, %50 : vector<64x1xf32>
    %52 = vector.broadcast %51 : vector<64x1xf32> to vector<64x128xf32>
    %53 = arith.subf %43, %52 : vector<64x128xf32>
    %54 = arith.mulf %53, %53 : vector<64x128xf32>
    %cst_37 = arith.constant dense<0.000000e+00> : vector<64xf32>
    %55 = vector.multi_reduction <add>, %54, %cst_37 [1] : vector<64x128xf32> to vector<64xf32>
    %56 = vector.shape_cast %55 : vector<64xf32> to vector<64x1xf32>
    %cst_38 = arith.constant 1.280000e+02 : f32
    %57 = vector.broadcast %cst_38 : f32 to vector<64x1xf32>
    %58 = arith.divf %56, %57 : vector<64x1xf32>
    %cst_39 = arith.constant 9.99999974E-6 : f32
    %59 = vector.broadcast %cst_39 : f32 to vector<64x1xf32>
    %60 = arith.addf %58, %59 : vector<64x1xf32>
    %61 = math.rsqrt %60 : vector<64x1xf32>
    %62 = vector.broadcast %61 : vector<64x1xf32> to vector<64x128xf32>
    %63 = arith.mulf %53, %62 : vector<64x128xf32>
    %64 = vector.broadcast %45 : vector<1x128xf32> to vector<64x128xf32>
    %65 = arith.mulf %63, %64 : vector<64x128xf32>
    %66 = vector.broadcast %47 : vector<1x128xf32> to vector<64x128xf32>
    %67 = arith.addf %65, %66 : vector<64x128xf32>
    %c0_40 = arith.constant 0 : index
    %c0_41 = arith.constant 0 : index
    %c0_42 = arith.constant 0 : index
    %68 = vector.load %arg11[%c0_40, %c0_41, %c0_42] : memref<2x128x256xf32, #tpu.memory_space<vmem>>, vector<1x128x256xf32>
    %69 = vector.shape_cast %68 : vector<1x128x256xf32> to vector<128x256xf32>
    %cst_43 = arith.constant dense<0.000000e+00> : vector<64x256xf32>
    %70 = tpu.matmul %67, %69, %cst_43 {dimension_numbers = #tpu.dot_dimension_numbers<[1], [0], [0], [1], [0, 0, 1, 1], [], []>} : vector<64x128xf32>, vector<128x256xf32>, vector<64x256xf32> -> vector<64x256xf32>
    %c0_44 = arith.constant 0 : index
    %c0_45 = arith.constant 0 : index
    %c0_46 = arith.constant 0 : index
    %71 = vector.load %arg12[%c0_44, %c0_45, %c0_46] : memref<2x1x256xf32, #tpu.memory_space<vmem>>, vector<1x1x256xf32>
    %72 = vector.shape_cast %71 : vector<1x1x256xf32> to vector<1x256xf32>
    %73 = vector.broadcast %72 : vector<1x256xf32> to vector<64x256xf32>
    %74 = arith.addf %70, %73 : vector<64x256xf32>
    %cst_47 = arith.constant 0.000000e+00 : f32
    %75 = vector.broadcast %cst_47 : f32 to vector<64x256xf32>
    %76 = arith.maximumf %74, %75 : vector<64x256xf32>
    %c0_48 = arith.constant 0 : index
    %c0_49 = arith.constant 0 : index
    %c0_50 = arith.constant 0 : index
    %77 = vector.load %arg13[%c0_48, %c0_49, %c0_50] : memref<2x256x128xf32, #tpu.memory_space<vmem>>, vector<1x256x128xf32>
    %78 = vector.shape_cast %77 : vector<1x256x128xf32> to vector<256x128xf32>
    %cst_51 = arith.constant dense<0.000000e+00> : vector<64x128xf32>
    %79 = tpu.matmul %76, %78, %cst_51 {dimension_numbers = #tpu.dot_dimension_numbers<[1], [0], [0], [1], [0, 0, 1, 1], [], []>} : vector<64x256xf32>, vector<256x128xf32>, vector<64x128xf32> -> vector<64x128xf32>
    %c0_52 = arith.constant 0 : index
    %c0_53 = arith.constant 0 : index
    %c0_54 = arith.constant 0 : index
    %80 = vector.load %arg14[%c0_52, %c0_53, %c0_54] : memref<2x1x128xf32, #tpu.memory_space<vmem>>, vector<1x1x128xf32>
    %81 = vector.shape_cast %80 : vector<1x1x128xf32> to vector<1x128xf32>
    %82 = vector.broadcast %81 : vector<1x128xf32> to vector<64x128xf32>
    %83 = arith.addf %79, %82 : vector<64x128xf32>
    %84 = arith.addf %67, %83 : vector<64x128xf32>
    %c0_55 = arith.constant 0 : index
    %c0_56 = arith.constant 0 : index
    %c0_57 = arith.constant 0 : index
    %85 = vector.load %arg15[%c0_55, %c0_56, %c0_57] : memref<2x1x128xf32, #tpu.memory_space<vmem>>, vector<1x1x128xf32>
    %86 = vector.shape_cast %85 : vector<1x1x128xf32> to vector<1x128xf32>
    %c0_58 = arith.constant 0 : index
    %c0_59 = arith.constant 0 : index
    %c0_60 = arith.constant 0 : index
    %87 = vector.load %arg16[%c0_58, %c0_59, %c0_60] : memref<2x1x128xf32, #tpu.memory_space<vmem>>, vector<1x1x128xf32>
    %88 = vector.shape_cast %87 : vector<1x1x128xf32> to vector<1x128xf32>
    %cst_61 = arith.constant dense<0.000000e+00> : vector<64xf32>
    %89 = vector.multi_reduction <add>, %84, %cst_61 [1] : vector<64x128xf32> to vector<64xf32>
    %90 = vector.shape_cast %89 : vector<64xf32> to vector<64x1xf32>
    %cst_62 = arith.constant 1.280000e+02 : f32
    %91 = vector.broadcast %cst_62 : f32 to vector<64x1xf32>
    %92 = arith.divf %90, %91 : vector<64x1xf32>
    %93 = vector.broadcast %92 : vector<64x1xf32> to vector<64x128xf32>
    %94 = arith.subf %84, %93 : vector<64x128xf32>
    %95 = arith.mulf %94, %94 : vector<64x128xf32>
    %cst_63 = arith.constant dense<0.000000e+00> : vector<64xf32>
    %96 = vector.multi_reduction <add>, %95, %cst_63 [1] : vector<64x128xf32> to vector<64xf32>
    %97 = vector.shape_cast %96 : vector<64xf32> to vector<64x1xf32>
    %cst_64 = arith.constant 1.280000e+02 : f32
    %98 = vector.broadcast %cst_64 : f32 to vector<64x1xf32>
    %99 = arith.divf %97, %98 : vector<64x1xf32>
    %cst_65 = arith.constant 9.99999974E-6 : f32
    %100 = vector.broadcast %cst_65 : f32 to vector<64x1xf32>
    %101 = arith.addf %99, %100 : vector<64x1xf32>
    %102 = math.rsqrt %101 : vector<64x1xf32>
    %103 = vector.broadcast %102 : vector<64x1xf32> to vector<64x128xf32>
    %104 = arith.mulf %94, %103 : vector<64x128xf32>
    %105 = vector.broadcast %86 : vector<1x128xf32> to vector<64x128xf32>
    %106 = arith.mulf %104, %105 : vector<64x128xf32>
    %107 = vector.broadcast %88 : vector<1x128xf32> to vector<64x128xf32>
    %108 = arith.addf %106, %107 : vector<64x128xf32>
    %c1 = arith.constant 1 : index
    %c0_66 = arith.constant 0 : index
    %c0_67 = arith.constant 0 : index
    %109 = vector.load %arg5[%c1, %c0_66, %c0_67] : memref<2x128x384xf32, #tpu.memory_space<vmem>>, vector<1x128x384xf32>
    %110 = vector.shape_cast %109 : vector<1x128x384xf32> to vector<128x384xf32>
    %cst_68 = arith.constant dense<0.000000e+00> : vector<64x384xf32>
    %111 = tpu.matmul %108, %110, %cst_68 {dimension_numbers = #tpu.dot_dimension_numbers<[1], [0], [0], [1], [0, 0, 1, 1], [], []>} : vector<64x128xf32>, vector<128x384xf32>, vector<64x384xf32> -> vector<64x384xf32>
    %c1_69 = arith.constant 1 : index
    %c0_70 = arith.constant 0 : index
    %c0_71 = arith.constant 0 : index
    %112 = vector.load %arg6[%c1_69, %c0_70, %c0_71] : memref<2x1x384xf32, #tpu.memory_space<vmem>>, vector<1x1x384xf32>
    %113 = vector.shape_cast %112 : vector<1x1x384xf32> to vector<1x384xf32>
    %114 = vector.broadcast %113 : vector<1x384xf32> to vector<64x384xf32>
    %115 = arith.addf %111, %114 : vector<64x384xf32>
    %116 = vector.extract_strided_slice %115 {offsets = [0, 0], sizes = [64, 128], strides = [1, 1]} : vector<64x384xf32> to vector<64x128xf32>
    %cst_72 = arith.constant 0.0883883461 : f32
    %117 = vector.broadcast %cst_72 : f32 to vector<64x128xf32>
    %118 = arith.mulf %116, %117 : vector<64x128xf32>
    %119 = vector.extract_strided_slice %115 {offsets = [0, 128], sizes = [64, 128], strides = [1, 1]} : vector<64x384xf32> to vector<64x128xf32>
    %120 = vector.extract_strided_slice %115 {offsets = [0, 256], sizes = [64, 128], strides = [1, 1]} : vector<64x384xf32> to vector<64x128xf32>
    %cst_73 = arith.constant dense<0.000000e+00> : vector<64x64xf32>
    %121 = tpu.matmul %118, %119, %cst_73 {dimension_numbers = #tpu.dot_dimension_numbers<[1], [1], [0], [0], [0, 0, 1, 0], [], []>} : vector<64x128xf32>, vector<64x128xf32>, vector<64x64xf32> -> vector<64x64xf32>
    %cst_74 = arith.constant dense<0xFF800000> : vector<64xf32>
    %122 = vector.multi_reduction <maximumf>, %121, %cst_74 [1] : vector<64x64xf32> to vector<64xf32>
    %123 = vector.shape_cast %122 : vector<64xf32> to vector<64x1xf32>
    %124 = vector.broadcast %123 : vector<64x1xf32> to vector<64x64xf32>
    %125 = arith.subf %121, %124 : vector<64x64xf32>
    %126 = math.exp %125 : vector<64x64xf32>
    %cst_75 = arith.constant dense<0.000000e+00> : vector<64xf32>
    %127 = vector.multi_reduction <add>, %126, %cst_75 [1] : vector<64x64xf32> to vector<64xf32>
    %128 = vector.shape_cast %127 : vector<64xf32> to vector<64x1xf32>
    %cst_76 = arith.constant 1.000000e+00 : f32
    %129 = vector.broadcast %cst_76 : f32 to vector<64x1xf32>
    %130 = arith.divf %129, %128 : vector<64x1xf32>
    %131 = vector.broadcast %130 : vector<64x1xf32> to vector<64x64xf32>
    %132 = arith.mulf %126, %131 : vector<64x64xf32>
    %cst_77 = arith.constant dense<0.000000e+00> : vector<64x128xf32>
    %133 = tpu.matmul %132, %120, %cst_77 {dimension_numbers = #tpu.dot_dimension_numbers<[1], [0], [0], [1], [0, 0, 1, 1], [], []>} : vector<64x64xf32>, vector<64x128xf32>, vector<64x128xf32> -> vector<64x128xf32>
    %c1_78 = arith.constant 1 : index
    %c0_79 = arith.constant 0 : index
    %c0_80 = arith.constant 0 : index
    %134 = vector.load %arg7[%c1_78, %c0_79, %c0_80] : memref<2x128x128xf32, #tpu.memory_space<vmem>>, vector<1x128x128xf32>
    %135 = vector.shape_cast %134 : vector<1x128x128xf32> to vector<128x128xf32>
    %cst_81 = arith.constant dense<0.000000e+00> : vector<64x128xf32>
    %136 = tpu.matmul %133, %135, %cst_81 {dimension_numbers = #tpu.dot_dimension_numbers<[1], [0], [0], [1], [0, 0, 1, 1], [], []>} : vector<64x128xf32>, vector<128x128xf32>, vector<64x128xf32> -> vector<64x128xf32>
    %c1_82 = arith.constant 1 : index
    %c0_83 = arith.constant 0 : index
    %c0_84 = arith.constant 0 : index
    %137 = vector.load %arg8[%c1_82, %c0_83, %c0_84] : memref<2x1x128xf32, #tpu.memory_space<vmem>>, vector<1x1x128xf32>
    %138 = vector.shape_cast %137 : vector<1x1x128xf32> to vector<1x128xf32>
    %139 = vector.broadcast %138 : vector<1x128xf32> to vector<64x128xf32>
    %140 = arith.addf %136, %139 : vector<64x128xf32>
    %141 = arith.addf %108, %140 : vector<64x128xf32>
    %c1_85 = arith.constant 1 : index
    %c0_86 = arith.constant 0 : index
    %c0_87 = arith.constant 0 : index
    %142 = vector.load %arg9[%c1_85, %c0_86, %c0_87] : memref<2x1x128xf32, #tpu.memory_space<vmem>>, vector<1x1x128xf32>
    %143 = vector.shape_cast %142 : vector<1x1x128xf32> to vector<1x128xf32>
    %c1_88 = arith.constant 1 : index
    %c0_89 = arith.constant 0 : index
    %c0_90 = arith.constant 0 : index
    %144 = vector.load %arg10[%c1_88, %c0_89, %c0_90] : memref<2x1x128xf32, #tpu.memory_space<vmem>>, vector<1x1x128xf32>
    %145 = vector.shape_cast %144 : vector<1x1x128xf32> to vector<1x128xf32>
    %cst_91 = arith.constant dense<0.000000e+00> : vector<64xf32>
    %146 = vector.multi_reduction <add>, %141, %cst_91 [1] : vector<64x128xf32> to vector<64xf32>
    %147 = vector.shape_cast %146 : vector<64xf32> to vector<64x1xf32>
    %cst_92 = arith.constant 1.280000e+02 : f32
    %148 = vector.broadcast %cst_92 : f32 to vector<64x1xf32>
    %149 = arith.divf %147, %148 : vector<64x1xf32>
    %150 = vector.broadcast %149 : vector<64x1xf32> to vector<64x128xf32>
    %151 = arith.subf %141, %150 : vector<64x128xf32>
    %152 = arith.mulf %151, %151 : vector<64x128xf32>
    %cst_93 = arith.constant dense<0.000000e+00> : vector<64xf32>
    %153 = vector.multi_reduction <add>, %152, %cst_93 [1] : vector<64x128xf32> to vector<64xf32>
    %154 = vector.shape_cast %153 : vector<64xf32> to vector<64x1xf32>
    %cst_94 = arith.constant 1.280000e+02 : f32
    %155 = vector.broadcast %cst_94 : f32 to vector<64x1xf32>
    %156 = arith.divf %154, %155 : vector<64x1xf32>
    %cst_95 = arith.constant 9.99999974E-6 : f32
    %157 = vector.broadcast %cst_95 : f32 to vector<64x1xf32>
    %158 = arith.addf %156, %157 : vector<64x1xf32>
    %159 = math.rsqrt %158 : vector<64x1xf32>
    %160 = vector.broadcast %159 : vector<64x1xf32> to vector<64x128xf32>
    %161 = arith.mulf %151, %160 : vector<64x128xf32>
    %162 = vector.broadcast %143 : vector<1x128xf32> to vector<64x128xf32>
    %163 = arith.mulf %161, %162 : vector<64x128xf32>
    %164 = vector.broadcast %145 : vector<1x128xf32> to vector<64x128xf32>
    %165 = arith.addf %163, %164 : vector<64x128xf32>
    %c1_96 = arith.constant 1 : index
    %c0_97 = arith.constant 0 : index
    %c0_98 = arith.constant 0 : index
    %166 = vector.load %arg11[%c1_96, %c0_97, %c0_98] : memref<2x128x256xf32, #tpu.memory_space<vmem>>, vector<1x128x256xf32>
    %167 = vector.shape_cast %166 : vector<1x128x256xf32> to vector<128x256xf32>
    %cst_99 = arith.constant dense<0.000000e+00> : vector<64x256xf32>
    %168 = tpu.matmul %165, %167, %cst_99 {dimension_numbers = #tpu.dot_dimension_numbers<[1], [0], [0], [1], [0, 0, 1, 1], [], []>} : vector<64x128xf32>, vector<128x256xf32>, vector<64x256xf32> -> vector<64x256xf32>
    %c1_100 = arith.constant 1 : index
    %c0_101 = arith.constant 0 : index
    %c0_102 = arith.constant 0 : index
    %169 = vector.load %arg12[%c1_100, %c0_101, %c0_102] : memref<2x1x256xf32, #tpu.memory_space<vmem>>, vector<1x1x256xf32>
    %170 = vector.shape_cast %169 : vector<1x1x256xf32> to vector<1x256xf32>
    %171 = vector.broadcast %170 : vector<1x256xf32> to vector<64x256xf32>
    %172 = arith.addf %168, %171 : vector<64x256xf32>
    %cst_103 = arith.constant 0.000000e+00 : f32
    %173 = vector.broadcast %cst_103 : f32 to vector<64x256xf32>
    %174 = arith.maximumf %172, %173 : vector<64x256xf32>
    %c1_104 = arith.constant 1 : index
    %c0_105 = arith.constant 0 : index
    %c0_106 = arith.constant 0 : index
    %175 = vector.load %arg13[%c1_104, %c0_105, %c0_106] : memref<2x256x128xf32, #tpu.memory_space<vmem>>, vector<1x256x128xf32>
    %176 = vector.shape_cast %175 : vector<1x256x128xf32> to vector<256x128xf32>
    %cst_107 = arith.constant dense<0.000000e+00> : vector<64x128xf32>
    %177 = tpu.matmul %174, %176, %cst_107 {dimension_numbers = #tpu.dot_dimension_numbers<[1], [0], [0], [1], [0, 0, 1, 1], [], []>} : vector<64x256xf32>, vector<256x128xf32>, vector<64x128xf32> -> vector<64x128xf32>
    %c1_108 = arith.constant 1 : index
    %c0_109 = arith.constant 0 : index
    %c0_110 = arith.constant 0 : index
    %178 = vector.load %arg14[%c1_108, %c0_109, %c0_110] : memref<2x1x128xf32, #tpu.memory_space<vmem>>, vector<1x1x128xf32>
    %179 = vector.shape_cast %178 : vector<1x1x128xf32> to vector<1x128xf32>
    %180 = vector.broadcast %179 : vector<1x128xf32> to vector<64x128xf32>
    %181 = arith.addf %177, %180 : vector<64x128xf32>
    %182 = arith.addf %165, %181 : vector<64x128xf32>
    %c1_111 = arith.constant 1 : index
    %c0_112 = arith.constant 0 : index
    %c0_113 = arith.constant 0 : index
    %183 = vector.load %arg15[%c1_111, %c0_112, %c0_113] : memref<2x1x128xf32, #tpu.memory_space<vmem>>, vector<1x1x128xf32>
    %184 = vector.shape_cast %183 : vector<1x1x128xf32> to vector<1x128xf32>
    %c1_114 = arith.constant 1 : index
    %c0_115 = arith.constant 0 : index
    %c0_116 = arith.constant 0 : index
    %185 = vector.load %arg16[%c1_114, %c0_115, %c0_116] : memref<2x1x128xf32, #tpu.memory_space<vmem>>, vector<1x1x128xf32>
    %186 = vector.shape_cast %185 : vector<1x1x128xf32> to vector<1x128xf32>
    %cst_117 = arith.constant dense<0.000000e+00> : vector<64xf32>
    %187 = vector.multi_reduction <add>, %182, %cst_117 [1] : vector<64x128xf32> to vector<64xf32>
    %188 = vector.shape_cast %187 : vector<64xf32> to vector<64x1xf32>
    %cst_118 = arith.constant 1.280000e+02 : f32
    %189 = vector.broadcast %cst_118 : f32 to vector<64x1xf32>
    %190 = arith.divf %188, %189 : vector<64x1xf32>
    %191 = vector.broadcast %190 : vector<64x1xf32> to vector<64x128xf32>
    %192 = arith.subf %182, %191 : vector<64x128xf32>
    %193 = arith.mulf %192, %192 : vector<64x128xf32>
    %cst_119 = arith.constant dense<0.000000e+00> : vector<64xf32>
    %194 = vector.multi_reduction <add>, %193, %cst_119 [1] : vector<64x128xf32> to vector<64xf32>
    %195 = vector.shape_cast %194 : vector<64xf32> to vector<64x1xf32>
    %cst_120 = arith.constant 1.280000e+02 : f32
    %196 = vector.broadcast %cst_120 : f32 to vector<64x1xf32>
    %197 = arith.divf %195, %196 : vector<64x1xf32>
    %cst_121 = arith.constant 9.99999974E-6 : f32
    %198 = vector.broadcast %cst_121 : f32 to vector<64x1xf32>
    %199 = arith.addf %197, %198 : vector<64x1xf32>
    %200 = math.rsqrt %199 : vector<64x1xf32>
    %201 = vector.broadcast %200 : vector<64x1xf32> to vector<64x128xf32>
    %202 = arith.mulf %192, %201 : vector<64x128xf32>
    %203 = vector.broadcast %184 : vector<1x128xf32> to vector<64x128xf32>
    %204 = arith.mulf %202, %203 : vector<64x128xf32>
    %205 = vector.broadcast %186 : vector<1x128xf32> to vector<64x128xf32>
    %206 = arith.addf %204, %205 : vector<64x128xf32>
    %c0_122 = arith.constant 0 : index
    %c0_123 = arith.constant 0 : index
    %207 = vector.load %arg17[%c0_122, %c0_123] : memref<128x128xf32, #tpu.memory_space<vmem>>, vector<128x128xf32>
    %cst_124 = arith.constant dense<0.000000e+00> : vector<64x128xf32>
    %208 = tpu.matmul %206, %207, %cst_124 {dimension_numbers = #tpu.dot_dimension_numbers<[1], [0], [0], [1], [0, 0, 1, 1], [], []>} : vector<64x128xf32>, vector<128x128xf32>, vector<64x128xf32> -> vector<64x128xf32>
    %c0_125 = arith.constant 0 : index
    %c0_126 = arith.constant 0 : index
    %209 = vector.load %arg18[%c0_125, %c0_126] : memref<1x128xf32, #tpu.memory_space<vmem>>, vector<1x128xf32>
    %210 = vector.broadcast %209 : vector<1x128xf32> to vector<64x128xf32>
    %211 = arith.addf %208, %210 : vector<64x128xf32>
    %212 = arith.negf %211 : vector<64x128xf32>
    %213 = math.exp %212 : vector<64x128xf32>
    %cst_127 = arith.constant 1.000000e+00 : f32
    %214 = vector.broadcast %cst_127 : f32 to vector<64x128xf32>
    %215 = arith.addf %214, %213 : vector<64x128xf32>
    %216 = arith.divf %214, %215 : vector<64x128xf32>
    %c0_128 = arith.constant 0 : index
    %c0_129 = arith.constant 0 : index
    %c0_130 = arith.constant 0 : index
    %217 = vector.load %arg19[%c0_128, %c0_129, %c0_130] : memref<1x64x128xf32, #tpu.memory_space<vmem>>, vector<1x64x128xf32>
    %218 = vector.shape_cast %217 : vector<1x64x128xf32> to vector<64x128xf32>
    %219 = vector.shape_cast %216 : vector<64x128xf32> to vector<1x64x128xf32>
    tpu.vector_store %arg19[%c0_128, %c0_129, %c0_130], %219 {strides = array<i32>} : memref<1x64x128xf32, #tpu.memory_space<vmem>>, vector<1x64x128xf32>,
    return
  }
  func.func @transform_0(%arg0: i32) -> (i32, i32, i32) {
    %c0_i32 = arith.constant 0 : i32
    %c0_i32_0 = arith.constant 0 : i32
    %c0_i32_1 = arith.constant 0 : i32
    return %arg0, %c0_i32, %c0_i32_0 : i32, i32, i32
  }
  func.func @transform_1(%arg0: i32) -> (i32, i32) {
    %c0_i32 = arith.constant 0 : i32
    %c0_i32_0 = arith.constant 0 : i32
    %c0_i32_1 = arith.constant 0 : i32
    return %c0_i32, %c0_i32_0 : i32, i32
  }
  func.func @transform_2(%arg0: i32) -> (i32, i32) {
    %c0_i32 = arith.constant 0 : i32
    %c0_i32_0 = arith.constant 0 : i32
    %c0_i32_1 = arith.constant 0 : i32
    return %c0_i32, %c0_i32_0 : i32, i32
  }
  func.func @transform_3(%arg0: i32) -> (i32, i32) {
    %c0_i32 = arith.constant 0 : i32
    %c0_i32_0 = arith.constant 0 : i32
    %c0_i32_1 = arith.constant 0 : i32
    return %c0_i32, %c0_i32_0 : i32, i32
  }
  func.func @transform_4(%arg0: i32) -> (i32, i32, i32) {
    %c0_i32 = arith.constant 0 : i32
    %c0_i32_0 = arith.constant 0 : i32
    %c0_i32_1 = arith.constant 0 : i32
    %c0_i32_2 = arith.constant 0 : i32
    return %c0_i32, %c0_i32_0, %c0_i32_1 : i32, i32, i32
  }
  func.func @transform_5(%arg0: i32) -> (i32, i32, i32) {
    %c0_i32 = arith.constant 0 : i32
    %c0_i32_0 = arith.constant 0 : i32
    %c0_i32_1 = arith.constant 0 : i32
    %c0_i32_2 = arith.constant 0 : i32
    return %c0_i32, %c0_i32_0, %c0_i32_1 : i32, i32, i32
  }
  func.func @transform_6(%arg0: i32) -> (i32, i32, i32) {
    %c0_i32 = arith.constant 0 : i32
    %c0_i32_0 = arith.constant 0 : i32
    %c0_i32_1 = arith.constant 0 : i32
    %c0_i32_2 = arith.constant 0 : i32
    return %c0_i32, %c0_i32_0, %c0_i32_1 : i32, i32, i32
  }
  func.func @transform_7(%arg0: i32) -> (i32, i32, i32) {
    %c0_i32 = arith.constant 0 : i32
    %c0_i32_0 = arith.constant 0 : i32
    %c0_i32_1 = arith.constant 0 : i32
    %c0_i32_2 = arith.constant 0 : i32
    return %c0_i32, %c0_i32_0, %c0_i32_1 : i32, i32, i32
  }
  func.func @transform_8(%arg0: i32) -> (i32, i32, i32) {
    %c0_i32 = arith.constant 0 : i32
    %c0_i32_0 = arith.constant 0 : i32
    %c0_i32_1 = arith.constant 0 : i32
    %c0_i32_2 = arith.constant 0 : i32
    return %c0_i32, %c0_i32_0, %c0_i32_1 : i32, i32, i32
  }
  func.func @transform_9(%arg0: i32) -> (i32, i32, i32) {
    %c0_i32 = arith.constant 0 : i32
    %c0_i32_0 = arith.constant 0 : i32
    %c0_i32_1 = arith.constant 0 : i32
    %c0_i32_2 = arith.constant 0 : i32
    return %c0_i32, %c0_i32_0, %c0_i32_1 : i32, i32, i32
  }
  func.func @transform_10(%arg0: i32) -> (i32, i32, i32) {
    %c0_i32 = arith.constant 0 : i32
    %c0_i32_0 = arith.constant 0 : i32
    %c0_i32_1 = arith.constant 0 : i32
    %c0_i32_2 = arith.constant 0 : i32
    return %c0_i32, %c0_i32_0, %c0_i32_1 : i32, i32, i32
  }
  func.func @transform_11(%arg0: i32) -> (i32, i32, i32) {
    %c0_i32 = arith.constant 0 : i32
    %c0_i32_0 = arith.constant 0 : i32
    %c0_i32_1 = arith.constant 0 : i32
    %c0_i32_2 = arith.constant 0 : i32
    return %c0_i32, %c0_i32_0, %c0_i32_1 : i32, i32, i32
  }
  func.func @transform_12(%arg0: i32) -> (i32, i32, i32) {
    %c0_i32 = arith.constant 0 : i32
    %c0_i32_0 = arith.constant 0 : i32
    %c0_i32_1 = arith.constant 0 : i32
    %c0_i32_2 = arith.constant 0 : i32
    return %c0_i32, %c0_i32_0, %c0_i32_1 : i32, i32, i32
  }
  func.func @transform_13(%arg0: i32) -> (i32, i32, i32) {
    %c0_i32 = arith.constant 0 : i32
    %c0_i32_0 = arith.constant 0 : i32
    %c0_i32_1 = arith.constant 0 : i32
    %c0_i32_2 = arith.constant 0 : i32
    return %c0_i32, %c0_i32_0, %c0_i32_1 : i32, i32, i32
  }
  func.func @transform_14(%arg0: i32) -> (i32, i32, i32) {
    %c0_i32 = arith.constant 0 : i32
    %c0_i32_0 = arith.constant 0 : i32
    %c0_i32_1 = arith.constant 0 : i32
    %c0_i32_2 = arith.constant 0 : i32
    return %c0_i32, %c0_i32_0, %c0_i32_1 : i32, i32, i32
  }
  func.func @transform_15(%arg0: i32) -> (i32, i32, i32) {
    %c0_i32 = arith.constant 0 : i32
    %c0_i32_0 = arith.constant 0 : i32
    %c0_i32_1 = arith.constant 0 : i32
    %c0_i32_2 = arith.constant 0 : i32
    return %c0_i32, %c0_i32_0, %c0_i32_1 : i32, i32, i32
  }
  func.func @transform_16(%arg0: i32) -> (i32, i32) {
    %c0_i32 = arith.constant 0 : i32
    %c0_i32_0 = arith.constant 0 : i32
    %c0_i32_1 = arith.constant 0 : i32
    return %c0_i32, %c0_i32_0 : i32, i32
  }
  func.func @transform_17(%arg0: i32) -> (i32, i32) {
    %c0_i32 = arith.constant 0 : i32
    %c0_i32_0 = arith.constant 0 : i32
    %c0_i32_1 = arith.constant 0 : i32
    return %c0_i32, %c0_i32_0 : i32, i32
  }
  func.func @transform_18(%arg0: i32) -> (i32, i32, i32) {
    %c0_i32 = arith.constant 0 : i32
    %c0_i32_0 = arith.constant 0 : i32
    %c0_i32_1 = arith.constant 0 : i32
    return %arg0, %c0_i32, %c0_i32_0 : i32, i32, i32
  }
}

</mosaic_0001>

<bundles_post_ra>
// kernel: pixel_transformer_forward.1
= control target key start
LH: loop header
LB: loop body
LE: loop exit
PB: predicated region body
PF: predicated region fallthrough
CT: control target
= control target key end

     0   :  { %s5129_s0 = inlined_call_operand.vmem [shape: f32[2,64,128], index: 0, kind: input, shape index: {}]   ;;  %s5130_s1 = inlined_call_operand.vmem [shape: f32[128,128], index: 1, kind: input, shape index: {}]   ;;  %s5131_s2 = inlined_call_operand.vmem [shape: f32[1,128], index: 2, kind: input, shape index: {}]   ;;  %s5132_s3 = inlined_call_operand.vmem [shape: f32[64,128], index: 3, kind: input, shape index: {}]   ;;  %s5133_s4 = inlined_call_operand.hbm [shape: f32[2,128,384], index: 4, kind: input, shape index: {}]   ;;  %s5134_s5 = inlined_call_operand.vmem [shape: f32[2,1,384], index: 5, kind: input, shape index: {}]   ;;  %s5135_s6 = inlined_call_operand.vmem [shape: f32[2,128,128], index: 6, kind: input, shape index: {}]   ;;  %s5136_s7 = inlined_call_operand.vmem [shape: f32[2,1,128], index: 7, kind: input, shape index: {}]   ;;  %s5137_s8 = inlined_call_operand.vmem [shape: f32[2,1,128], index: 8, kind: input, shape index: {}]   ;;  %s5138_s9 = inlined_call_operand.vmem [shape: f32[2,1,128], index: 9, kind: input, shape index: {}]   ;;  %s5139_s10 = inlined_call_operand.vmem [shape: f32[2,128,256], index: 10, kind: input, shape index: {}]   ;;  %s5140_s11 = inlined_call_operand.vmem [shape: f32[2,1,256], index: 11, kind: input, shape index: {}]   ;;  %s5141_s12 = inlined_call_operand.hbm [shape: f32[2,256,128], index: 12, kind: input, shape index: {}]   ;;  %s5142_s13 = inlined_call_operand.vmem [shape: f32[2,1,128], index: 13, kind: input, shape index: {}]   ;;  %s5143_s14 = inlined_call_operand.vmem [shape: f32[2,1,128], index: 14, kind: input, shape index: {}]   ;;  %s5144_s15 = inlined_call_operand.vmem [shape: f32[2,1,128], index: 15, kind: input, shape index: {}]   ;;  %s5145_s16 = inlined_call_operand.vmem [shape: f32[128,128], index: 16, kind: input, shape index: {}]   ;;  %s5146_s17 = inlined_call_operand.vmem [shape: f32[1,128], index: 17, kind: input, shape index: {}]   ;;  %s5147_s18 = inlined_call_operand.vmem [shape: f32[2,64,128], index: 18, kind: output, shape index: {}]  }
   0x1   :  { %5149 = sst [smem:[#allocation8_spill]] %s5129_s0 }
   0x2   :  { %5150 = sst [smem:[#allocation9_spill]] %s5130_s1 }
   0x3   :  { %5151 = sst [smem:[#allocation10_spill]] %s5131_s2 }
   0x4   :  { %23 = vsyncpa [#allocation3], 0 }
   0x5   :  { %24 = vsyncpa [#allocation5], 0  ;;  %s3922_s27 = smov 0  }
   0x6 LB: > { %s464_s30 = sshll.u32 %s5133_s4, 4  ;;  %s3931_s0 = sadd.s32 4294967295, %s3818_s27   ;;  %s3818_s27 = sphi %s3922_s27, %s30_s27   ;;  %s465_s30 = int_to_ptr.hbm [resolvable:$true] %s464_s30 }
   0x7   : > { %p3407_p0 = scmp.ge.s32.totalorder %s3818_s27, 1  ;;  %p444_p1 = scmp.lt.s32.totalorder %s3818_s27, 3 }
   0x8   : > { %p3549_p2 = scmp.eq.s32.totalorder %s3931_s0, 0  ;;  %s3820_s1 = smov [#allocation2]  }
   0x9   : > { %p3936_p3 = pnand %p3407_p0, %p444_p1  ;;  %s466_s20 = sshll.u32 %s3820_s1, 4  ;;  %s467_s20 = int_to_ptr.vmem [resolvable:$true] %s466_s20 }
   0xa   : > { %s499_s2 = sshll.u32 %s5141_s12, 4  ;;  %s3821_s23 = smov [#allocation4]   ;;  %s500_s2 = int_to_ptr.hbm [resolvable:$true] %s499_s2 }
   0xb   : > { %p3542_p4 = pneg %p3936_p3  ;;  %s501_s24 = sshll.u32 %s3821_s23, 4  ;;  %s502_s24 = int_to_ptr.vmem [resolvable:$true] %s501_s24 }
   0xc   : > { %s3822_s25 = smov 384   ;;  %s3823_s26 = smov 24  }
   0xd   : > { %p3543_p5 = pnand %p3549_p2, %p3542_p4  ;;  %s3824_s28 = smov 128  }
   0xe   : > { %s3825_s29 = smov 8   ;;  %540 = sbr.rel (%p3936_p3) target bundleno = 3900 (0xf3c), region = 92 }
   0xf   : > { %3545 = dma.hbm_to_vmem [thread:$0]  (!%p3543_p5), %s465_s30, 12288, %s467_s20, [#allocation3], %s3822_s25, %s3822_s25, %s3823_s26  }
  0x10   : > { %3548 = dma.hbm_to_vmem [thread:$0]  (!%p3543_p5), %s500_s2, 8192, %s502_s24, [#allocation5], %s3824_s28, %s3824_s28, %s3825_s29  }
  0x13   : > { %3809 = dma.done.wait (%p3549_p2), [#allocation3], 12288  }
  0x14   : > { %3811 = vsyncadd (%p3549_p2), [#allocation3], 4294955008 }
  0x15   : > { %3813 = dma.done.wait (%p3549_p2), [#allocation5], 8192  }
  0x16   : > { %3815 = vsyncadd (%p3549_p2), [#allocation5], 4294959104  ;;  %s5153_s20 = sld [smem:[#allocation9_spill]]  ;;  %p600_p6 = scmp.lt.s32.totalorder %s3931_s0, 1  ;;  %v748_v14 = vld [vmem:[#allocation2 + $0x168] sm:$0xff]  ;;  %v745_v15 = vld [vmem:[#allocation2 + $0x150] sm:$0xff] }
  0x17   : > { %s5154_s26 = sld [smem:[#allocation8_spill]]  ;;  %759 = vmatpush.msra.mxu1 %v748_v14  ;;  %3518 = vmatpush.msra.mxu3 %v748_v14  ;;  %v742_v17 = vld [vmem:[#allocation2 + $0x138] sm:$0xff]  ;;  %v749_v21 = vld [vmem:[#allocation2 + $0x170] sm:$0xff]  ;;  %v739_v22 = vld [vmem:[#allocation2 + $0x120] sm:$0xff]  ;;  %vm931_vm0 = vcmask 523264  }
  0x18   : > { %s5157_s0 = smov (!%p600_p6, %s3931_s0), 1  ;;  %v746_v23 = vld [vmem:[#allocation2 + $0x158] sm:$0xff]  ;;  %v736_v24 = vld [vmem:[#allocation2 + $0x108] sm:$0xff]  ;;  %v743_v25 = vld [vmem:[#allocation2 + $0x140] sm:$0xff]  ;;  %s5155_s19 = sld [smem:[#allocation10_spill]] }
  0x19   : > { %s3500_s21 = sshll.u32 %s5157_s0, 6  ;;  %760 = vmatpush.msra.mxu1 %v745_v15  ;;  %3519 = vmatpush.msra.mxu3 %v745_v15  ;;  %v733_v26 = vld [vmem:[#allocation2 + $0xf0] sm:$0xff]  ;;  %v740_v27 = vld [vmem:[#allocation2 + $0x128] sm:$0xff]  ;;  %v730_v28 = vld [vmem:[#allocation2 + $0xd8] sm:$0xff] }
  0x1a   : > { %v737_v31 = vld [vmem:[#allocation2 + $0x110] sm:$0xff]  ;;  %v727_v32 = vld [vmem:[#allocation2 + $0xc0] sm:$0xff]  ;;  %v734_v33 = vld [vmem:[#allocation2 + $0xf8] sm:$0xff]  ;;  %s5112_s23 = scalar_lea.vmem %s5147_s18, %s3500_s21 }
  0x1b   : > { %761 = vmatpush.msra.mxu1 %v742_v17  ;;  %3520 = vmatpush.msra.mxu3 %v742_v17  ;;  %v724_v34 = vld [vmem:[#allocation2 + $0xa8] sm:$0xff]  ;;  %v731_v35 = vld [vmem:[#allocation2 + $0xe0] sm:$0xff]  ;;  %v721_v36 = vld [vmem:[#allocation2 + $0x90] sm:$0xff] }
  0x1c   : > { %v633_v0 = vld [vmem:[%s5153_s20 + $0x78] sm:$0xff]  ;;  %v632_v1 = vld [vmem:[%s5153_s20 + $0x70] sm:$0xff]  ;;  %v631_v2 = vld [vmem:[%s5153_s20 + $0x68] sm:$0xff] }
  0x1d   : > { %638 = vmatpush.msra.mxu0 %v633_v0  ;;  %3502 = vmatpush.msra.mxu2 %v633_v0  ;;  %v630_v3 = vld [vmem:[%s5153_s20 + $0x60] sm:$0xff]  ;;  %v629_v4 = vld [vmem:[%s5153_s20 + $0x58] sm:$0xff]  ;;  %v628_v5 = vld [vmem:[%s5153_s20 + $0x50] sm:$0xff]  ;;  %s4012_s28 = scalar_lea.vmem %s5154_s26, %s3500_s21 }
  0x1e   : > { %v627_v6 = vld [vmem:[%s5153_s20 + $0x48] sm:$0xff]  ;;  %v626_v7 = vld [vmem:[%s5153_s20 + $0x40] sm:$0xff]  ;;  %v625_v8 = vld [vmem:[%s5153_s20 + $0x38] sm:$0xff]  ;;  %762 = vmatpush.msra.mxu1 %v739_v22  ;;  %3521 = vmatpush.msra.mxu3 %v739_v22 }
  0x1f   : > { %639 = vmatpush.msra.mxu0 %v632_v1  ;;  %3503 = vmatpush.msra.mxu2 %v632_v1  ;;  %v624_v9 = vld [vmem:[%s5153_s20 + $0x30] sm:$0xff]  ;;  %v623_v10 = vld [vmem:[%s5153_s20 + $0x28] sm:$0xff]  ;;  %v622_v11 = vld [vmem:[%s5153_s20 + $0x20] sm:$0xff] }
  0x20   : > { %v621_v12 = vld [vmem:[%s5153_s20 + $0x18] sm:$0xff]  ;;  %v620_v13 = vld [vmem:[%s5153_s20 + $0x10] sm:$0xff]  ;;  %v619_v16 = vld [vmem:[%s5153_s20 + $0x8] sm:$0xff]  ;;  %763 = vmatpush.msra.mxu1 %v736_v24  ;;  %3522 = vmatpush.msra.mxu3 %v736_v24 }
  0x21   : > { %640 = vmatpush.msra.mxu0 %v631_v2  ;;  %3504 = vmatpush.msra.mxu2 %v631_v2  ;;  %v618_v18 = vld [vmem:[%s5153_s20] sm:$0xff]  ;;  %v611_v29 = vld [vmem:[%s4012_s28 + $0x8] sm:$0xff]  ;;  %v718_v38 = vld [vmem:[#allocation2 + $0x78] sm:$0xff] }
  0x22   : > { %v610_v19 = vld [vmem:[%s4012_s28] sm:$0xff]  ;;  %v615_v30 = vld [vmem:[%s4012_s28 + $0x28] sm:$0xff]  ;;  %764 = vmatpush.msra.mxu1 %v733_v26  ;;  %3523 = vmatpush.msra.mxu3 %v733_v26  ;;  %v612_v39 = vld [vmem:[%s4012_s28 + $0x10] sm:$0xff] }
  0x23   : > { %641 = vmatpush.msra.mxu0 %v630_v3  ;;  %3505 = vmatpush.msra.mxu2 %v630_v3  ;;  %v614_v20 = vld [vmem:[%s4012_s28 + $0x20] sm:$0xff]  ;;  %v728_v37 = vld [vmem:[#allocation2 + $0xc8] sm:$0xff]  ;;  %v616_v40 = vld [vmem:[%s4012_s28 + $0x30] sm:$0xff] }
  0x24   : > { %765 = vmatpush.msra.mxu1 %v730_v28  ;;  %3524 = vmatpush.msra.mxu3 %v730_v28  ;;  %v725_v41 = vld [vmem:[#allocation2 + $0xb0] sm:$0xff]  ;;  %v715_v42 = vld [vmem:[#allocation2 + $0x60] sm:$0xff]  ;;  %v722_v43 = vld [vmem:[#allocation2 + $0x98] sm:$0xff] }
  0x25   : > { %642 = vmatpush.msra.mxu0 %v629_v4  ;;  %3506 = vmatpush.msra.mxu2 %v629_v4  ;;  %v719_v44 = vld [vmem:[#allocation2 + $0x80] sm:$0xff]  ;;  %v716_v45 = vld [vmem:[#allocation2 + $0x68] sm:$0xff]  ;;  %v613_v46 = vld [vmem:[%s4012_s28 + $0x18] sm:$0xff] }
  0x26   : > { %766 = vmatpush.msra.mxu1 %v727_v32  ;;  %3525 = vmatpush.msra.mxu3 %v727_v32  ;;  %v617_v47 = vld [vmem:[%s4012_s28 + $0x38] sm:$0xff]  ;;  %v712_v48 = vld [vmem:[#allocation2 + $0x48] sm:$0xff]  ;;  %v713_v49 = vld [vmem:[#allocation2 + $0x50] sm:$0xff] }
  0x27   : > { %643 = vmatpush.msra.mxu0 %v628_v5  ;;  %3507 = vmatpush.msra.mxu2 %v628_v5  ;;  %v709_v50 = vld [vmem:[#allocation2 + $0x30] sm:$0xff]  ;;  %v710_v51 = vld [vmem:[#allocation2 + $0x38] sm:$0xff]  ;;  %v707_v53 = vld [vmem:[#allocation2 + $0x20] sm:$0xff] }
  0x28   : > { %767 = vmatpush.msra.mxu1 %v724_v34  ;;  %3526 = vmatpush.msra.mxu3 %v724_v34  ;;  %v706_v52 = vld [vmem:[#allocation2 + $0x18] sm:$0xff]  ;;  %v703_v54 = vld [vmem:[#allocation2] sm:$0xff]  ;;  %v704_v55 = vld [vmem:[#allocation2 + $0x8] sm:$0xff] }
  0x29   : > { %644 = vmatpush.msra.mxu0 %v627_v6  ;;  %3508 = vmatpush.msra.mxu2 %v627_v6  ;;  %v750_v56 = vld [vmem:[#allocation2 + $0x178] sm:$0xff]  ;;  %v747_v57 = vld [vmem:[#allocation2 + $0x160] sm:$0xff]  ;;  %v744_v58 = vld [vmem:[#allocation2 + $0x148] sm:$0xff] }
  0x2a   : > { %768 = vmatpush.msra.mxu1 %v721_v36  ;;  %3527 = vmatpush.msra.mxu3 %v721_v36  ;;  %v741_v59 = vld [vmem:[#allocation2 + $0x130] sm:$0xff]  ;;  %v738_v60 = vld [vmem:[#allocation2 + $0x118] sm:$0xff]  ;;  %v735_v61 = vld [vmem:[#allocation2 + $0x100] sm:$0xff] }
  0x2b   : > { %645 = vmatpush.msra.mxu0 %v626_v7  ;;  %3509 = vmatpush.msra.mxu2 %v626_v7  ;;  %v732_v62 = vld [vmem:[#allocation2 + $0xe8] sm:$0xff]  ;;  %v729_v63 = vld [vmem:[#allocation2 + $0xd0] sm:$0xff]  ;;  %v3568_v0 = vld [vmem:[%s5155_s19] ss:$0 sm:$0xff] }
  0x2c   : > { %769 = vmatpush.msra.mxu1 %v718_v38  ;;  %3528 = vmatpush.msra.mxu3 %v718_v38  ;;  %v726_v1 = vld [vmem:[#allocation2 + $0xb8] sm:$0xff]  ;;  %v723_v2 = vld [vmem:[#allocation2 + $0xa0] sm:$0xff]  ;;  %v720_v5 = vld [vmem:[#allocation2 + $0x88] sm:$0xff] }
  0x2d   : > { %646 = vmatpush.msra.mxu0 %v625_v8  ;;  %3510 = vmatpush.msra.mxu2 %v625_v8  ;;  %v687_v6 = vld [vmem:[%s5132_s3] sm:$0xff]  ;;  %v717_v8 = vld [vmem:[#allocation2 + $0x70] sm:$0xff]  ;;  %v708_v14 = vld [vmem:[#allocation2 + $0x28] sm:$0xff] }
  0x2e   : > { %770 = vmatpush.msra.mxu1 %v715_v42  ;;  %3529 = vmatpush.msra.mxu3 %v715_v42  ;;  %v691_v15 = vld [vmem:[%s5132_s3 + $0x20] sm:$0xff]  ;;  %v692_v26 = vld [vmem:[%s5132_s3 + $0x28] sm:$0xff]  ;;  %v693_v36 = vld [vmem:[%s5132_s3 + $0x30] sm:$0xff] }
  0x2f   : > { %647 = vmatpush.msra.mxu0 %v624_v9  ;;  %3511 = vmatpush.msra.mxu2 %v624_v9 }
  0x30   : > { %771 = vmatpush.msra.mxu1 %v712_v48  ;;  %3530 = vmatpush.msra.mxu3 %v712_v48 }
  0x31   : > { %648 = vmatpush.msra.mxu0 %v623_v10  ;;  %3512 = vmatpush.msra.mxu2 %v623_v10  ;;  %v714_v10 = vld [vmem:[#allocation2 + $0x58] sm:$0xff] }
  0x32   : > { %772 = vmatpush.msra.mxu1 %v709_v50  ;;  %3531 = vmatpush.msra.mxu3 %v709_v50 }
  0x33   : > { %649 = vmatpush.msra.mxu0 %v622_v11  ;;  %3513 = vmatpush.msra.mxu2 %v622_v11 }
  0x34   : > { %773 = vmatpush.msra.mxu1 %v706_v52  ;;  %3532 = vmatpush.msra.mxu3 %v706_v52 }
  0x35   : > { %650 = vmatpush.msra.mxu0 %v621_v12  ;;  %3514 = vmatpush.msra.mxu2 %v621_v12 }
  0x36   : > { %774 = vmatpush.msra.mxu1 %v703_v54  ;;  %3533 = vmatpush.msra.mxu3 %v703_v54 }
  0x37   : > { %651 = vmatpush.msra.mxu0 %v620_v13  ;;  %3515 = vmatpush.msra.mxu2 %v620_v13  ;;  %v711_v13 = vld [vmem:[#allocation2 + $0x40] sm:$0xff] }
  0x38   : > { %841 = vmatpush.msrb.mxu3 %v750_v56 }
  0x39   : > { %652 = vmatpush.msra.mxu0 %v619_v16  ;;  %3516 = vmatpush.msra.mxu2 %v619_v16 }
  0x3a   : > { %842 = vmatpush.msrb.mxu3 %v747_v57 }
  0x3b   : > { %653 = vmatpush.msra.mxu0 %v618_v18  ;;  %3517 = vmatpush.msra.mxu2 %v618_v18 }
  0x3c   : > { %654 = vmatmul.f32.vlgmr.msra.gmra.mxu0 %v610_v19  ;;  %666 = vmatmul.f32.vlgmr.msra.gmra.mxu2 %v614_v20  ;;  %v705_v19 = vld [vmem:[#allocation2 + $0x10] sm:$0xff]  ;;  %v688_v20 = vld [vmem:[%s5132_s3 + $0x8] sm:$0xff] }
  0x3d   : > { %800 = vmatpush.msrb.mxu2 %v749_v21  ;;  %843 = vmatpush.msrb.mxu3 %v744_v58 }
  0x3f   : > { %801 = vmatpush.msrb.mxu2 %v746_v23  ;;  %844 = vmatpush.msrb.mxu3 %v741_v59 }
  0x41   : > { %802 = vmatpush.msrb.mxu2 %v743_v25  ;;  %845 = vmatpush.msrb.mxu3 %v738_v60 }
  0x43   : > { %803 = vmatpush.msrb.mxu2 %v740_v27  ;;  %846 = vmatpush.msrb.mxu3 %v735_v61 }
  0x44   : > { %657 = vmatmul.f32.gmra.mxu0 %v611_v29  ;;  %669 = vmatmul.f32.gmra.mxu2 %v615_v30  ;;  %v689_v30 = vld [vmem:[%s5132_s3 + $0x10] sm:$0xff] }
  0x45   : > { %804 = vmatpush.msrb.mxu2 %v737_v31  ;;  %847 = vmatpush.msrb.mxu3 %v732_v62  ;;  %v751_v62 = vld [vmem:[%s5134_s5] sm:$0x7] }
  0x47   : > { %805 = vmatpush.msrb.mxu2 %v734_v33  ;;  %848 = vmatpush.msrb.mxu3 %v729_v63 }
  0x49   : > { %806 = vmatpush.msrb.mxu2 %v731_v35  ;;  %849 = vmatpush.msrb.mxu3 %v726_v1 }
  0x4b   : > { %807 = vmatpush.msrb.mxu2 %v728_v37  ;;  %850 = vmatpush.msrb.mxu3 %v723_v2 }
  0x4c   : > { %660 = vmatmul.f32.gmra.mxu0 %v612_v39  ;;  %672 = vmatmul.f32.gmra.mxu2 %v616_v40  ;;  %v690_v40 = vld [vmem:[%s5132_s3 + $0x18] sm:$0xff] }
  0x4d   : > { %808 = vmatpush.msrb.mxu2 %v725_v41  ;;  %851 = vmatpush.msrb.mxu3 %v720_v5 }
  0x4f   : > { %809 = vmatpush.msrb.mxu2 %v722_v43  ;;  %852 = vmatpush.msrb.mxu3 %v717_v8 }
  0x51   : > { %810 = vmatpush.msrb.mxu2 %v719_v44  ;;  %853 = vmatpush.msrb.mxu3 %v714_v10 }
  0x53   : > { %811 = vmatpush.msrb.mxu2 %v716_v45  ;;  %854 = vmatpush.msrb.mxu3 %v711_v13  ;;  %v753_v13 = vperm.slane %v751_v62, 0 }
  0x54   : > { %663 = vmatmul.f32.gmra.mxu0 %v613_v46  ;;  %675 = vmatmul.f32.gmra.mxu2 %v617_v47  ;;  %v694_v46 = vld [vmem:[%s5132_s3 + $0x38] sm:$0xff] }
  0x55   : > { %812 = vmatpush.msrb.mxu2 %v713_v49  ;;  %855 = vmatpush.msrb.mxu3 %v708_v14 }
  0x57   : > { %813 = vmatpush.msrb.mxu2 %v710_v51  ;;  %856 = vmatpush.msrb.mxu3 %v705_v19 }
  0x59   : > { %814 = vmatpush.msrb.mxu2 %v707_v53 }
  0x5b   : > { %815 = vmatpush.msrb.mxu2 %v704_v55 }
  0xb9   : > { %v655_v3 = vpop.f32.mrf.mxu0 }
  0xba   : > { %v656_v4 = vadd.f32 %v3568_v0, %v655_v3 }
  0xbc   : > { %v679_v7 = vmul.f32 11.313708, %v656_v4 }
  0xbe   : > { %v4031_v9 = vadd.f32 %v687_v6, %v679_v7 }
  0xbf   : > { %v667_v11 = vpop.f32.mrf.mxu2 }
  0xc0   : > { %v668_v12 = vadd.f32 %v3568_v0, %v667_v11  ;;  %775 = vmatmul.f32.vlgmr.msra.gmra.mxu1 %v4031_v9  ;;  %816 = vmatmul.f32.vlgmr.msrb.gmra.mxu2 %v4031_v9 }
  0xc1   : > { %v658_v16 = vpop.f32.mrf.mxu0 }
  0xc2   : > { %v683_v17 = vmul.f32 11.313708, %v668_v12  ;;  %v659_v18 = vadd.f32 %v3568_v0, %v658_v16 }
  0xc4   : > { %v4041_v21 = vadd.f32 %v691_v15, %v683_v17  ;;  %v680_v22 = vmul.f32 11.313708, %v659_v18 }
  0xc6   : > { %v4043_v23 = vadd.f32 %v688_v20, %v680_v22  ;;  %787 = vmatmul.f32.vlgmr.msra.gmra.mxu3 %v4041_v21  ;;  %v755_v22 = vperm.slane %v751_v62, 2 }
  0xc7   : > { %v670_v24 = vpop.f32.mrf.mxu2 }
  0xc8   : > { %v671_v25 = vadd.f32 %v3568_v0, %v670_v24  ;;  %778 = vmatmul.f32.gmra.mxu1 %v4043_v23  ;;  %819 = vmatmul.f32.gmra.mxu2 %v4043_v23 }
  0xc9   : > { %v661_v27 = vpop.f32.mrf.mxu0 }
  0xca   : > { %v684_v28 = vmul.f32 11.313708, %v671_v25  ;;  %v662_v29 = vadd.f32 %v3568_v0, %v661_v27 }
  0xcc   : > { %v4054_v31 = vadd.f32 %v692_v26, %v684_v28  ;;  %v681_v32 = vmul.f32 11.313708, %v662_v29 }
  0xce   : > { %v4056_v33 = vadd.f32 %v689_v30, %v681_v32  ;;  %790 = vmatmul.f32.gmra.mxu3 %v4054_v31 }
  0xcf   : > { %v673_v34 = vpop.f32.mrf.mxu2 }
  0xd0   : > { %v674_v35 = vadd.f32 %v3568_v0, %v673_v34  ;;  %781 = vmatmul.f32.gmra.mxu1 %v4056_v33  ;;  %822 = vmatmul.f32.gmra.mxu2 %v4056_v33 }
  0xd1   : > { %v664_v37 = vpop.f32.mrf.mxu0 }
  0xd2   : > { %v685_v38 = vmul.f32 11.313708, %v674_v35  ;;  %v665_v39 = vadd.f32 %v3568_v0, %v664_v37 }
  0xd4   : > { %v4067_v41 = vadd.f32 %v693_v36, %v685_v38  ;;  %v682_v42 = vmul.f32 11.313708, %v665_v39 }
  0xd6   : > { %v4069_v43 = vadd.f32 %v690_v40, %v682_v42  ;;  %793 = vmatmul.f32.gmra.mxu3 %v4067_v41 }
  0xd7   : > { %v676_v44 = vpop.f32.mrf.mxu2 }
  0xd8   : > { %v677_v45 = vadd.f32 %v3568_v0, %v676_v44  ;;  %784 = vmatmul.f32.gmra.mxu1 %v4069_v43  ;;  %825 = vmatmul.f32.gmra.mxu2 %v4069_v43  ;;  %v754_v0 = vperm.slane %v751_v62, 1 }
  0xda   : > { %v686_v47 = vmul.f32 11.313708, %v677_v45 }
  0xdc   : > { %v4077_v48 = vadd.f32 %v694_v46, %v686_v47 }
  0xde   : > { %796 = vmatmul.f32.gmra.mxu3 %v4077_v48 }
  0xe0   : > { %828 = vmatmul.f32.gmra.mxu2 %v4041_v21 }
  0xe6   : > { %857 = vmatmul.f32.vlgmr.msrb.gmra.mxu3 %v4031_v9 }
  0xe8   : > { %831 = vmatmul.f32.gmra.mxu2 %v4054_v31 }
  0xee   : > { %860 = vmatmul.f32.gmra.mxu3 %v4043_v23 }
  0xf0   : > { %834 = vmatmul.f32.gmra.mxu2 %v4067_v41 }
  0xf6   : > { %863 = vmatmul.f32.gmra.mxu3 %v4056_v33 }
  0xf8   : > { %837 = vmatmul.f32.gmra.mxu2 %v4077_v48 }
  0xfe   : > { %866 = vmatmul.f32.gmra.mxu3 %v4069_v43 }
 0x106   : > { %869 = vmatmul.f32.gmra.mxu3 %v4041_v21 }
 0x10e   : > { %872 = vmatmul.f32.gmra.mxu3 %v4054_v31 }
 0x116   : > { %875 = vmatmul.f32.gmra.mxu3 %v4067_v41 }
 0x11e   : > { %878 = vmatmul.f32.gmra.mxu3 %v4077_v48 }
 0x13d   : > { %v776_v10 = vpop.f32.mrf.mxu1 }
 0x13e   : > { %v777_v15 = vadd.f32 %v776_v10, %v753_v13 }
 0x140   : > { %v882_v19 = vmul.f32 0.088388346, %v777_v15 }
 0x143   : > { %v817_v49 = vpop.f32.mrf.mxu2 }
 0x144   : > { %v818_v17 = vadd.f32 %v817_v49, %v754_v0 }
 0x145   : > { %v779_v16 = vpop.f32.mrf.mxu1 }
 0x146   : > { %v780_v20 = vadd.f32 %v779_v16, %v753_v13 }
 0x148   : > { %v883_v27 = vmul.f32 0.088388346, %v780_v20 }
 0x149   : > { %v4092_v50 = vpop.f32.mrf.mxu3 }
 0x14a   : > { %v789_v44 = vadd.f32 %v4092_v50, %v753_v13 }
 0x14b   : > { %v820_v51 = vpop.f32.mrf.mxu2 }
 0x14c   : > { %v821_v14 = vadd.f32 %v820_v51, %v754_v0  ;;  %v886_v45 = vmul.f32 0.088388346, %v789_v44 }
 0x14d   : > { %v782_v25 = vpop.f32.mrf.mxu1 }
 0x14e   : > { %v783_v30 = vadd.f32 %v782_v25, %v753_v13 }
 0x150   : > { %v884_v35 = vmul.f32 0.088388346, %v783_v30 }
 0x151   : > { %v4094_v52 = vpop.f32.mrf.mxu3 }
 0x152   : > { %v792_v46 = vadd.f32 %v4094_v52, %v753_v13 }
 0x153   : > { %v823_v53 = vpop.f32.mrf.mxu2 }
 0x154   : > { %v824_v11 = vadd.f32 %v823_v53, %v754_v0  ;;  %v887_v47 = vmul.f32 0.088388346, %v792_v46 }
 0x155   : > { %v785_v36 = vpop.f32.mrf.mxu1 }
 0x156   : > { %v786_v39 = vadd.f32 %v785_v36, %v753_v13 }
 0x158   : > { %v885_v42 = vmul.f32 0.088388346, %v786_v39 }
 0x159   : > { %v4096_v54 = vpop.f32.mrf.mxu3 }
 0x15a   : > { %v795_v49 = vadd.f32 %v4096_v54, %v753_v13 }
 0x15b   : > { %v826_v55 = vpop.f32.mrf.mxu2 }
 0x15c   : > { %v827_v8 = vadd.f32 %v826_v55, %v754_v0  ;;  %v888_v51 = vmul.f32 0.088388346, %v795_v49 }
 0x161   : > { %v4098_v56 = vpop.f32.mrf.mxu3 }
 0x162   : > { %v798_v53 = vadd.f32 %v4098_v56, %v753_v13 }
 0x163   : > { %v829_v57 = vpop.f32.mrf.mxu2 }
 0x164   : > { %v830_v6 = vadd.f32 %v829_v57, %v754_v0  ;;  %v889_v55 = vmul.f32 0.088388346, %v798_v53 }
 0x169   : > { %v858_v58 = vpop.f32.mrf.mxu3 }
 0x16a   : > { %v859_v40 = vadd.f32 %v858_v58, %v755_v22 }
 0x16b   : > { %v832_v59 = vpop.f32.mrf.mxu2 }
 0x16c   : > { %v833_v5 = vadd.f32 %v832_v59, %v754_v0 }
 0x171   : > { %v861_v60 = vpop.f32.mrf.mxu3 }
 0x172   : > { %v862_v38 = vadd.f32 %v861_v60, %v755_v22 }
 0x173   : > { %v835_v61 = vpop.f32.mrf.mxu2 }
 0x174   : > { %v836_v3 = vadd.f32 %v835_v61, %v754_v0 }
 0x179   : > { %v864_v63 = vpop.f32.mrf.mxu3 }
 0x17a   : > { %v865_v37 = vadd.f32 %v864_v63, %v755_v22 }
 0x17b   : > { %v838_v1 = vpop.f32.mrf.mxu2 }
 0x17c   : > { %v839_v2 = vadd.f32 %v838_v1, %v754_v0 }
 0x17e   : > { %898 = vmatpush.xpose.msrb.mxu0 %v839_v2 }
 0x181   : > { %v867_v4 = vpop.f32.mrf.mxu3 }
 0x182   : > { %899 = vmatpush.xpose.msrb.mxu0 %v836_v3  ;;  %v868_v34 = vadd.f32 %v867_v4, %v755_v22 }
 0x186   : > { %900 = vmatpush.xpose.msrb.mxu0 %v833_v5 }
 0x189   : > { %v870_v7 = vpop.f32.mrf.mxu3 }
 0x18a   : > { %901 = vmatpush.xpose.msrb.mxu0 %v830_v6  ;;  %v871_v32 = vadd.f32 %v870_v7, %v755_v22 }
 0x18e   : > { %902 = vmatpush.xpose.msrb.mxu0 %v827_v8 }
 0x191   : > { %v873_v12 = vpop.f32.mrf.mxu3 }
 0x192   : > { %903 = vmatpush.xpose.msrb.mxu0 %v824_v11  ;;  %v874_v29 = vadd.f32 %v873_v12, %v755_v22 }
 0x196   : > { %904 = vmatpush.xpose.msrb.mxu0 %v821_v14 }
 0x199   : > { %v876_v18 = vpop.f32.mrf.mxu3 }
 0x19a   : > { %905 = vmatpush.xpose.msrb.mxu0 %v818_v17  ;;  %v877_v28 = vadd.f32 %v876_v18, %v755_v22 }
 0x19d   : > { %906 = vmatmul.f32.vlgmr.msrb.gmra.mxu0 %v882_v19 }
 0x1a1   : > { %v879_v24 = vpop.f32.mrf.mxu3 }
 0x1a2   : > { %v880_v26 = vadd.f32 %v879_v24, %v755_v22 }
 0x1a4   : > { %1164 = vmatpush.msrb.mxu1 %v880_v26 }
 0x1a5   : > { %909 = vmatmul.f32.gmra.mxu0 %v883_v27 }
 0x1a6   : > { %1165 = vmatpush.msrb.mxu1 %v877_v28 }
 0x1a8   : > { %1166 = vmatpush.msrb.mxu1 %v874_v29 }
 0x1aa   : > { %1167 = vmatpush.msrb.mxu1 %v871_v32 }
 0x1ac   : > { %1168 = vmatpush.msrb.mxu1 %v868_v34 }
 0x1ad   : > { %912 = vmatmul.f32.gmra.mxu0 %v884_v35 }
 0x1ae   : > { %1169 = vmatpush.msrb.mxu1 %v865_v37 }
 0x1b0   : > { %1170 = vmatpush.msrb.mxu1 %v862_v38 }
 0x1b2   : > { %1171 = vmatpush.msrb.mxu1 %v859_v40 }
 0x1b5   : > { %915 = vmatmul.f32.gmra.mxu0 %v885_v42 }
 0x1bd   : > { %918 = vmatmul.f32.gmra.mxu0 %v886_v45 }
 0x1c5   : > { %921 = vmatmul.f32.gmra.mxu0 %v887_v47 }
 0x1cd   : > { %924 = vmatmul.f32.gmra.mxu0 %v888_v51 }
 0x1d5   : > { %927 = vmatmul.f32.gmra.mxu0 %v889_v55 }
 0x21a   : > { %v907_v57 = vpop.f32.mrf.mxu0 }
 0x21b   : > { %v932_v58 = vsel %vm931_vm0, %v907_v57, -inf }
 0x21c   : > { %933 = vmax.xlane.f32.xlu0 %v932_v58 }
 0x222   : > { %v910_v50 = vpop.f32.mrf.mxu0 }
 0x223   : > { %v935_v59 = vsel %vm931_vm0, %v910_v50, -inf }
 0x224   : > { %936 = vmax.xlane.f32.xlu0 %v935_v59 }
 0x22a   : > { %v913_v52 = vpop.f32.mrf.mxu0 }
 0x22b   : > { %v938_v60 = vsel %vm931_vm0, %v913_v52, -inf }
 0x22c   : > { %939 = vmax.xlane.f32.xlu1 %v938_v60 }
 0x232   : > { %v916_v54 = vpop.f32.mrf.mxu0 }
 0x233   : > { %v941_v61 = vsel %vm931_vm0, %v916_v54, -inf }
 0x234   : > { %942 = vmax.xlane.f32.xlu1 %v941_v61 }
 0x23a   : > { %v919_v56 = vpop.f32.mrf.mxu0 }
 0x23b   : > { %v944_v62 = vsel %vm931_vm0, %v919_v56, -inf }
 0x23c   : > { %945 = vmax.xlane.f32.xlu2 %v944_v62 }
 0x242   : > { %v922_v63 = vpop.f32.mrf.mxu0 }
 0x243   : > { %v947_v0 = vsel %vm931_vm0, %v922_v63, -inf }
 0x244   : > { %948 = vmax.xlane.f32.xlu2 %v947_v0 }
 0x24a   : > { %v925_v1 = vpop.f32.mrf.mxu0 }
 0x24b   : > { %v950_v2 = vsel %vm931_vm0, %v925_v1, -inf }
 0x24c   : > { %951 = vmax.xlane.f32.xlu0 %v950_v2 }
 0x252   : > { %v928_v3 = vpop.f32.mrf.mxu0 }
 0x253   : > { %v953_v4 = vsel %vm931_vm0, %v928_v3, -inf }
 0x254   : > { %954 = vmax.xlane.f32.xlu2 %v953_v4 }
 0x28f   : > { %v934_v5 = vpop.xlane.xlu0 %933 }
 0x290   : > { %v956_v6 = vsub.f32 %v907_v57, %v934_v5 }
 0x292   : > { %v964_v7 = vmul.f32 1.442695, %v956_v6 }
 0x294   : > { %3582 = vpow2.f32 %v964_v7 }
 0x297   : > { %v937_v8 = vpop.xlane.xlu0 %936 }
 0x298   : > { %v957_v10 = vsub.f32 %v910_v50, %v937_v8 }
 0x29a   : > { %v4115_v11 = vpop.eup %3582  ;;  %v966_v12 = vmul.f32 1.442695, %v957_v10 }
 0x29b   : > { %v980_v13 = vsel %vm931_vm0, %v4115_v11, 0.0 }
 0x29c   : > { %3584 = vpow2.f32 %v966_v12  ;;  %981 = vadd.xlane.f32.xlu1 %v980_v13 }
 0x29f   : > { %v940_v14 = vpop.xlane.xlu1 %939 }
 0x2a0   : > { %v958_v15 = vsub.f32 %v913_v52, %v940_v14 }
 0x2a2   : > { %v4119_v16 = vpop.eup %3584  ;;  %v968_v17 = vmul.f32 1.442695, %v958_v15 }
 0x2a3   : > { %v983_v18 = vsel %vm931_vm0, %v4119_v16, 0.0 }
 0x2a4   : > { %3586 = vpow2.f32 %v968_v17  ;;  %984 = vadd.xlane.f32.xlu0 %v983_v18 }
 0x2a7   : > { %v943_v19 = vpop.xlane.xlu1 %942 }
 0x2a8   : > { %v959_v20 = vsub.f32 %v916_v54, %v943_v19 }
 0x2aa   : > { %v4123_v22 = vpop.eup %3586  ;;  %v970_v24 = vmul.f32 1.442695, %v959_v20 }
 0x2ab   : > { %v986_v25 = vsel %vm931_vm0, %v4123_v22, 0.0 }
 0x2ac   : > { %3588 = vpow2.f32 %v970_v24  ;;  %987 = vadd.xlane.f32.xlu1 %v986_v25 }
 0x2af   : > { %v946_v26 = vpop.xlane.xlu2 %945 }
 0x2b0   : > { %v960_v27 = vsub.f32 %v919_v56, %v946_v26 }
 0x2b2   : > { %v4127_v28 = vpop.eup %3588  ;;  %v972_v29 = vmul.f32 1.442695, %v960_v27 }
 0x2b3   : > { %v989_v30 = vsel %vm931_vm0, %v4127_v28, 0.0 }
 0x2b4   : > { %3590 = vpow2.f32 %v972_v29  ;;  %990 = vadd.xlane.f32.xlu2 %v989_v30 }
 0x2b7   : > { %v949_v32 = vpop.xlane.xlu2 %948 }
 0x2b8   : > { %v961_v34 = vsub.f32 %v922_v63, %v949_v32 }
 0x2ba   : > { %v4131_v35 = vpop.eup %3590  ;;  %v974_v36 = vmul.f32 1.442695, %v961_v34 }
 0x2bb   : > { %v992_v37 = vsel %vm931_vm0, %v4131_v35, 0.0 }
 0x2bc   : > { %3592 = vpow2.f32 %v974_v36  ;;  %993 = vadd.xlane.f32.xlu0 %v992_v37 }
 0x2bf   : > { %v952_v38 = vpop.xlane.xlu0 %951 }
 0x2c0   : > { %v962_v39 = vsub.f32 %v925_v1, %v952_v38 }
 0x2c2   : > { %v4135_v40 = vpop.eup %3592  ;;  %v976_v42 = vmul.f32 1.442695, %v962_v39 }
 0x2c3   : > { %v995_v44 = vsel %vm931_vm0, %v4135_v40, 0.0 }
 0x2c4   : > { %3594 = vpow2.f32 %v976_v42  ;;  %996 = vadd.xlane.f32.xlu1 %v995_v44 }
 0x2c7   : > { %v955_v45 = vpop.xlane.xlu2 %954 }
 0x2c8   : > { %v963_v46 = vsub.f32 %v928_v3, %v955_v45 }
 0x2ca   : > { %v4139_v47 = vpop.eup %3594  ;;  %v978_v49 = vmul.f32 1.442695, %v963_v46 }
 0x2cb   : > { %v998_v51 = vsel %vm931_vm0, %v4139_v47, 0.0 }
 0x2cc   : > { %3596 = vpow2.f32 %v978_v49  ;;  %999 = vadd.xlane.f32.xlu2 %v998_v51 }
 0x2d2   : > { %v4143_v53 = vpop.eup %3596 }
 0x2d3   : > { %v1001_v55 = vsel %vm931_vm0, %v4143_v53, 0.0 }
 0x2d4   : > { %1002 = vadd.xlane.f32.xlu0 %v1001_v55 }
 0x30f   : > { %v982_v57 = vpop.xlane.xlu1 %981 }
 0x310   : > { %3598 = vrcp.f32 %v982_v57  ;;  %v1015_v60 = vand.u32 2147483648, %v982_v57  ;;  %v1013_v61 = vand.u32 2147483647, %v982_v57  ;;  %vm1009_vm2 = vweird.f32 %v982_v57 }
 0x312   : > { %v1016_v63 = vor.u32 1.1754944e-38, %v1015_v60  ;;  %vm1014_vm4 = vcmp.eq.f32.partialorder %v1013_v61, 8.507059e+37  ;;  %v1212_v60 = vld [vmem:[%s5135_s6 + $0x78] sm:$0xff] }
 0x313   : > { %1217 = vmatpush.msra.mxu2 %v1212_v60  ;;  %v1197_v60 = vld [vmem:[%s5135_s6] sm:$0xff] }
 0x316   : > { %v3599_v58 = vpop.eup %3598 }
 0x317   : > { %v1005_v50 = vmul.f32 %v3599_v58, %v982_v57  ;;  %v985_v59 = vpop.xlane.xlu0 %984  ;;  %vm1010_vm1 = vweird.f32 %v3599_v58 }
 0x318   : > { %3600 = vrcp.f32 %v985_v59  ;;  %vm1011_vm3 = vmor %vm1009_vm2, %vm1010_vm1  ;;  %v1030_v6 = vand.u32 2147483648, %v985_v59  ;;  %v1028_v8 = vand.u32 2147483647, %v985_v59  ;;  %vm1024_vm6 = vweird.f32 %v985_v59 }
 0x319   : > { %v1006_v52 = vsub.f32 1.0, %v1005_v50 }
 0x31a   : > { %v1031_v13 = vor.u32 1.1754944e-38, %v1030_v6  ;;  %vm1029_vm8 = vcmp.eq.f32.partialorder %v1028_v8, 8.507059e+37  ;;  %v1208_v6 = vld [vmem:[%s5135_s6 + $0x58] sm:$0xff] }
 0x31b   : > { %v1007_v54 = vmul.f32 %v3599_v58, %v1006_v52 }
 0x31d   : > { %v1008_v56 = vadd.f32 %v3599_v58, %v1007_v54  ;;  %v1211_v54 = vld [vmem:[%s5135_s6 + $0x70] sm:$0xff] }
 0x31e   : > { %v3601_v62 = vpop.eup %3600  ;;  %1218 = vmatpush.msra.mxu2 %v1211_v54 }
 0x31f   : > { %v1020_v0 = vmul.f32 %v3601_v62, %v985_v59  ;;  %v988_v1 = vpop.xlane.xlu1 %987  ;;  %v1012_v2 = vsel %vm1011_vm3, %v3599_v58, %v1008_v56  ;;  %vm1025_vm5 = vweird.f32 %v3601_v62 }
 0x320   : > { %3602 = vrcp.f32 %v988_v1  ;;  %v1017_v3 = vsel %vm1014_vm4, %v1016_v63, %v1012_v2  ;;  %vm1026_vm7 = vmor %vm1024_vm6, %vm1025_vm5  ;;  %v1045_v20 = vand.u32 2147483648, %v988_v1  ;;  %v1043_v25 = vand.u32 2147483647, %v988_v1  ;;  %v1209_v2 = vld [vmem:[%s5135_s6 + $0x60] sm:$0xff] }
 0x321   : > { %v1021_v4 = vsub.f32 1.0, %v1020_v0  ;;  %v1124_v5 = vmul.f32 %v4115_v11, %v1017_v3  ;;  %vm1039_vm10 = vweird.f32 %v988_v1 }
 0x322   : > { %v1046_v29 = vor.u32 1.1754944e-38, %v1045_v20  ;;  %vm1044_vm12 = vcmp.eq.f32.partialorder %v1043_v25, 8.507059e+37 }
 0x323   : > { %v1022_v7 = vmul.f32 %v3601_v62, %v1021_v4  ;;  %3418 = vmatmul.msk.f32.vlgmr.msrb.gmra.mxu1 %vm931_vm0, %v1124_v5 }
 0x325   : > { %v1023_v10 = vadd.f32 %v3601_v62, %v1022_v7 }
 0x326   : > { %v3603_v12 = vpop.eup %3602 }
 0x327   : > { %v1035_v14 = vmul.f32 %v3603_v12, %v988_v1  ;;  %v991_v15 = vpop.xlane.xlu2 %990  ;;  %v1027_v17 = vsel %vm1026_vm7, %v3601_v62, %v1023_v10  ;;  %vm1040_vm9 = vweird.f32 %v3603_v12 }
 0x328   : > { %3604 = vrcp.f32 %v991_v15  ;;  %v1032_v18 = vsel %vm1029_vm8, %v1031_v13, %v1027_v17  ;;  %vm1041_vm11 = vmor %vm1039_vm10, %vm1040_vm9  ;;  %v1060_v38 = vand.u32 2147483648, %v991_v15  ;;  %v1058_v42 = vand.u32 2147483647, %v991_v15 }
 0x329   : > { %v1036_v19 = vsub.f32 1.0, %v1035_v14  ;;  %v1125_v11 = vmul.f32 %v4119_v16, %v1032_v18  ;;  %vm1054_vm14 = vweird.f32 %v991_v15 }
 0x32a   : > { %v1061_v46 = vor.u32 1.1754944e-38, %v1060_v38  ;;  %vm1059_vm1 = vcmp.eq.f32.partialorder %v1058_v42, 8.507059e+37 }
 0x32b   : > { %v1037_v24 = vmul.f32 %v3603_v12, %v1036_v19  ;;  %3419 = vmatmul.msk.f32.gmra.mxu1 %vm931_vm0, %v1125_v11  ;;  %v1205_v11 = vld [vmem:[%s5135_s6 + $0x40] sm:$0xff] }
 0x32d   : > { %v1038_v26 = vadd.f32 %v3603_v12, %v1037_v24 }
 0x32e   : > { %v3605_v27 = vpop.eup %3604 }
 0x32f   : > { %v1050_v30 = vmul.f32 %v3605_v27, %v991_v15  ;;  %v994_v32 = vpop.xlane.xlu0 %993  ;;  %v1042_v34 = vsel %vm1041_vm11, %v3603_v12, %v1038_v26  ;;  %vm1055_vm13 = vweird.f32 %v3605_v27  ;;  %v1207_v12 = vld [vmem:[%s5135_s6 + $0x50] sm:$0xff]  ;;  %v1204_v26 = vld [vmem:[%s5135_s6 + $0x38] sm:$0xff] }
 0x330   : > { %3606 = vrcp.f32 %v994_v32  ;;  %v1047_v36 = vsel %vm1044_vm12, %v1046_v29, %v1042_v34  ;;  %vm1056_vm15 = vmor %vm1054_vm14, %vm1055_vm13  ;;  %v1075_v50 = vand.u32 2147483648, %v994_v32  ;;  %v1073_v52 = vand.u32 2147483647, %v994_v32 }
 0x331   : > { %v1051_v37 = vsub.f32 1.0, %v1050_v30  ;;  %v1126_v16 = vmul.f32 %v4123_v22, %v1047_v36  ;;  %vm1069_vm3 = vweird.f32 %v994_v32 }
 0x332   : > { %v1076_v62 = vor.u32 1.1754944e-38, %v1075_v50  ;;  %vm1074_vm5 = vcmp.eq.f32.partialorder %v1073_v52, 8.507059e+37 }
 0x333   : > { %v1052_v39 = vmul.f32 %v3605_v27, %v1051_v37  ;;  %3420 = vmatmul.msk.f32.gmra.mxu1 %vm931_vm0, %v1126_v16 }
 0x335   : > { %v1053_v44 = vadd.f32 %v3605_v27, %v1052_v39  ;;  %v1201_v39 = vld [vmem:[%s5135_s6 + $0x20] sm:$0xff] }
 0x336   : > { %v3607_v45 = vpop.eup %3606 }
 0x337   : > { %v1065_v49 = vmul.f32 %v3607_v45, %v994_v32  ;;  %v997_v51 = vpop.xlane.xlu1 %996  ;;  %v1057_v55 = vsel %vm1056_vm15, %v3605_v27, %v1053_v44  ;;  %vm1070_vm2 = vweird.f32 %v3607_v45  ;;  %v1203_v32 = vld [vmem:[%s5135_s6 + $0x30] sm:$0xff] }
 0x338   : > { %3608 = vrcp.f32 %v997_v51  ;;  %v1062_v57 = vsel %vm1059_vm1, %v1061_v46, %v1057_v55  ;;  %vm1071_vm4 = vmor %vm1069_vm3, %vm1070_vm2  ;;  %v1090_v7 = vand.u32 2147483648, %v997_v51  ;;  %v1088_v10 = vand.u32 2147483647, %v997_v51  ;;  %v1200_v46 = vld [vmem:[%s5135_s6 + $0x18] sm:$0xff] }
 0x339   : > { %v1066_v58 = vsub.f32 1.0, %v1065_v49  ;;  %v1127_v22 = vmul.f32 %v4127_v28, %v1062_v57  ;;  %v1210_v28 = vld [vmem:[%s5135_s6 + $0x68] sm:$0xff]  ;;  %vm1084_vm7 = vweird.f32 %v997_v51  ;;  %v1199_v57 = vld [vmem:[%s5135_s6 + $0x10] sm:$0xff] }
 0x33a   : > { %1219 = vmatpush.msra.mxu2 %v1210_v28  ;;  %v1091_v15 = vor.u32 1.1754944e-38, %v1090_v7  ;;  %vm1089_vm9 = vcmp.eq.f32.partialorder %v1088_v10, 8.507059e+37 }
 0x33b   : > { %v1067_v59 = vmul.f32 %v3607_v45, %v1066_v58  ;;  %3421 = vmatmul.msk.f32.gmra.mxu1 %vm931_vm0, %v1127_v22 }
 0x33c   : > { %1220 = vmatpush.msra.mxu2 %v1209_v2 }
 0x33d   : > { %v1068_v61 = vadd.f32 %v3607_v45, %v1067_v59 }
 0x33e   : > { %v3609_v56 = vpop.eup %3608  ;;  %1221 = vmatpush.msra.mxu2 %v1208_v6 }
 0x33f   : > { %v1080_v63 = vmul.f32 %v3609_v56, %v997_v51  ;;  %v1000_v0 = vpop.xlane.xlu2 %999  ;;  %v1072_v1 = vsel %vm1071_vm4, %v3607_v45, %v1068_v61  ;;  %vm1085_vm6 = vweird.f32 %v3609_v56 }
 0x340   : > { %3610 = vrcp.f32 %v1000_v0  ;;  %v1077_v3 = vsel %vm1074_vm5, %v1076_v62, %v1072_v1  ;;  %vm1086_vm8 = vmor %vm1084_vm7, %vm1085_vm6  ;;  %1222 = vmatpush.msra.mxu2 %v1207_v12  ;;  %v1105_v27 = vand.u32 2147483648, %v1000_v0  ;;  %v1103_v30 = vand.u32 2147483647, %v1000_v0  ;;  %v3569_v1 = vld [vmem:[%s5136_s7] ss:$0 sm:$0xff] }
 0x341   : > { %v1081_v4 = vsub.f32 1.0, %v1080_v63  ;;  %v1128_v5 = vmul.f32 %v4131_v35, %v1077_v3  ;;  %v1206_v35 = vld [vmem:[%s5135_s6 + $0x48] sm:$0xff]  ;;  %vm1099_vm11 = vweird.f32 %v1000_v0 }
 0x342   : > { %1223 = vmatpush.msra.mxu2 %v1206_v35  ;;  %v1106_v37 = vor.u32 1.1754944e-38, %v1105_v27  ;;  %vm1104_vm13 = vcmp.eq.f32.partialorder %v1103_v30, 8.507059e+37 }
 0x343   : > { %v1082_v8 = vmul.f32 %v3609_v56, %v1081_v4  ;;  %3422 = vmatmul.msk.f32.gmra.mxu1 %vm931_vm0, %v1128_v5 }
 0x344   : > { %1224 = vmatpush.msra.mxu2 %v1205_v11 }
 0x345   : > { %v1083_v13 = vadd.f32 %v3609_v56, %v1082_v8 }
 0x346   : > { %v3611_v14 = vpop.eup %3610  ;;  %1225 = vmatpush.msra.mxu2 %v1204_v26 }
 0x347   : > { %v1095_v17 = vmul.f32 %v3611_v14, %v1000_v0  ;;  %v1003_v18 = vpop.xlane.xlu0 %1002  ;;  %v1087_v19 = vsel %vm1086_vm8, %v3609_v56, %v1083_v13  ;;  %vm1100_vm10 = vweird.f32 %v3611_v14 }
 0x348   : > { %3612 = vrcp.f32 %v1003_v18  ;;  %v1092_v20 = vsel %vm1089_vm9, %v1091_v15, %v1087_v19  ;;  %vm1101_vm12 = vmor %vm1099_vm11, %vm1100_vm10  ;;  %1226 = vmatpush.msra.mxu2 %v1203_v32  ;;  %v1120_v49 = vand.u32 2147483648, %v1003_v18  ;;  %v1118_v55 = vand.u32 2147483647, %v1003_v18 }
 0x349   : > { %v1096_v24 = vsub.f32 1.0, %v1095_v17  ;;  %v1129_v25 = vmul.f32 %v4135_v40, %v1092_v20  ;;  %v1202_v40 = vld [vmem:[%s5135_s6 + $0x28] sm:$0xff]  ;;  %vm1114_vm15 = vweird.f32 %v1003_v18 }
 0x34a   : > { %1227 = vmatpush.msra.mxu2 %v1202_v40  ;;  %v1121_v22 = vor.u32 1.1754944e-38, %v1120_v49  ;;  %vm1119_vm2 = vcmp.eq.f32.partialorder %v1118_v55, 8.507059e+37  ;;  %v1488_v49 = vld [vmem:[%s5139_s10 + $0xf8] sm:$0xff] }
 0x34b   : > { %v1097_v29 = vmul.f32 %v3611_v14, %v1096_v24  ;;  %3423 = vmatmul.msk.f32.gmra.mxu1 %vm931_vm0, %v1129_v25  ;;  %v3826_v24 = vmov 128.0   ;;  %1536 = vmatpush.msra.mxu0 %v1488_v49 }
 0x34c   : > { %1228 = vmatpush.msra.mxu2 %v1201_v39  ;;  %3614 = vrcp.f32 %v3826_v24  ;;  %v1461_v24 = vld [vmem:[%s5139_s10 + $0x20] sm:$0xff] }
 0x34d   : > { %v1098_v34 = vadd.f32 %v3611_v14, %v1097_v29 }
 0x34e   : > { %v3613_v36 = vpop.eup %3612  ;;  %1229 = vmatpush.msra.mxu2 %v1200_v46 }
 0x34f   : > { %v1110_v16 = vmul.f32 %v3613_v36, %v1003_v18  ;;  %v1102_v38 = vsel %vm1101_vm12, %v3611_v14, %v1098_v34  ;;  %vm1115_vm14 = vweird.f32 %v3613_v36 }
 0x350   : > { %v1107_v42 = vsel %vm1104_vm13, %v1106_v37, %v1102_v38  ;;  %vm1116_vm1 = vmor %vm1114_vm15, %vm1115_vm14  ;;  %1230 = vmatpush.msra.mxu2 %v1199_v57  ;;  %v1486_v57 = vld [vmem:[%s5139_s10 + $0xe8] sm:$0xff] }
 0x351   : > { %v1111_v44 = vsub.f32 1.0, %v1110_v16  ;;  %v1130_v45 = vmul.f32 %v4139_v47, %v1107_v42  ;;  %v1198_v47 = vld [vmem:[%s5135_s6 + $0x8] sm:$0xff]  ;;  %1537 = vmatpush.msra.mxu0 %v1486_v57 }
 0x352   : > { %1231 = vmatpush.msra.mxu2 %v1198_v47  ;;  %v3615_v25 = vpop.eup %3614 }
 0x353   : > { %v1112_v51 = vmul.f32 %v3613_v36, %v1111_v44  ;;  %3424 = vmatmul.msk.f32.gmra.mxu1 %vm931_vm0, %v1130_v45  ;;  %vm1289_vm3 = vweird.f32 %v3615_v25 }
 0x354   : > { %1232 = vmatpush.msra.mxu2 %v1197_v60 }
 0x355   : > { %v1113_v58 = vadd.f32 %v3613_v36, %v1112_v51  ;;  %v1485_v51 = vld [vmem:[%s5139_s10 + $0xe0] sm:$0xff] }
 0x357   : > { %v1117_v50 = vsel %vm1116_vm1, %v3613_v36, %v1113_v58 }
 0x358   : > { %v1122_v59 = vsel %vm1119_vm2, %v1121_v22, %v1117_v50 }
 0x359   : > { %v1131_v52 = vmul.f32 %v4143_v53, %v1122_v59 }
 0x35b   : > { %3425 = vmatmul.msk.f32.gmra.mxu1 %vm931_vm0, %v1131_v52 }
 0x3a0   : > { %v1173_v54 = vpop.f32.mrf.mxu1 }
 0x3a1   : > { %1233 = vmatmul.f32.vlgmr.msra.gmra.mxu2 %v1173_v54 }
 0x3a8   : > { %v1176_v61 = vpop.f32.mrf.mxu1 }
 0x3a9   : > { %1236 = vmatmul.f32.gmra.mxu2 %v1176_v61 }
 0x3b0   : > { %v1179_v28 = vpop.f32.mrf.mxu1 }
 0x3b1   : > { %1239 = vmatmul.f32.gmra.mxu2 %v1179_v28 }
 0x3b8   : > { %v1182_v56 = vpop.f32.mrf.mxu1 }
 0x3b9   : > { %1242 = vmatmul.f32.gmra.mxu2 %v1182_v56 }
 0x3c0   : > { %v1185_v62 = vpop.f32.mrf.mxu1 }
 0x3c1   : > { %1245 = vmatmul.f32.gmra.mxu2 %v1185_v62 }
 0x3c8   : > { %v1188_v63 = vpop.f32.mrf.mxu1 }
 0x3c9   : > { %1248 = vmatmul.f32.gmra.mxu2 %v1188_v63 }
 0x3d0   : > { %v1191_v53 = vpop.f32.mrf.mxu1 }
 0x3d1   : > { %1251 = vmatmul.f32.gmra.mxu2 %v1191_v53 }
 0x3d8   : > { %v1194_v0 = vpop.f32.mrf.mxu1 }
 0x3d9   : > { %1254 = vmatmul.f32.gmra.mxu2 %v1194_v0 }
 0x424   : > { %v1234_v2 = vpop.f32.mrf.mxu2 }
 0x425   : > { %v1235_v3 = vadd.f32 %v3569_v1, %v1234_v2  ;;  %v1484_v2 = vld [vmem:[%s5139_s10 + $0xd8] sm:$0xff] }
 0x426   : > { %1538 = vmatpush.msra.mxu0 %v1484_v2 }
 0x427   : > { %v1258_v4 = vadd.f32 %v1235_v3, %v4031_v9  ;;  %v1481_v3 = vld [vmem:[%s5139_s10 + $0xc0] sm:$0xff] }
 0x429   : > { %1268 = vadd.xlane.f32.xlu1 %v1258_v4 }
 0x42c   : > { %v1237_v5 = vpop.f32.mrf.mxu2 }
 0x42d   : > { %v1238_v6 = vadd.f32 %v3569_v1, %v1237_v5  ;;  %v1479_v5 = vld [vmem:[%s5139_s10 + $0xb0] sm:$0xff] }
 0x42f   : > { %v1259_v7 = vadd.f32 %v1238_v6, %v4043_v23  ;;  %v1480_v6 = vld [vmem:[%s5139_s10 + $0xb8] sm:$0xff] }
 0x431   : > { %1270 = vadd.xlane.f32.xlu2 %v1259_v7 }
 0x434   : > { %v1240_v8 = vpop.f32.mrf.mxu2 }
 0x435   : > { %v1241_v10 = vadd.f32 %v3569_v1, %v1240_v8  ;;  %v1478_v8 = vld [vmem:[%s5139_s10 + $0xa8] sm:$0xff] }
 0x437   : > { %v1260_v12 = vadd.f32 %v1241_v10, %v4056_v33  ;;  %v1475_v10 = vld [vmem:[%s5139_s10 + $0x90] sm:$0xff] }
 0x439   : > { %1272 = vadd.xlane.f32.xlu0 %v1260_v12 }
 0x43c   : > { %v1243_v13 = vpop.f32.mrf.mxu2 }
 0x43d   : > { %v1244_v35 = vadd.f32 %v3569_v1, %v1243_v13  ;;  %v1473_v13 = vld [vmem:[%s5139_s10 + $0x80] sm:$0xff] }
 0x43f   : > { %v1261_v14 = vadd.f32 %v1244_v35, %v4069_v43  ;;  %v1285_v43 = vmul.f32 128.0, %v3615_v25  ;;  %v1474_v35 = vld [vmem:[%s5139_s10 + $0x88] sm:$0xff] }
 0x441   : > { %1274 = vadd.xlane.f32.xlu1 %v1261_v14  ;;  %v1286_v26 = vsub.f32 1.0, %v1285_v43  ;;  %v1459_v43 = vld [vmem:[%s5139_s10 + $0x10] sm:$0xff] }
 0x443   : > { %v1287_v27 = vmul.f32 %v3615_v25, %v1286_v26  ;;  %v1460_v26 = vld [vmem:[%s5139_s10 + $0x18] sm:$0xff] }
 0x444   : > { %v1246_v15 = vpop.f32.mrf.mxu2 }
 0x445   : > { %v1247_v17 = vadd.f32 %v3569_v1, %v1246_v15  ;;  %v1288_v29 = vadd.f32 %v3615_v25, %v1287_v27  ;;  %v1472_v15 = vld [vmem:[%s5139_s10 + $0x78] sm:$0xff]  ;;  %v1457_v27 = vld [vmem:[%s5139_s10] sm:$0xff] }
 0x447   : > { %v1262_v9 = vadd.f32 %v1247_v17, %v4041_v21  ;;  %v4221_v21 = vsel %vm1289_vm3, %v3615_v25, %v1288_v29  ;;  %v1469_v17 = vld [vmem:[%s5139_s10 + $0x60] sm:$0xff]  ;;  %v1462_v25 = vld [vmem:[%s5139_s10 + $0x28] sm:$0xff] }
 0x448   : > { %v1458_v29 = vld [vmem:[%s5139_s10 + $0x8] sm:$0xff] }
 0x449   : > { %1276 = vadd.xlane.f32.xlu2 %v1262_v9 }
 0x44c   : > { %v1249_v18 = vpop.f32.mrf.mxu2 }
 0x44d   : > { %v1250_v19 = vadd.f32 %v3569_v1, %v1249_v18  ;;  %v1467_v18 = vld [vmem:[%s5139_s10 + $0x50] sm:$0xff] }
 0x44f   : > { %v1263_v23 = vadd.f32 %v1250_v19, %v4054_v31  ;;  %v1468_v19 = vld [vmem:[%s5139_s10 + $0x58] sm:$0xff] }
 0x451   : > { %1278 = vadd.xlane.f32.xlu0 %v1263_v23 }
 0x454   : > { %v1252_v11 = vpop.f32.mrf.mxu2 }
 0x455   : > { %v1253_v20 = vadd.f32 %v3569_v1, %v1252_v11  ;;  %v1466_v11 = vld [vmem:[%s5139_s10 + $0x48] sm:$0xff] }
 0x457   : > { %v1264_v33 = vadd.f32 %v1253_v20, %v4067_v41  ;;  %v1463_v20 = vld [vmem:[%s5139_s10 + $0x30] sm:$0xff] }
 0x459   : > { %1280 = vadd.xlane.f32.xlu2 %v1264_v33 }
 0x45c   : > { %v1255_v41 = vpop.f32.mrf.mxu2 }
 0x45d   : > { %v1256_v36 = vadd.f32 %v3569_v1, %v1255_v41  ;;  %v1483_v1 = vld [vmem:[%s5139_s10 + $0xd0] sm:$0xff] }
 0x45f   : > { %v4232_v38 = vadd.f32 %v1256_v36, %v4077_v48  ;;  %v1487_v48 = vld [vmem:[%s5139_s10 + $0xf0] sm:$0xff] }
 0x460   : > { %1495 = vmatpush.msra.mxu3 %v1487_v48 }
 0x462   : > { %1496 = vmatpush.msra.mxu3 %v1485_v51 }
 0x464   : > { %1497 = vmatpush.msra.mxu3 %v1483_v1 }
 0x466   : > { %1498 = vmatpush.msra.mxu3 %v1481_v3 }
 0x468   : > { %1499 = vmatpush.msra.mxu3 %v1479_v5 }
 0x49c   : > { %v1269_v30 = vpop.xlane.xlu1 %1268 }
 0x49d   : > { %v1291_v32 = vmul.f32 %v4221_v21, %v1269_v30 }
 0x49f   : > { %v4224_v31 = vsub.f32 %v1258_v4, %v1291_v32  ;;  %v1482_v4 = vld [vmem:[%s5139_s10 + $0xc8] sm:$0xff] }
 0x4a0   : > { %1539 = vmatpush.msra.mxu0 %v1482_v4 }
 0x4a1   : > { %v1307_v34 = vmul.f32 %v4224_v31, %v4224_v31 }
 0x4a2   : > { %1540 = vmatpush.msra.mxu0 %v1480_v6 }
 0x4a3   : > { %1315 = vadd.xlane.f32.xlu1 %v1307_v34 }
 0x4a4   : > { %v1271_v40 = vpop.xlane.xlu2 %1270  ;;  %1541 = vmatpush.msra.mxu0 %v1478_v8 }
 0x4a5   : > { %v1292_v37 = vmul.f32 %v4221_v21, %v1271_v40 }
 0x4a7   : > { %v4229_v16 = vsub.f32 %v1259_v7, %v1292_v37  ;;  %v1477_v7 = vld [vmem:[%s5139_s10 + $0xa0] sm:$0xff] }
 0x4a8   : > { %1500 = vmatpush.msra.mxu3 %v1477_v7 }
 0x4a9   : > { %v1308_v39 = vmul.f32 %v4229_v16, %v4229_v16 }
 0x4aa   : > { %1501 = vmatpush.msra.mxu3 %v1475_v10 }
 0x4ab   : > { %1282 = vadd.xlane.f32.xlu1 %v4232_v38  ;;  %1317 = vadd.xlane.f32.xlu0 %v1308_v39 }
 0x4ac   : > { %v1273_v42 = vpop.xlane.xlu0 %1272  ;;  %1502 = vmatpush.msra.mxu3 %v1473_v13 }
 0x4ad   : > { %v1293_v44 = vmul.f32 %v4221_v21, %v1273_v42 }
 0x4af   : > { %v4238_v45 = vsub.f32 %v1260_v12, %v1293_v44  ;;  %v1476_v12 = vld [vmem:[%s5139_s10 + $0x98] sm:$0xff] }
 0x4b0   : > { %1542 = vmatpush.msra.mxu0 %v1476_v12 }
 0x4b1   : > { %v1309_v46 = vmul.f32 %v4238_v45, %v4238_v45 }
 0x4b2   : > { %1543 = vmatpush.msra.mxu0 %v1474_v35 }
 0x4b3   : > { %1319 = vadd.xlane.f32.xlu2 %v1309_v46 }
 0x4b4   : > { %v1275_v55 = vpop.xlane.xlu1 %1274  ;;  %1544 = vmatpush.msra.mxu0 %v1472_v15 }
 0x4b5   : > { %v1294_v58 = vmul.f32 %v4221_v21, %v1275_v55 }
 0x4b7   : > { %v4255_v47 = vsub.f32 %v1261_v14, %v1294_v58  ;;  %v1471_v14 = vld [vmem:[%s5139_s10 + $0x70] sm:$0xff] }
 0x4b8   : > { %1503 = vmatpush.msra.mxu3 %v1471_v14 }
 0x4b9   : > { %v1310_v22 = vmul.f32 %v4255_v47, %v4255_v47 }
 0x4ba   : > { %1504 = vmatpush.msra.mxu3 %v1469_v17 }
 0x4bb   : > { %1321 = vadd.xlane.f32.xlu0 %v1310_v22 }
 0x4bc   : > { %v1277_v50 = vpop.xlane.xlu2 %1276  ;;  %1505 = vmatpush.msra.mxu3 %v1467_v18 }
 0x4bd   : > { %v1295_v59 = vmul.f32 %v4221_v21, %v1277_v50 }
 0x4bf   : > { %v4260_v52 = vsub.f32 %v1262_v9, %v1295_v59  ;;  %v1470_v9 = vld [vmem:[%s5139_s10 + $0x68] sm:$0xff] }
 0x4c0   : > { %1545 = vmatpush.msra.mxu0 %v1470_v9 }
 0x4c1   : > { %v1311_v60 = vmul.f32 %v4260_v52, %v4260_v52 }
 0x4c2   : > { %1546 = vmatpush.msra.mxu0 %v1468_v19 }
 0x4c3   : > { %1323 = vadd.xlane.f32.xlu1 %v1311_v60  ;;  %v4370_v60 = vld [vmem:[%s5137_s8] ss:$0 sm:$0xff] }
 0x4c4   : > { %v1279_v54 = vpop.xlane.xlu0 %1278  ;;  %1547 = vmatpush.msra.mxu0 %v1466_v11 }
 0x4c5   : > { %v1296_v61 = vmul.f32 %v4221_v21, %v1279_v54 }
 0x4c7   : > { %v4265_v28 = vsub.f32 %v1263_v23, %v1296_v61  ;;  %v1465_v23 = vld [vmem:[%s5139_s10 + $0x40] sm:$0xff] }
 0x4c8   : > { %1506 = vmatpush.msra.mxu3 %v1465_v23 }
 0x4c9   : > { %v1312_v56 = vmul.f32 %v4265_v28, %v4265_v28 }
 0x4ca   : > { %1507 = vmatpush.msra.mxu3 %v1463_v20 }
 0x4cb   : > { %1325 = vadd.xlane.f32.xlu2 %v1312_v56 }
 0x4cc   : > { %v1281_v62 = vpop.xlane.xlu2 %1280  ;;  %1508 = vmatpush.msra.mxu3 %v1461_v24 }
 0x4cd   : > { %v1297_v63 = vmul.f32 %v4221_v21, %v1281_v62  ;;  %v4376_v62 = vld [vmem:[%s5138_s9] ss:$0 sm:$0xff] }
 0x4ce   : > { %1509 = vmatpush.msra.mxu3 %v1459_v43 }
 0x4cf   : > { %v4270_v53 = vsub.f32 %v1264_v33, %v1297_v63  ;;  %v1464_v33 = vld [vmem:[%s5139_s10 + $0x38] sm:$0xff] }
 0x4d0   : > { %1548 = vmatpush.msra.mxu0 %v1464_v33  ;;  %1510 = vmatpush.msra.mxu3 %v1457_v27 }
 0x4d1   : > { %v1313_v0 = vmul.f32 %v4270_v53, %v4270_v53 }
 0x4d2   : > { %1549 = vmatpush.msra.mxu0 %v1462_v25 }
 0x4d3   : > { %1327 = vadd.xlane.f32.xlu0 %v1313_v0 }
 0x4d4   : > { %1550 = vmatpush.msra.mxu0 %v1460_v26 }
 0x4d6   : > { %1551 = vmatpush.msra.mxu0 %v1458_v29 }
 0x516   : > { %v1316_v30 = vpop.xlane.xlu1 %1315 }
 0x517   : > { %v1331_v32 = vmul.f32 %v1316_v30, %v4221_v21 }
 0x519   : > { %v1339_v34 = vadd.f32 1e-05, %v1331_v32 }
 0x51b   : > { %3616 = vrsqrt.f32 %v1339_v34  ;;  %vm1353_vm5 = vweird.f32 %v1339_v34 }
 0x51e   : > { %v1283_v41 = vpop.xlane.xlu1 %1282  ;;  %v1318_v40 = vpop.xlane.xlu0 %1317 }
 0x51f   : > { %v1298_v36 = vmul.f32 %v4221_v21, %v1283_v41  ;;  %v1332_v37 = vmul.f32 %v1318_v40, %v4221_v21  ;;  %v1623_v40 = vld [vmem:[#allocation4 + $0xf0] sm:$0xff] }
 0x521   : > { %v3617_v39 = vpop.eup %3616  ;;  %v4362_v42 = vsub.f32 %v4232_v38, %v1298_v36  ;;  %v1340_v44 = vadd.f32 1e-05, %v1332_v37 }
 0x522   : > { %v1348_v46 = vmul.f32 %v3617_v39, %v1339_v34  ;;  %vm1354_vm4 = vweird.f32 %v3617_v39 }
 0x523   : > { %3618 = vrsqrt.f32 %v1340_v44  ;;  %v1314_v48 = vmul.f32 %v4362_v42, %v4362_v42  ;;  %vm1355_vm6 = vmor %vm1353_vm5, %vm1354_vm4  ;;  %vm1363_vm8 = vweird.f32 %v1340_v44 }
 0x524   : > { %v1349_v49 = vmul.f32 %v3617_v39, %v1348_v46 }
 0x525   : > { %1329 = vadd.xlane.f32.xlu1 %v1314_v48 }
 0x526   : > { %v1350_v51 = vmul.f32 0.5, %v1349_v49  ;;  %v1320_v55 = vpop.xlane.xlu2 %1319 }
 0x527   : > { %v1333_v57 = vmul.f32 %v1320_v55, %v4221_v21 }
 0x528   : > { %v1351_v58 = vsub.f32 1.5, %v1350_v51 }
 0x529   : > { %v3619_v22 = vpop.eup %3618  ;;  %v1341_v50 = vadd.f32 1e-05, %v1333_v57 }
 0x52a   : > { %v1352_v59 = vmul.f32 %v3617_v39, %v1351_v58  ;;  %v1358_v38 = vmul.f32 %v3619_v22, %v1340_v44  ;;  %vm1364_vm7 = vweird.f32 %v3619_v22 }
 0x52b   : > { %3620 = vrsqrt.f32 %v1341_v50  ;;  %vm1365_vm9 = vmor %vm1363_vm8, %vm1364_vm7  ;;  %vm1373_vm11 = vweird.f32 %v1341_v50 }
 0x52c   : > { %v1356_v54 = vsel %vm1355_vm6, %v3617_v39, %v1352_v59  ;;  %v1359_v61 = vmul.f32 %v3619_v22, %v1358_v38 }
 0x52d   : > { %v1427_v56 = vmul.f32 %v1356_v54, %v4224_v31 }
 0x52e   : > { %v1360_v63 = vmul.f32 0.5, %v1359_v61  ;;  %v1322_v0 = vpop.xlane.xlu0 %1321 }
 0x52f   : > { %v1334_v1 = vmul.f32 %v1322_v0, %v4221_v21  ;;  %v1438_v2 = vmul.f32 %v4370_v60, %v1427_v56 }
 0x530   : > { %v1361_v3 = vsub.f32 1.5, %v1360_v63 }
 0x531   : > { %v3621_v4 = vpop.eup %3620  ;;  %v1342_v5 = vadd.f32 1e-05, %v1334_v1  ;;  %v4381_v6 = vadd.f32 %v4376_v62, %v1438_v2 }
 0x532   : > { %v1362_v7 = vmul.f32 %v3619_v22, %v1361_v3  ;;  %v1368_v31 = vmul.f32 %v3621_v4, %v1341_v50  ;;  %vm1374_vm10 = vweird.f32 %v3621_v4 }
 0x533   : > { %3622 = vrsqrt.f32 %v1342_v5  ;;  %1511 = vmatmul.f32.vlgmr.msra.gmra.mxu3 %v4381_v6  ;;  %1552 = vmatmul.f32.vlgmr.msra.gmra.mxu0 %v4381_v6  ;;  %vm1375_vm12 = vmor %vm1373_vm11, %vm1374_vm10  ;;  %vm1383_vm14 = vweird.f32 %v1342_v5 }
 0x534   : > { %v1366_v8 = vsel %vm1365_vm9, %v3619_v22, %v1362_v7  ;;  %v1369_v10 = vmul.f32 %v3621_v4, %v1368_v31 }
 0x535   : > { %v1428_v12 = vmul.f32 %v1366_v8, %v4229_v16 }
 0x536   : > { %v1370_v13 = vmul.f32 0.5, %v1369_v10  ;;  %v1324_v35 = vpop.xlane.xlu1 %1323 }
 0x537   : > { %v1335_v14 = vmul.f32 %v1324_v35, %v4221_v21  ;;  %v1439_v15 = vmul.f32 %v4370_v60, %v1428_v12 }
 0x538   : > { %v1371_v17 = vsub.f32 1.5, %v1370_v13 }
 0x539   : > { %v3623_v9 = vpop.eup %3622  ;;  %v1343_v18 = vadd.f32 1e-05, %v1335_v14  ;;  %v4389_v19 = vadd.f32 %v4376_v62, %v1439_v15  ;;  %v1622_v14 = vld [vmem:[#allocation4 + $0xe8] sm:$0xff]  ;;  %v1608_v15 = vld [vmem:[#allocation4 + $0x78] sm:$0xff] }
 0x53a   : > { %v1372_v23 = vmul.f32 %v3621_v4, %v1371_v17  ;;  %v1378_v11 = vmul.f32 %v3623_v9, %v1342_v5  ;;  %vm1384_vm13 = vweird.f32 %v3623_v9  ;;  %v1621_v17 = vld [vmem:[#allocation4 + $0xe0] sm:$0xff]  ;;  %1629 = vmatpush.msra.mxu1 %v1608_v15 }
 0x53b   : > { %3624 = vrsqrt.f32 %v1343_v18  ;;  %1514 = vmatmul.f32.gmra.mxu3 %v4389_v19  ;;  %1555 = vmatmul.f32.gmra.mxu0 %v4389_v19  ;;  %vm1385_vm15 = vmor %vm1383_vm14, %vm1384_vm13  ;;  %vm1393_vm2 = vweird.f32 %v1343_v18 }
 0x53c   : > { %v1376_v16 = vsel %vm1375_vm12, %v3621_v4, %v1372_v23  ;;  %v1379_v20 = vmul.f32 %v3623_v9, %v1378_v11  ;;  %v1619_v23 = vld [vmem:[#allocation4 + $0xd0] sm:$0xff]  ;;  %v1605_v11 = vld [vmem:[#allocation4 + $0x60] sm:$0xff] }
 0x53d   : > { %v1429_v33 = vmul.f32 %v1376_v16, %v4238_v45  ;;  %v1624_v45 = vld [vmem:[#allocation4 + $0xf8] sm:$0xff]  ;;  %v1618_v16 = vld [vmem:[#allocation4 + $0xc8] sm:$0xff] }
 0x53e   : > { %v1380_v24 = vmul.f32 0.5, %v1379_v20  ;;  %v1326_v25 = vpop.xlane.xlu2 %1325  ;;  %1670 = vmatpush.msrb.mxu2 %v1624_v45  ;;  %v1604_v20 = vld [vmem:[#allocation4 + $0x58] sm:$0xff] }
 0x53f   : > { %v1336_v43 = vmul.f32 %v1326_v25, %v4221_v21  ;;  %v1440_v26 = vmul.f32 %v4370_v60, %v1429_v33  ;;  %v1617_v33 = vld [vmem:[#allocation4 + $0xc0] sm:$0xff]  ;;  %v1616_v25 = vld [vmem:[#allocation4 + $0xb8] sm:$0xff] }
 0x540   : > { %v1381_v27 = vsub.f32 1.5, %v1380_v24  ;;  %1671 = vmatpush.msrb.mxu2 %v1623_v40  ;;  %v1603_v24 = vld [vmem:[#allocation4 + $0x50] sm:$0xff]  ;;  %v1612_v45 = vld [vmem:[#allocation4 + $0x98] sm:$0xff]  ;;  %v1598_v40 = vld [vmem:[#allocation4 + $0x28] sm:$0xff] }
 0x541   : > { %v3625_v29 = vpop.eup %3624  ;;  %v1344_v30 = vadd.f32 1e-05, %v1336_v43  ;;  %v4397_v32 = vadd.f32 %v4376_v62, %v1440_v26  ;;  %v1602_v43 = vld [vmem:[#allocation4 + $0x48] sm:$0xff]  ;;  %v1615_v26 = vld [vmem:[#allocation4 + $0xb0] sm:$0xff] }
 0x542   : > { %v1382_v34 = vmul.f32 %v3623_v9, %v1381_v27  ;;  %v1388_v41 = vmul.f32 %v3625_v29, %v1343_v18  ;;  %vm1394_vm1 = vweird.f32 %v3625_v29  ;;  %1672 = vmatpush.msrb.mxu2 %v1622_v14  ;;  %v1620_v18 = vld [vmem:[#allocation4 + $0xd8] sm:$0xff]  ;;  %v1601_v27 = vld [vmem:[#allocation4 + $0x40] sm:$0xff] }
 0x543   : > { %3626 = vrsqrt.f32 %v1344_v30  ;;  %1517 = vmatmul.f32.gmra.mxu3 %v4397_v32  ;;  %1558 = vmatmul.f32.gmra.mxu0 %v4397_v32  ;;  %vm1395_vm3 = vmor %vm1393_vm2, %vm1394_vm1  ;;  %vm1403_vm5 = vweird.f32 %v1344_v30 }
 0x544   : > { %v1386_v36 = vsel %vm1385_vm15, %v3623_v9, %v1382_v34  ;;  %v1389_v37 = vmul.f32 %v3625_v29, %v1388_v41  ;;  %1673 = vmatpush.msrb.mxu2 %v1621_v17  ;;  %v1607_v9 = vld [vmem:[#allocation4 + $0x70] sm:$0xff]  ;;  %v1613_v34 = vld [vmem:[#allocation4 + $0xa0] sm:$0xff] }
 0x545   : > { %v1430_v39 = vmul.f32 %v1386_v36, %v4255_v47  ;;  %1630 = vmatpush.msra.mxu1 %v1607_v9  ;;  %v1599_v41 = vld [vmem:[#allocation4 + $0x30] sm:$0xff] }
 0x546   : > { %v1390_v44 = vmul.f32 0.5, %v1389_v37  ;;  %v1328_v46 = vpop.xlane.xlu0 %1327  ;;  %1674 = vmatpush.msrb.mxu2 %v1620_v18  ;;  %v1611_v36 = vld [vmem:[#allocation4 + $0x90] sm:$0xff]  ;;  %v1597_v37 = vld [vmem:[#allocation4 + $0x20] sm:$0xff] }
 0x547   : > { %v1337_v48 = vmul.f32 %v1328_v46, %v4221_v21  ;;  %v1441_v49 = vmul.f32 %v4370_v60, %v1430_v39  ;;  %v1610_v39 = vld [vmem:[#allocation4 + $0x88] sm:$0xff]  ;;  %v1609_v46 = vld [vmem:[#allocation4 + $0x80] sm:$0xff] }
 0x548   : > { %v1391_v51 = vsub.f32 1.5, %v1390_v44  ;;  %1675 = vmatpush.msrb.mxu2 %v1619_v23  ;;  %v1596_v44 = vld [vmem:[#allocation4 + $0x18] sm:$0xff] }
 0x549   : > { %v3627_v55 = vpop.eup %3626  ;;  %v1345_v57 = vadd.f32 1e-05, %v1337_v48  ;;  %v4405_v58 = vadd.f32 %v4376_v62, %v1441_v49  ;;  %v1595_v48 = vld [vmem:[#allocation4 + $0x10] sm:$0xff] }
 0x54a   : > { %v1392_v22 = vmul.f32 %v3625_v29, %v1391_v51  ;;  %v1398_v50 = vmul.f32 %v3627_v55, %v1344_v30  ;;  %vm1404_vm4 = vweird.f32 %v3627_v55  ;;  %1676 = vmatpush.msrb.mxu2 %v1618_v16  ;;  %v1600_v30 = vld [vmem:[#allocation4 + $0x38] sm:$0xff]  ;;  %v1594_v51 = vld [vmem:[#allocation4 + $0x8] sm:$0xff] }
 0x54b   : > { %3628 = vrsqrt.f32 %v1345_v57  ;;  %1520 = vmatmul.f32.gmra.mxu3 %v4405_v58  ;;  %1561 = vmatmul.f32.gmra.mxu0 %v4405_v58  ;;  %vm1405_vm6 = vmor %vm1403_vm5, %vm1404_vm4  ;;  %vm1413_vm8 = vweird.f32 %v1345_v57 }
 0x54c   : > { %v1396_v47 = vsel %vm1395_vm3, %v3625_v29, %v1392_v22  ;;  %v1399_v59 = vmul.f32 %v3627_v55, %v1398_v50  ;;  %1677 = vmatpush.msrb.mxu2 %v1617_v33  ;;  %v1614_v29 = vld [vmem:[#allocation4 + $0xa8] sm:$0xff] }
 0x54d   : > { %v1431_v38 = vmul.f32 %v1396_v47, %v4260_v52 }
 0x54e   : > { %v1400_v54 = vmul.f32 0.5, %v1399_v59  ;;  %1678 = vmatpush.msrb.mxu2 %v1616_v25 }
 0x54f   : > { %v1442_v61 = vmul.f32 %v4370_v60, %v1431_v38 }
 0x550   : > { %v1401_v56 = vsub.f32 1.5, %v1400_v54  ;;  %1679 = vmatpush.msrb.mxu2 %v1615_v26 }
 0x551   : > { %v3629_v63 = vpop.eup %3628  ;;  %v4412_v0 = vadd.f32 %v4376_v62, %v1442_v61  ;;  %v1489_v61 = vld [vmem:[%s5140_s11] sm:$0x3] }
 0x552   : > { %v1402_v1 = vmul.f32 %v3627_v55, %v1401_v56  ;;  %v1408_v2 = vmul.f32 %v3629_v63, %v1345_v57  ;;  %vm1414_vm7 = vweird.f32 %v3629_v63  ;;  %1680 = vmatpush.msrb.mxu2 %v1614_v29  ;;  %v1593_v57 = vld [vmem:[#allocation4] sm:$0xff] }
 0x553   : > { %1523 = vmatmul.f32.gmra.mxu3 %v4412_v0  ;;  %1564 = vmatmul.f32.gmra.mxu0 %v4412_v0  ;;  %vm1415_vm9 = vmor %vm1413_vm8, %vm1414_vm7 }
 0x554   : > { %v1406_v3 = vsel %vm1405_vm6, %v3627_v55, %v1402_v1  ;;  %v1409_v4 = vmul.f32 %v3629_v63, %v1408_v2  ;;  %1681 = vmatpush.msrb.mxu2 %v1613_v34 }
 0x555   : > { %v1432_v52 = vmul.f32 %v1406_v3, %v4265_v28 }
 0x556   : > { %v1410_v5 = vmul.f32 0.5, %v1409_v4  ;;  %1682 = vmatpush.msrb.mxu2 %v1612_v45 }
 0x557   : > { %v1443_v7 = vmul.f32 %v4370_v60, %v1432_v52 }
 0x558   : > { %v1411_v31 = vsub.f32 1.5, %v1410_v5  ;;  %1683 = vmatpush.msrb.mxu2 %v1611_v36 }
 0x559   : > { %v4419_v8 = vadd.f32 %v4376_v62, %v1443_v7 }
 0x55a   : > { %v1412_v10 = vmul.f32 %v3629_v63, %v1411_v31  ;;  %1684 = vmatpush.msrb.mxu2 %v1610_v39  ;;  %v4442_v31 = vperm.slane %v1489_v61, 0 }
 0x55b   : > { %1526 = vmatmul.f32.gmra.mxu3 %v4419_v8  ;;  %1567 = vmatmul.f32.gmra.mxu0 %v4419_v8 }
 0x55c   : > { %v1416_v12 = vsel %vm1415_vm9, %v3629_v63, %v1412_v10  ;;  %1685 = vmatpush.msrb.mxu2 %v1609_v46  ;;  %v4434_v63 = vperm.slane %v1489_v61, 1 }
 0x55d   : > { %v1433_v13 = vmul.f32 %v1416_v12, %v4270_v53  ;;  %v1606_v53 = vld [vmem:[#allocation4 + $0x68] sm:$0xff] }
 0x55e   : > { %1631 = vmatpush.msra.mxu1 %v1606_v53 }
 0x55f   : > { %v1444_v28 = vmul.f32 %v4370_v60, %v1433_v13 }
 0x560   : > { %1632 = vmatpush.msra.mxu1 %v1605_v11 }
 0x561   : > { %v4426_v35 = vadd.f32 %v4376_v62, %v1444_v28 }
 0x562   : > { %1633 = vmatpush.msra.mxu1 %v1604_v20 }
 0x563   : > { %1529 = vmatmul.f32.gmra.mxu3 %v4426_v35  ;;  %1570 = vmatmul.f32.gmra.mxu0 %v4426_v35 }
 0x564   : > { %1634 = vmatpush.msra.mxu1 %v1603_v24 }
 0x566   : > { %1635 = vmatpush.msra.mxu1 %v1602_v43 }
 0x568   : > { %1636 = vmatpush.msra.mxu1 %v1601_v27 }
 0x56a   : > { %1637 = vmatpush.msra.mxu1 %v1600_v30 }
 0x56c   : > { %1638 = vmatpush.msra.mxu1 %v1599_v41 }
 0x56e   : > { %1639 = vmatpush.msra.mxu1 %v1598_v40 }
 0x570   : > { %1640 = vmatpush.msra.mxu1 %v1597_v37 }
 0x572   : > { %1641 = vmatpush.msra.mxu1 %v1596_v44 }
 0x574   : > { %1642 = vmatpush.msra.mxu1 %v1595_v48 }
 0x576   : > { %1643 = vmatpush.msra.mxu1 %v1594_v51 }
 0x578   : > { %1644 = vmatpush.msra.mxu1 %v1593_v57 }
 0x598   : > { %v1330_v49 = vpop.xlane.xlu1 %1329 }
 0x599   : > { %v1338_v55 = vmul.f32 %v1330_v49, %v4221_v21 }
 0x59b   : > { %v1346_v22 = vadd.f32 1e-05, %v1338_v55 }
 0x59d   : > { %3630 = vrsqrt.f32 %v1346_v22  ;;  %vm1423_vm11 = vweird.f32 %v1346_v22 }
 0x5a3   : > { %v3631_v50 = vpop.eup %3630 }
 0x5a4   : > { %v1418_v47 = vmul.f32 %v3631_v50, %v1346_v22  ;;  %vm1424_vm10 = vweird.f32 %v3631_v50 }
 0x5a5   : > { %vm1425_vm12 = vmor %vm1423_vm11, %vm1424_vm10 }
 0x5a6   : > { %v1419_v59 = vmul.f32 %v3631_v50, %v1418_v47 }
 0x5a8   : > { %v1420_v38 = vmul.f32 0.5, %v1419_v59  ;;  %v3572_v59 = vld [vmem:[%s5142_s13] ss:$0 sm:$0xff] }
 0x5aa   : > { %v1421_v54 = vsub.f32 1.5, %v1420_v38 }
 0x5ac   : > { %v1422_v56 = vmul.f32 %v3631_v50, %v1421_v54 }
 0x5ae   : > { %v1426_v1 = vsel %vm1425_vm12, %v3631_v50, %v1422_v56 }
 0x5af   : > { %v1434_v2 = vmul.f32 %v1426_v1, %v4362_v42 }
 0x5b0   : > { %v1553_v3 = vpop.f32.mrf.mxu0 }
 0x5b1   : > { %v1554_v4 = vadd.f32 %v1553_v3, %v4434_v63  ;;  %v1445_v52 = vmul.f32 %v4370_v60, %v1434_v2 }
 0x5b3   : > { %v1578_v5 = vmax.f32 %v1554_v4, 0.0  ;;  %v4440_v7 = vadd.f32 %v4376_v62, %v1445_v52 }
 0x5b5   : > { %1532 = vmatmul.f32.gmra.mxu3 %v4440_v7  ;;  %1573 = vmatmul.f32.gmra.mxu0 %v4440_v7 }
 0x5b6   : > { %1686 = vmatmul.f32.vlgmr.msrb.gmra.mxu2 %v1578_v5  ;;  %v1512_v10 = vpop.f32.mrf.mxu3 }
 0x5b7   : > { %v1513_v12 = vadd.f32 %v1512_v10, %v4442_v31 }
 0x5b8   : > { %v1556_v42 = vpop.f32.mrf.mxu0 }
 0x5b9   : > { %v1577_v13 = vmax.f32 %v1513_v12, 0.0  ;;  %v1557_v28 = vadd.f32 %v1556_v42, %v4434_v63 }
 0x5bb   : > { %1645 = vmatmul.f32.vlgmr.msra.gmra.mxu1 %v1577_v13  ;;  %v1580_v60 = vmax.f32 %v1557_v28, 0.0 }
 0x5be   : > { %1689 = vmatmul.f32.gmra.mxu2 %v1580_v60  ;;  %v1515_v14 = vpop.f32.mrf.mxu3 }
 0x5bf   : > { %v1516_v62 = vadd.f32 %v1515_v14, %v4442_v31 }
 0x5c0   : > { %v1559_v15 = vpop.f32.mrf.mxu0 }
 0x5c1   : > { %v1560_v17 = vadd.f32 %v1559_v15, %v4434_v63  ;;  %v1579_v9 = vmax.f32 %v1516_v62, 0.0 }
 0x5c3   : > { %1648 = vmatmul.f32.gmra.mxu1 %v1579_v9  ;;  %v1582_v18 = vmax.f32 %v1560_v17, 0.0 }
 0x5c6   : > { %1692 = vmatmul.f32.gmra.mxu2 %v1582_v18  ;;  %v1518_v53 = vpop.f32.mrf.mxu3 }
 0x5c7   : > { %v1519_v23 = vadd.f32 %v1518_v53, %v4442_v31 }
 0x5c8   : > { %v1562_v11 = vpop.f32.mrf.mxu0 }
 0x5c9   : > { %v1563_v16 = vadd.f32 %v1562_v11, %v4434_v63  ;;  %v1581_v20 = vmax.f32 %v1519_v23, 0.0 }
 0x5cb   : > { %1651 = vmatmul.f32.gmra.mxu1 %v1581_v20  ;;  %v1584_v33 = vmax.f32 %v1563_v16, 0.0 }
 0x5ce   : > { %1695 = vmatmul.f32.gmra.mxu2 %v1584_v33  ;;  %v1521_v24 = vpop.f32.mrf.mxu3 }
 0x5cf   : > { %v1522_v25 = vadd.f32 %v1521_v24, %v4442_v31 }
 0x5d0   : > { %v1565_v43 = vpop.f32.mrf.mxu0 }
 0x5d1   : > { %v1566_v26 = vadd.f32 %v1565_v43, %v4434_v63  ;;  %v1583_v27 = vmax.f32 %v1522_v25, 0.0 }
 0x5d3   : > { %v1586_v29 = vmax.f32 %v1566_v26, 0.0  ;;  %1654 = vmatmul.f32.gmra.mxu1 %v1583_v27 }
 0x5d6   : > { %1698 = vmatmul.f32.gmra.mxu2 %v1586_v29  ;;  %v1524_v30 = vpop.f32.mrf.mxu3 }
 0x5d7   : > { %v1525_v34 = vadd.f32 %v1524_v30, %v4442_v31 }
 0x5d8   : > { %v1568_v41 = vpop.f32.mrf.mxu0 }
 0x5d9   : > { %v1569_v45 = vadd.f32 %v1568_v41, %v4434_v63  ;;  %v1585_v40 = vmax.f32 %v1525_v34, 0.0 }
 0x5db   : > { %v1588_v36 = vmax.f32 %v1569_v45, 0.0  ;;  %1657 = vmatmul.f32.gmra.mxu1 %v1585_v40 }
 0x5de   : > { %1701 = vmatmul.f32.gmra.mxu2 %v1588_v36  ;;  %v1527_v37 = vpop.f32.mrf.mxu3 }
 0x5df   : > { %v1528_v39 = vadd.f32 %v1527_v37, %v4442_v31 }
 0x5e0   : > { %v1571_v44 = vpop.f32.mrf.mxu0 }
 0x5e1   : > { %v1572_v46 = vadd.f32 %v1571_v44, %v4434_v63  ;;  %v1587_v48 = vmax.f32 %v1528_v39, 0.0 }
 0x5e3   : > { %v1590_v49 = vmax.f32 %v1572_v46, 0.0  ;;  %1660 = vmatmul.f32.gmra.mxu1 %v1587_v48 }
 0x5e6   : > { %1704 = vmatmul.f32.gmra.mxu2 %v1590_v49  ;;  %v1530_v51 = vpop.f32.mrf.mxu3 }
 0x5e7   : > { %v1531_v55 = vadd.f32 %v1530_v51, %v4442_v31  ;;  %v1949_v51 = vld [vmem:[#allocation2 + $0x2e8] sm:$0xff] }
 0x5e8   : > { %1961 = vmatpush.msrb.mxu3 %v1949_v51  ;;  %v1908_v51 = vld [vmem:[#allocation2 + $0x1a0] sm:$0xff] }
 0x5e9   : > { %v1589_v57 = vmax.f32 %v1531_v55, 0.0  ;;  %v1950_v55 = vld [vmem:[#allocation2 + $0x2f0] sm:$0xff] }
 0x5ea   : > { %2002 = vmatpush.msrb.mxu0 %v1950_v55  ;;  %v1909_v55 = vld [vmem:[#allocation2 + $0x1a8] sm:$0xff] }
 0x5eb   : > { %1663 = vmatmul.f32.gmra.mxu1 %v1589_v57  ;;  %v1951_v57 = vld [vmem:[#allocation2 + $0x2f8] sm:$0xff] }
 0x5ec   : > { %2043 = vmatpush.msrb.mxu1 %v1951_v57  ;;  %v1904_v57 = vld [vmem:[#allocation2 + $0x180] sm:$0xff] }
 0x632   : > { %v1574_v22 = vpop.f32.mrf.mxu0 }
 0x633   : > { %v1575_v50 = vadd.f32 %v1574_v22, %v4434_v63 }
 0x635   : > { %v1592_v47 = vmax.f32 %v1575_v50, 0.0  ;;  %v1947_v50 = vld [vmem:[#allocation2 + $0x2d8] sm:$0xff] }
 0x636   : > { %2003 = vmatpush.msrb.mxu0 %v1947_v50 }
 0x637   : > { %1707 = vmatmul.f32.gmra.mxu2 %v1592_v47  ;;  %v1948_v47 = vld [vmem:[#allocation2 + $0x2e0] sm:$0xff] }
 0x638   : > { %v1533_v38 = vpop.f32.mrf.mxu3  ;;  %v1646_v54 = vpop.f32.mrf.mxu1  ;;  %2044 = vmatpush.msrb.mxu1 %v1948_v47 }
 0x639   : > { %v1534_v61 = vadd.f32 %v1533_v38, %v4442_v31  ;;  %v1647_v56 = vadd.f32 %v3572_v59, %v1646_v54  ;;  %v1687_v1 = vpop.f32.mrf.mxu2 }
 0x63b   : > { %v1688_v2 = vadd.f32 %v1687_v1, %v1647_v56  ;;  %v1591_v3 = vmax.f32 %v1534_v61, 0.0 }
 0x63d   : > { %1666 = vmatmul.f32.gmra.mxu1 %v1591_v3  ;;  %v1711_v4 = vadd.f32 %v1688_v2, %v4381_v6 }
 0x63f   : > { %1721 = vadd.xlane.f32.xlu2 %v1711_v4 }
 0x640   : > { %v1649_v52 = vpop.f32.mrf.mxu1 }
 0x641   : > { %v1650_v63 = vadd.f32 %v3572_v59, %v1649_v52  ;;  %v1690_v5 = vpop.f32.mrf.mxu2 }
 0x643   : > { %v1691_v10 = vadd.f32 %v1690_v5, %v1650_v63 }
 0x645   : > { %v1712_v12 = vadd.f32 %v1691_v10, %v4389_v19 }
 0x647   : > { %1723 = vadd.xlane.f32.xlu0 %v1712_v12 }
 0x648   : > { %v1652_v42 = vpop.f32.mrf.mxu1 }
 0x649   : > { %v1653_v13 = vadd.f32 %v3572_v59, %v1652_v42  ;;  %v1693_v28 = vpop.f32.mrf.mxu2 }
 0x64b   : > { %v1694_v60 = vadd.f32 %v1693_v28, %v1653_v13  ;;  %v1943_v13 = vld [vmem:[#allocation2 + $0x2b8] sm:$0xff]  ;;  %v1944_v28 = vld [vmem:[#allocation2 + $0x2c0] sm:$0xff] }
 0x64c   : > { %2004 = vmatpush.msrb.mxu0 %v1944_v28 }
 0x64d   : > { %v1713_v31 = vadd.f32 %v1694_v60, %v4397_v32  ;;  %v1945_v60 = vld [vmem:[#allocation2 + $0x2c8] sm:$0xff] }
 0x64e   : > { %2045 = vmatpush.msrb.mxu1 %v1945_v60 }
 0x64f   : > { %1725 = vadd.xlane.f32.xlu1 %v1713_v31 }
 0x650   : > { %v1655_v14 = vpop.f32.mrf.mxu1 }
 0x651   : > { %v1656_v62 = vadd.f32 %v3572_v59, %v1655_v14  ;;  %v1696_v15 = vpop.f32.mrf.mxu2  ;;  %v1941_v14 = vld [vmem:[#allocation2 + $0x2a8] sm:$0xff] }
 0x652   : > { %2005 = vmatpush.msrb.mxu0 %v1941_v14 }
 0x653   : > { %v1697_v17 = vadd.f32 %v1696_v15, %v1656_v62  ;;  %v1942_v62 = vld [vmem:[#allocation2 + $0x2b0] sm:$0xff]  ;;  %v1937_v15 = vld [vmem:[#allocation2 + $0x288] sm:$0xff] }
 0x654   : > { %2046 = vmatpush.msrb.mxu1 %v1942_v62 }
 0x655   : > { %v1714_v6 = vadd.f32 %v1697_v17, %v4405_v58  ;;  %v1938_v17 = vld [vmem:[#allocation2 + $0x290] sm:$0xff] }
 0x656   : > { %2006 = vmatpush.msrb.mxu0 %v1938_v17 }
 0x657   : > { %1727 = vadd.xlane.f32.xlu2 %v1714_v6 }
 0x658   : > { %v1658_v9 = vpop.f32.mrf.mxu1 }
 0x659   : > { %v1659_v18 = vadd.f32 %v3572_v59, %v1658_v9  ;;  %v1699_v53 = vpop.f32.mrf.mxu2  ;;  %v1934_v9 = vld [vmem:[#allocation2 + $0x270] sm:$0xff] }
 0x65b   : > { %v1700_v23 = vadd.f32 %v1699_v53, %v1659_v18  ;;  %v1935_v18 = vld [vmem:[#allocation2 + $0x278] sm:$0xff]  ;;  %v1936_v53 = vld [vmem:[#allocation2 + $0x280] sm:$0xff] }
 0x65c   : > { %2007 = vmatpush.msrb.mxu0 %v1935_v18 }
 0x65d   : > { %v1715_v19 = vadd.f32 %v1700_v23, %v4412_v0  ;;  %v1931_v23 = vld [vmem:[#allocation2 + $0x258] sm:$0xff] }
 0x65f   : > { %1729 = vadd.xlane.f32.xlu0 %v1715_v19 }
 0x660   : > { %v1661_v11 = vpop.f32.mrf.mxu1 }
 0x661   : > { %v1662_v16 = vadd.f32 %v3572_v59, %v1661_v11  ;;  %v1702_v20 = vpop.f32.mrf.mxu2  ;;  %v1933_v11 = vld [vmem:[#allocation2 + $0x268] sm:$0xff] }
 0x663   : > { %v1703_v33 = vadd.f32 %v1702_v20, %v1662_v16  ;;  %v1928_v16 = vld [vmem:[#allocation2 + $0x240] sm:$0xff]  ;;  %v1929_v20 = vld [vmem:[#allocation2 + $0x248] sm:$0xff] }
 0x665   : > { %v1716_v32 = vadd.f32 %v1703_v33, %v4419_v8  ;;  %v1930_v33 = vld [vmem:[#allocation2 + $0x250] sm:$0xff] }
 0x667   : > { %1731 = vadd.xlane.f32.xlu1 %v1716_v32 }
 0x668   : > { %v1664_v24 = vpop.f32.mrf.mxu1 }
 0x669   : > { %v1665_v25 = vadd.f32 %v3572_v59, %v1664_v24  ;;  %v1705_v43 = vpop.f32.mrf.mxu2  ;;  %v1926_v24 = vld [vmem:[#allocation2 + $0x230] sm:$0xff] }
 0x66b   : > { %v1706_v26 = vadd.f32 %v1705_v43, %v1665_v25  ;;  %v1927_v25 = vld [vmem:[#allocation2 + $0x238] sm:$0xff]  ;;  %v1922_v43 = vld [vmem:[#allocation2 + $0x210] sm:$0xff] }
 0x66d   : > { %v1717_v58 = vadd.f32 %v1706_v26, %v4426_v35  ;;  %v1923_v26 = vld [vmem:[#allocation2 + $0x218] sm:$0xff] }
 0x66f   : > { %1733 = vadd.xlane.f32.xlu0 %v1717_v58 }
 0x6b2   : > { %v1722_v27 = vpop.xlane.xlu2 %1721 }
 0x6b3   : > { %v1737_v29 = vmul.f32 %v1722_v27, %v4221_v21  ;;  %v1919_v27 = vld [vmem:[#allocation2 + $0x1f8] sm:$0xff] }
 0x6b5   : > { %v4472_v30 = vsub.f32 %v1711_v4, %v1737_v29  ;;  %v1920_v29 = vld [vmem:[#allocation2 + $0x200] sm:$0xff] }
 0x6b7   : > { %v1753_v0 = vmul.f32 %v4472_v30, %v4472_v30 }
 0x6b9   : > { %1761 = vadd.xlane.f32.xlu2 %v1753_v0  ;;  %v1921_v0 = vld [vmem:[#allocation2 + $0x208] sm:$0xff] }
 0x6ba   : > { %v1724_v34 = vpop.xlane.xlu0 %1723  ;;  %v1667_v41 = vpop.f32.mrf.mxu1 }
 0x6bb   : > { %v1738_v8 = vmul.f32 %v1724_v34, %v4221_v21  ;;  %v1668_v45 = vadd.f32 %v3572_v59, %v1667_v41  ;;  %v1708_v40 = vpop.f32.mrf.mxu2  ;;  %v1916_v34 = vld [vmem:[#allocation2 + $0x1e0] sm:$0xff]  ;;  %v1917_v41 = vld [vmem:[#allocation2 + $0x1e8] sm:$0xff] }
 0x6bd   : > { %v4477_v36 = vsub.f32 %v1712_v12, %v1738_v8  ;;  %v1709_v37 = vadd.f32 %v1708_v40, %v1668_v45  ;;  %v1918_v8 = vld [vmem:[#allocation2 + $0x1f0] sm:$0xff]  ;;  %v1913_v45 = vld [vmem:[#allocation2 + $0x1c8] sm:$0xff] }
 0x6be   : > { %v1914_v40 = vld [vmem:[#allocation2 + $0x1d0] sm:$0xff] }
 0x6bf   : > { %v1754_v35 = vmul.f32 %v4477_v36, %v4477_v36  ;;  %v4482_v39 = vadd.f32 %v1709_v37, %v4440_v7  ;;  %v1946_v7 = vld [vmem:[#allocation2 + $0x2d0] sm:$0xff]  ;;  %v1915_v37 = vld [vmem:[#allocation2 + $0x1d8] sm:$0xff] }
 0x6c0   : > { %1962 = vmatpush.msrb.mxu3 %v1946_v7  ;;  %v1906_v7 = vld [vmem:[#allocation2 + $0x190] sm:$0xff] }
 0x6c1   : > { %1763 = vadd.xlane.f32.xlu1 %v1754_v35  ;;  %1735 = vadd.xlane.f32.xlu2 %v4482_v39  ;;  %v1910_v35 = vld [vmem:[#allocation2 + $0x1b0] sm:$0xff] }
 0x6c2   : > { %v1726_v44 = vpop.xlane.xlu1 %1725  ;;  %1963 = vmatpush.msrb.mxu3 %v1943_v13 }
 0x6c3   : > { %v1739_v46 = vmul.f32 %v1726_v44, %v4221_v21  ;;  %v1911_v44 = vld [vmem:[#allocation2 + $0x1b8] sm:$0xff] }
 0x6c5   : > { %v4486_v48 = vsub.f32 %v1713_v31, %v1739_v46  ;;  %v1940_v31 = vld [vmem:[#allocation2 + $0x2a0] sm:$0xff] }
 0x6c6   : > { %1964 = vmatpush.msrb.mxu3 %v1940_v31  ;;  %v1912_v46 = vld [vmem:[#allocation2 + $0x1c0] sm:$0xff] }
 0x6c7   : > { %v1755_v49 = vmul.f32 %v4486_v48, %v4486_v48 }
 0x6c8   : > { %1965 = vmatpush.msrb.mxu3 %v1937_v15 }
 0x6c9   : > { %1765 = vadd.xlane.f32.xlu0 %v1755_v49  ;;  %v1907_v49 = vld [vmem:[#allocation2 + $0x198] sm:$0xff] }
 0x6ca   : > { %v1728_v22 = vpop.xlane.xlu2 %1727  ;;  %1966 = vmatpush.msrb.mxu3 %v1934_v9 }
 0x6cb   : > { %v1740_v59 = vmul.f32 %v1728_v22, %v4221_v21  ;;  %v1905_v22 = vld [vmem:[#allocation2 + $0x188] sm:$0xff] }
 0x6cc   : > { %1967 = vmatpush.msrb.mxu3 %v1931_v23 }
 0x6cd   : > { %v4491_v38 = vsub.f32 %v1714_v6, %v1740_v59  ;;  %v1939_v6 = vld [vmem:[#allocation2 + $0x298] sm:$0xff] }
 0x6ce   : > { %2047 = vmatpush.msrb.mxu1 %v1939_v6  ;;  %1968 = vmatpush.msrb.mxu3 %v1928_v16 }
 0x6cf   : > { %v1756_v54 = vmul.f32 %v4491_v38, %v4491_v38 }
 0x6d0   : > { %2048 = vmatpush.msrb.mxu1 %v1936_v53  ;;  %v4528_v53 = vld [vmem:[%s5144_s15] ss:$0 sm:$0xff] }
 0x6d1   : > { %1767 = vadd.xlane.f32.xlu1 %v1756_v54 }
 0x6d2   : > { %v1730_v61 = vpop.xlane.xlu0 %1729  ;;  %2049 = vmatpush.msrb.mxu1 %v1933_v11 }
 0x6d3   : > { %v1741_v56 = vmul.f32 %v1730_v61, %v4221_v21 }
 0x6d4   : > { %2050 = vmatpush.msrb.mxu1 %v1930_v33 }
 0x6d5   : > { %v4496_v1 = vsub.f32 %v1715_v19, %v1741_v56  ;;  %v1932_v19 = vld [vmem:[#allocation2 + $0x260] sm:$0xff] }
 0x6d6   : > { %2008 = vmatpush.msrb.mxu0 %v1932_v19  ;;  %2051 = vmatpush.msrb.mxu1 %v1927_v25 }
 0x6d7   : > { %v1757_v2 = vmul.f32 %v4496_v1, %v4496_v1 }
 0x6d8   : > { %2009 = vmatpush.msrb.mxu0 %v1929_v20 }
 0x6d9   : > { %1769 = vadd.xlane.f32.xlu2 %v1757_v2 }
 0x6da   : > { %v1732_v3 = vpop.xlane.xlu1 %1731  ;;  %2010 = vmatpush.msrb.mxu0 %v1926_v24 }
 0x6db   : > { %v1742_v4 = vmul.f32 %v1732_v3, %v4221_v21 }
 0x6dc   : > { %2011 = vmatpush.msrb.mxu0 %v1923_v26 }
 0x6dd   : > { %v4501_v52 = vsub.f32 %v1716_v32, %v1742_v4  ;;  %v1925_v32 = vld [vmem:[#allocation2 + $0x228] sm:$0xff] }
 0x6de   : > { %1969 = vmatpush.msrb.mxu3 %v1925_v32  ;;  %2012 = vmatpush.msrb.mxu0 %v1920_v29 }
 0x6df   : > { %v1758_v63 = vmul.f32 %v4501_v52, %v4501_v52 }
 0x6e0   : > { %1970 = vmatpush.msrb.mxu3 %v1922_v43  ;;  %2013 = vmatpush.msrb.mxu0 %v1917_v41 }
 0x6e1   : > { %1771 = vadd.xlane.f32.xlu0 %v1758_v63 }
 0x6e2   : > { %v1734_v5 = vpop.xlane.xlu0 %1733  ;;  %1971 = vmatpush.msrb.mxu3 %v1919_v27  ;;  %2014 = vmatpush.msrb.mxu0 %v1914_v40 }
 0x6e3   : > { %v1743_v10 = vmul.f32 %v1734_v5, %v4221_v21 }
 0x6e4   : > { %1972 = vmatpush.msrb.mxu3 %v1916_v34  ;;  %2015 = vmatpush.msrb.mxu0 %v1911_v44 }
 0x6e5   : > { %v4506_v12 = vsub.f32 %v1717_v58, %v1743_v10  ;;  %v1924_v58 = vld [vmem:[#allocation2 + $0x220] sm:$0xff] }
 0x6e6   : > { %2052 = vmatpush.msrb.mxu1 %v1924_v58  ;;  %1973 = vmatpush.msrb.mxu3 %v1913_v45 }
 0x6e7   : > { %v1759_v42 = vmul.f32 %v4506_v12, %v4506_v12  ;;  %2016 = vmatpush.msrb.mxu0 %v1908_v51 }
 0x6e8   : > { %2053 = vmatpush.msrb.mxu1 %v1921_v0  ;;  %1974 = vmatpush.msrb.mxu3 %v1910_v35 }
 0x6e9   : > { %1773 = vadd.xlane.f32.xlu1 %v1759_v42  ;;  %2017 = vmatpush.msrb.mxu0 %v1905_v22 }
 0x6ea   : > { %2054 = vmatpush.msrb.mxu1 %v1918_v8  ;;  %1975 = vmatpush.msrb.mxu3 %v1907_v49 }
 0x6ec   : > { %2055 = vmatpush.msrb.mxu1 %v1915_v37  ;;  %1976 = vmatpush.msrb.mxu3 %v1904_v57 }
 0x6ee   : > { %2056 = vmatpush.msrb.mxu1 %v1912_v46 }
 0x6f0   : > { %2057 = vmatpush.msrb.mxu1 %v1909_v55 }
 0x6f2   : > { %2058 = vmatpush.msrb.mxu1 %v1906_v7 }
 0x72c   : > { %v1762_v50 = vpop.xlane.xlu2 %1761 }
 0x72d   : > { %v1777_v47 = vmul.f32 %v1762_v50, %v4221_v21 }
 0x72f   : > { %v1785_v59 = vadd.f32 1e-05, %v1777_v47 }
 0x731   : > { %3632 = vrsqrt.f32 %v1785_v59  ;;  %vm1799_vm14 = vweird.f32 %v1785_v59 }
 0x734   : > { %v1764_v54 = vpop.xlane.xlu1 %1763  ;;  %v1736_v61 = vpop.xlane.xlu2 %1735 }
 0x735   : > { %v1778_v56 = vmul.f32 %v1764_v54, %v4221_v21  ;;  %v1744_v2 = vmul.f32 %v1736_v61, %v4221_v21 }
 0x737   : > { %v3633_v3 = vpop.eup %3632  ;;  %v1786_v4 = vadd.f32 1e-05, %v1778_v56  ;;  %v4514_v63 = vsub.f32 %v4482_v39, %v1744_v2  ;;  %v4522_v39 = vld [vmem:[%s5143_s14] ss:$0 sm:$0xff] }
 0x738   : > { %v1794_v5 = vmul.f32 %v3633_v3, %v1785_v59  ;;  %vm1800_vm13 = vweird.f32 %v3633_v3 }
 0x739   : > { %3634 = vrsqrt.f32 %v1786_v4  ;;  %v1760_v10 = vmul.f32 %v4514_v63, %v4514_v63  ;;  %vm1801_vm15 = vmor %vm1799_vm14, %vm1800_vm13  ;;  %vm1809_vm2 = vweird.f32 %v1786_v4 }
 0x73a   : > { %v1795_v42 = vmul.f32 %v3633_v3, %v1794_v5 }
 0x73b   : > { %1775 = vadd.xlane.f32.xlu2 %v1760_v10 }
 0x73c   : > { %v1796_v13 = vmul.f32 0.5, %v1795_v42  ;;  %v1766_v28 = vpop.xlane.xlu0 %1765 }
 0x73d   : > { %v1779_v60 = vmul.f32 %v1766_v28, %v4221_v21 }
 0x73e   : > { %v1797_v31 = vsub.f32 1.5, %v1796_v13 }
 0x73f   : > { %v3635_v14 = vpop.eup %3634  ;;  %v1787_v62 = vadd.f32 1e-05, %v1779_v60 }
 0x740   : > { %v1798_v15 = vmul.f32 %v3633_v3, %v1797_v31  ;;  %v1804_v17 = vmul.f32 %v3635_v14, %v1786_v4  ;;  %vm1810_vm1 = vweird.f32 %v3635_v14 }
 0x741   : > { %3636 = vrsqrt.f32 %v1787_v62  ;;  %vm1811_vm3 = vmor %vm1809_vm2, %vm1810_vm1  ;;  %vm1819_vm5 = vweird.f32 %v1787_v62 }
 0x742   : > { %v1802_v6 = vsel %vm1801_vm15, %v3633_v3, %v1798_v15  ;;  %v1805_v9 = vmul.f32 %v3635_v14, %v1804_v17 }
 0x743   : > { %v1873_v18 = vmul.f32 %v1802_v6, %v4472_v30 }
 0x744   : > { %v1806_v23 = vmul.f32 0.5, %v1805_v9  ;;  %v1768_v19 = vpop.xlane.xlu1 %1767 }
 0x745   : > { %v1780_v11 = vmul.f32 %v1768_v19, %v4221_v21  ;;  %v1884_v16 = vmul.f32 %v4522_v39, %v1873_v18 }
 0x746   : > { %v1807_v20 = vsub.f32 1.5, %v1806_v23 }
 0x747   : > { %v3637_v33 = vpop.eup %3636  ;;  %v1788_v32 = vadd.f32 1e-05, %v1780_v11  ;;  %v4533_v24 = vadd.f32 %v4528_v53, %v1884_v16 }
 0x748   : > { %v1808_v25 = vmul.f32 %v3635_v14, %v1807_v20  ;;  %v1814_v30 = vmul.f32 %v3637_v33, %v1787_v62  ;;  %vm1820_vm4 = vweird.f32 %v3637_v33 }
 0x749   : > { %3638 = vrsqrt.f32 %v1788_v32  ;;  %1977 = vmatmul.f32.vlgmr.msrb.gmra.mxu3 %v4533_v24  ;;  %2018 = vmatmul.f32.vlgmr.msrb.gmra.mxu0 %v4533_v24  ;;  %vm1821_vm6 = vmor %vm1819_vm5, %vm1820_vm4  ;;  %vm1829_vm8 = vweird.f32 %v1788_v32 }
 0x74a   : > { %v1812_v43 = vsel %vm1811_vm3, %v3635_v14, %v1808_v25  ;;  %v1815_v26 = vmul.f32 %v3637_v33, %v1814_v30  ;;  %2059 = vmatmul.f32.vlgmr.msrb.gmra.mxu1 %v4533_v24 }
 0x74b   : > { %v1874_v58 = vmul.f32 %v1812_v43, %v4477_v36 }
 0x74c   : > { %v1816_v27 = vmul.f32 0.5, %v1815_v26  ;;  %v1770_v29 = vpop.xlane.xlu2 %1769 }
 0x74d   : > { %v1781_v0 = vmul.f32 %v1770_v29, %v4221_v21  ;;  %v1885_v34 = vmul.f32 %v4522_v39, %v1874_v58 }
 0x74e   : > { %v1817_v41 = vsub.f32 1.5, %v1816_v27 }
 0x74f   : > { %v3639_v8 = vpop.eup %3638  ;;  %v1789_v45 = vadd.f32 1e-05, %v1781_v0  ;;  %v4542_v40 = vadd.f32 %v4528_v53, %v1885_v34 }
 0x750   : > { %v1818_v37 = vmul.f32 %v3637_v33, %v1817_v41  ;;  %v1824_v35 = vmul.f32 %v3639_v8, %v1788_v32  ;;  %vm1830_vm7 = vweird.f32 %v3639_v8 }
 0x751   : > { %3640 = vrsqrt.f32 %v1789_v45  ;;  %1980 = vmatmul.f32.gmra.mxu3 %v4542_v40  ;;  %2021 = vmatmul.f32.gmra.mxu0 %v4542_v40  ;;  %vm1831_vm9 = vmor %vm1829_vm8, %vm1830_vm7  ;;  %vm1839_vm11 = vweird.f32 %v1789_v45 }
 0x752   : > { %v1822_v36 = vsel %vm1821_vm6, %v3637_v33, %v1818_v37  ;;  %v1825_v44 = vmul.f32 %v3639_v8, %v1824_v35  ;;  %2062 = vmatmul.f32.gmra.mxu1 %v4542_v40 }
 0x753   : > { %v1875_v46 = vmul.f32 %v1822_v36, %v4486_v48 }
 0x754   : > { %v1826_v49 = vmul.f32 0.5, %v1825_v44  ;;  %v1772_v51 = vpop.xlane.xlu0 %1771 }
 0x755   : > { %v1782_v55 = vmul.f32 %v1772_v51, %v4221_v21  ;;  %v1886_v57 = vmul.f32 %v4522_v39, %v1875_v46 }
 0x756   : > { %v1827_v22 = vsub.f32 1.5, %v1826_v49 }
 0x757   : > { %v3641_v7 = vpop.eup %3640  ;;  %v1790_v50 = vadd.f32 1e-05, %v1782_v55  ;;  %v4551_v47 = vadd.f32 %v4528_v53, %v1886_v57 }
 0x758   : > { %v1828_v59 = vmul.f32 %v3639_v8, %v1827_v22  ;;  %v1834_v54 = vmul.f32 %v3641_v7, %v1789_v45  ;;  %vm1840_vm10 = vweird.f32 %v3641_v7 }
 0x759   : > { %3642 = vrsqrt.f32 %v1790_v50  ;;  %1983 = vmatmul.f32.gmra.mxu3 %v4551_v47  ;;  %2024 = vmatmul.f32.gmra.mxu0 %v4551_v47  ;;  %vm1841_vm12 = vmor %vm1839_vm11, %vm1840_vm10  ;;  %vm1849_vm14 = vweird.f32 %v1790_v50 }
 0x75a   : > { %v1832_v48 = vsel %vm1831_vm9, %v3639_v8, %v1828_v59  ;;  %v1835_v61 = vmul.f32 %v3641_v7, %v1834_v54  ;;  %2065 = vmatmul.f32.gmra.mxu1 %v4551_v47 }
 0x75b   : > { %v1876_v56 = vmul.f32 %v1832_v48, %v4491_v38 }
 0x75c   : > { %v1836_v2 = vmul.f32 0.5, %v1835_v61  ;;  %v1774_v3 = vpop.xlane.xlu1 %1773 }
 0x75d   : > { %v1783_v4 = vmul.f32 %v1774_v3, %v4221_v21  ;;  %v1887_v5 = vmul.f32 %v4522_v39, %v1876_v56  ;;  %v3426_v56 = vld [vmem:[%s5134_s5 + $0x3] sm:$0x7] }
 0x75e   : > { %v1837_v10 = vsub.f32 1.5, %v1836_v2  ;;  %v1956_v2 = vperm.slane %v3426_v56, 1  ;;  %v1957_v3 = vperm.slane %v3426_v56, 2 }
 0x75f   : > { %v3643_v42 = vpop.eup %3642  ;;  %v1791_v13 = vadd.f32 1e-05, %v1783_v4  ;;  %v4560_v28 = vadd.f32 %v4528_v53, %v1887_v5 }
 0x760   : > { %v1838_v60 = vmul.f32 %v3641_v7, %v1837_v10  ;;  %v1844_v31 = vmul.f32 %v3643_v42, %v1790_v50  ;;  %vm1850_vm13 = vweird.f32 %v3643_v42 }
 0x761   : > { %3644 = vrsqrt.f32 %v1791_v13  ;;  %1986 = vmatmul.f32.gmra.mxu3 %v4560_v28  ;;  %2027 = vmatmul.f32.gmra.mxu0 %v4560_v28  ;;  %vm1851_vm15 = vmor %vm1849_vm14, %vm1850_vm13  ;;  %vm1859_vm2 = vweird.f32 %v1791_v13 }
 0x762   : > { %v1842_v38 = vsel %vm1841_vm12, %v3641_v7, %v1838_v60  ;;  %v1845_v14 = vmul.f32 %v3643_v42, %v1844_v31  ;;  %2068 = vmatmul.f32.gmra.mxu1 %v4560_v28 }
 0x763   : > { %v1877_v62 = vmul.f32 %v1842_v38, %v4496_v1 }
 0x764   : > { %v1846_v15 = vmul.f32 0.5, %v1845_v14 }
 0x765   : > { %v1888_v17 = vmul.f32 %v4522_v39, %v1877_v62 }
 0x766   : > { %v1847_v6 = vsub.f32 1.5, %v1846_v15 }
 0x767   : > { %v3645_v9 = vpop.eup %3644  ;;  %v4568_v18 = vadd.f32 %v4528_v53, %v1888_v17 }
 0x768   : > { %v1848_v23 = vmul.f32 %v3643_v42, %v1847_v6  ;;  %v1854_v19 = vmul.f32 %v3645_v9, %v1791_v13  ;;  %vm1860_vm1 = vweird.f32 %v3645_v9 }
 0x769   : > { %1989 = vmatmul.f32.gmra.mxu3 %v4568_v18  ;;  %2030 = vmatmul.f32.gmra.mxu0 %v4568_v18  ;;  %vm1861_vm3 = vmor %vm1859_vm2, %vm1860_vm1 }
 0x76a   : > { %v1852_v11 = vsel %vm1851_vm15, %v3643_v42, %v1848_v23  ;;  %v1855_v16 = vmul.f32 %v3645_v9, %v1854_v19  ;;  %2071 = vmatmul.f32.gmra.mxu1 %v4568_v18 }
 0x76b   : > { %v1878_v1 = vmul.f32 %v1852_v11, %v4501_v52 }
 0x76c   : > { %v1856_v20 = vmul.f32 0.5, %v1855_v16 }
 0x76d   : > { %v1889_v33 = vmul.f32 %v4522_v39, %v1878_v1  ;;  %v1955_v1 = vperm.slane %v3426_v56, 0 }
 0x76e   : > { %v1857_v32 = vsub.f32 1.5, %v1856_v20 }
 0x76f   : > { %v4576_v25 = vadd.f32 %v4528_v53, %v1889_v33 }
 0x770   : > { %v1858_v30 = vmul.f32 %v3645_v9, %v1857_v32 }
 0x771   : > { %1992 = vmatmul.f32.gmra.mxu3 %v4576_v25  ;;  %2033 = vmatmul.f32.gmra.mxu0 %v4576_v25 }
 0x772   : > { %v1862_v43 = vsel %vm1861_vm3, %v3645_v9, %v1858_v30  ;;  %2074 = vmatmul.f32.gmra.mxu1 %v4576_v25 }
 0x773   : > { %v1879_v52 = vmul.f32 %v1862_v43, %v4506_v12 }
 0x775   : > { %v1890_v26 = vmul.f32 %v4522_v39, %v1879_v52 }
 0x777   : > { %v4584_v58 = vadd.f32 %v4528_v53, %v1890_v26 }
 0x779   : > { %1995 = vmatmul.f32.gmra.mxu3 %v4584_v58  ;;  %2036 = vmatmul.f32.gmra.mxu0 %v4584_v58 }
 0x77a   : > { %2077 = vmatmul.f32.gmra.mxu1 %v4584_v58 }
 0x7ae   : > { %v1776_v27 = vpop.xlane.xlu2 %1775 }
 0x7af   : > { %v1784_v29 = vmul.f32 %v1776_v27, %v4221_v21 }
 0x7b1   : > { %v1792_v0 = vadd.f32 1e-05, %v1784_v29 }
 0x7b3   : > { %3646 = vrsqrt.f32 %v1792_v0  ;;  %vm1869_vm5 = vweird.f32 %v1792_v0 }
 0x7b9   : > { %v3647_v34 = vpop.eup %3646 }
 0x7ba   : > { %v1864_v41 = vmul.f32 %v3647_v34, %v1792_v0  ;;  %vm1870_vm4 = vweird.f32 %v3647_v34 }
 0x7bb   : > { %vm1871_vm6 = vmor %vm1869_vm5, %vm1870_vm4 }
 0x7bc   : > { %v1865_v8 = vmul.f32 %v3647_v34, %v1864_v41 }
 0x7be   : > { %v1866_v12 = vmul.f32 0.5, %v1865_v8 }
 0x7c0   : > { %v1867_v45 = vsub.f32 1.5, %v1866_v12 }
 0x7c2   : > { %v1868_v37 = vmul.f32 %v3647_v34, %v1867_v45 }
 0x7c4   : > { %v1872_v35 = vsel %vm1871_vm6, %v3647_v34, %v1868_v37 }
 0x7c5   : > { %v1880_v36 = vmul.f32 %v1872_v35, %v4514_v63 }
 0x7c6   : > { %v2019_v49 = vpop.f32.mrf.mxu0 }
 0x7c7   : > { %v1891_v44 = vmul.f32 %v4522_v39, %v1880_v36  ;;  %v2060_v51 = vpop.f32.mrf.mxu1  ;;  %v2020_v32 = vadd.f32 %v2019_v49, %v1956_v2 }
 0x7c8   : > { %v2061_v23 = vadd.f32 %v2060_v51, %v1957_v3 }
 0x7c9   : > { %v4593_v46 = vadd.f32 %v4528_v53, %v1891_v44 }
 0x7cb   : > { %1998 = vmatmul.f32.gmra.mxu3 %v4593_v46  ;;  %2039 = vmatmul.f32.gmra.mxu0 %v4593_v46 }
 0x7cc   : > { %2080 = vmatmul.f32.gmra.mxu1 %v4593_v46  ;;  %v1978_v17 = vpop.f32.mrf.mxu3 }
 0x7cd   : > { %v1979_v33 = vadd.f32 %v1978_v17, %v1955_v1 }
 0x7ce   : > { %v2022_v55 = vpop.f32.mrf.mxu0 }
 0x7cf   : > { %v2063_v57 = vpop.f32.mrf.mxu1  ;;  %v2023_v20 = vadd.f32 %v2022_v55, %v1956_v2  ;;  %v2084_v30 = vmul.f32 0.088388346, %v1979_v33 }
 0x7d0   : > { %v2064_v9 = vadd.f32 %v2063_v57, %v1957_v3 }
 0x7d4   : > { %v1981_v16 = vpop.f32.mrf.mxu3 }
 0x7d5   : > { %v1982_v52 = vadd.f32 %v1981_v16, %v1955_v1 }
 0x7d6   : > { %v2025_v22 = vpop.f32.mrf.mxu0 }
 0x7d7   : > { %v2066_v7 = vpop.f32.mrf.mxu1  ;;  %v2026_v11 = vadd.f32 %v2025_v22, %v1956_v2  ;;  %v2085_v26 = vmul.f32 0.088388346, %v1982_v52 }
 0x7d8   : > { %v2067_v15 = vadd.f32 %v2066_v7, %v1957_v3 }
 0x7dc   : > { %v1984_v43 = vpop.f32.mrf.mxu3 }
 0x7dd   : > { %v1985_v29 = vadd.f32 %v1984_v43, %v1955_v1 }
 0x7de   : > { %v2028_v50 = vpop.f32.mrf.mxu0 }
 0x7df   : > { %v2069_v59 = vpop.f32.mrf.mxu1  ;;  %v2029_v19 = vadd.f32 %v2028_v50, %v1956_v2  ;;  %v2086_v0 = vmul.f32 0.088388346, %v1985_v29 }
 0x7e0   : > { %v2070_v62 = vadd.f32 %v2069_v59, %v1957_v3 }
 0x7e4   : > { %v1987_v27 = vpop.f32.mrf.mxu3 }
 0x7e5   : > { %v1988_v34 = vadd.f32 %v1987_v27, %v1955_v1 }
 0x7e6   : > { %v2031_v63 = vpop.f32.mrf.mxu0 }
 0x7e7   : > { %v2072_v54 = vpop.f32.mrf.mxu1  ;;  %v2032_v6 = vadd.f32 %v2031_v63, %v1956_v2  ;;  %v2087_v8 = vmul.f32 0.088388346, %v1988_v34 }
 0x7e8   : > { %v2073_v38 = vadd.f32 %v2072_v54, %v1957_v3 }
 0x7ec   : > { %v1990_v41 = vpop.f32.mrf.mxu3 }
 0x7ed   : > { %v1991_v12 = vadd.f32 %v1990_v41, %v1955_v1 }
 0x7ee   : > { %v2034_v39 = vpop.f32.mrf.mxu0 }
 0x7ef   : > { %v2075_v48 = vpop.f32.mrf.mxu1  ;;  %v2035_v14 = vadd.f32 %v2034_v39, %v1956_v2  ;;  %v2088_v37 = vmul.f32 0.088388346, %v1991_v12 }
 0x7f0   : > { %v2076_v31 = vadd.f32 %v2075_v48, %v1957_v3 }
 0x7f4   : > { %v1993_v45 = vpop.f32.mrf.mxu3 }
 0x7f5   : > { %v1994_v35 = vadd.f32 %v1993_v45, %v1955_v1 }
 0x7f6   : > { %v2037_v53 = vpop.f32.mrf.mxu0 }
 0x7f7   : > { %v2078_v61 = vpop.f32.mrf.mxu1  ;;  %v2038_v60 = vadd.f32 %v2037_v53, %v1956_v2  ;;  %v2089_v36 = vmul.f32 0.088388346, %v1994_v35 }
 0x7f8   : > { %v2079_v13 = vadd.f32 %v2078_v61, %v1957_v3 }
 0x7fc   : > { %v1996_v44 = vpop.f32.mrf.mxu3 }
 0x7fd   : > { %v1997_v49 = vadd.f32 %v1996_v44, %v1955_v1 }
 0x7ff   : > { %v2090_v51 = vmul.f32 0.088388346, %v1997_v49 }
 0x848   : > { %v2040_v4 = vpop.f32.mrf.mxu0 }
 0x849   : > { %v2041_v5 = vadd.f32 %v2040_v4, %v1956_v2  ;;  %v2081_v10 = vpop.f32.mrf.mxu1 }
 0x84a   : > { %v2082_v42 = vadd.f32 %v2081_v10, %v1957_v3 }
 0x84b   : > { %2100 = vmatpush.xpose.msra.mxu2 %v2041_v5 }
 0x84c   : > { %2365 = vmatpush.msra.mxu3 %v2082_v42 }
 0x84e   : > { %2366 = vmatpush.msra.mxu3 %v2079_v13  ;;  %v1999_v55 = vpop.f32.mrf.mxu3 }
 0x84f   : > { %2101 = vmatpush.xpose.msra.mxu2 %v2038_v60  ;;  %v2000_v57 = vadd.f32 %v1999_v55, %v1955_v1 }
 0x850   : > { %2367 = vmatpush.msra.mxu3 %v2076_v31 }
 0x851   : > { %v2091_v22 = vmul.f32 0.088388346, %v2000_v57 }
 0x852   : > { %2368 = vmatpush.msra.mxu3 %v2073_v38 }
 0x853   : > { %2102 = vmatpush.xpose.msra.mxu2 %v2035_v14 }
 0x854   : > { %2369 = vmatpush.msra.mxu3 %v2070_v62 }
 0x856   : > { %2370 = vmatpush.msra.mxu3 %v2067_v15 }
 0x857   : > { %2103 = vmatpush.xpose.msra.mxu2 %v2032_v6 }
 0x858   : > { %2371 = vmatpush.msra.mxu3 %v2064_v9 }
 0x85a   : > { %2372 = vmatpush.msra.mxu3 %v2061_v23 }
 0x85b   : > { %2104 = vmatpush.xpose.msra.mxu2 %v2029_v19 }
 0x85f   : > { %2105 = vmatpush.xpose.msra.mxu2 %v2026_v11 }
 0x863   : > { %2106 = vmatpush.xpose.msra.mxu2 %v2023_v20 }
 0x867   : > { %2107 = vmatpush.xpose.msra.mxu2 %v2020_v32 }
 0x86a   : > { %2108 = vmatmul.f32.vlgmr.msra.gmra.mxu2 %v2084_v30 }
 0x872   : > { %2111 = vmatmul.f32.gmra.mxu2 %v2085_v26 }
 0x87a   : > { %2114 = vmatmul.f32.gmra.mxu2 %v2086_v0 }
 0x882   : > { %2117 = vmatmul.f32.gmra.mxu2 %v2087_v8 }
 0x88a   : > { %2120 = vmatmul.f32.gmra.mxu2 %v2088_v37 }
 0x892   : > { %2123 = vmatmul.f32.gmra.mxu2 %v2089_v36 }
 0x89a   : > { %2126 = vmatmul.f32.gmra.mxu2 %v2090_v51 }
 0x8a2   : > { %2129 = vmatmul.f32.gmra.mxu2 %v2091_v22 }
 0x8ed   : > { %v2109_v7 = vpop.f32.mrf.mxu2 }
 0x8ee   : > { %v2133_v50 = vsel %vm931_vm0, %v2109_v7, -inf }
 0x8ef   : > { %2134 = vmax.xlane.f32.xlu0 %v2133_v50 }
 0x8f5   : > { %v2112_v59 = vpop.f32.mrf.mxu2 }
 0x8f6   : > { %v2136_v63 = vsel %vm931_vm0, %v2112_v59, -inf }
 0x8f7   : > { %2137 = vmax.xlane.f32.xlu1 %v2136_v63 }
 0x8fd   : > { %v2115_v54 = vpop.f32.mrf.mxu2 }
 0x8fe   : > { %v2139_v39 = vsel %vm931_vm0, %v2115_v54, -inf }
 0x8ff   : > { %2140 = vmax.xlane.f32.xlu2 %v2139_v39 }
 0x905   : > { %v2118_v48 = vpop.f32.mrf.mxu2 }
 0x906   : > { %v2142_v53 = vsel %vm931_vm0, %v2118_v48, -inf }
 0x907   : > { %2143 = vmax.xlane.f32.xlu0 %v2142_v53 }
 0x90d   : > { %v2121_v61 = vpop.f32.mrf.mxu2 }
 0x90e   : > { %v2145_v56 = vsel %vm931_vm0, %v2121_v61, -inf }
 0x90f   : > { %2146 = vmax.xlane.f32.xlu1 %v2145_v56 }
 0x915   : > { %v2124_v2 = vpop.f32.mrf.mxu2 }
 0x916   : > { %v2148_v3 = vsel %vm931_vm0, %v2124_v2, -inf }
 0x917   : > { %2149 = vmax.xlane.f32.xlu2 %v2148_v3 }
 0x91d   : > { %v2127_v4 = vpop.f32.mrf.mxu2 }
 0x91e   : > { %v2151_v5 = vsel %vm931_vm0, %v2127_v4, -inf }
 0x91f   : > { %2152 = vmax.xlane.f32.xlu0 %v2151_v5 }
 0x925   : > { %v2130_v10 = vpop.f32.mrf.mxu2 }
 0x926   : > { %v2154_v42 = vsel %vm931_vm0, %v2130_v10, -inf }
 0x927   : > { %2155 = vmax.xlane.f32.xlu2 %v2154_v42 }
 0x962   : > { %v2135_v13 = vpop.xlane.xlu0 %2134 }
 0x963   : > { %v2157_v60 = vsub.f32 %v2109_v7, %v2135_v13 }
 0x965   : > { %v2165_v31 = vmul.f32 1.442695, %v2157_v60 }
 0x967   : > { %3648 = vpow2.f32 %v2165_v31 }
 0x96a   : > { %v2138_v38 = vpop.xlane.xlu1 %2137 }
 0x96b   : > { %v2158_v14 = vsub.f32 %v2112_v59, %v2138_v38 }
 0x96d   : > { %v4609_v62 = vpop.eup %3648  ;;  %v2167_v15 = vmul.f32 1.442695, %v2158_v14 }
 0x96e   : > { %v2181_v17 = vsel %vm931_vm0, %v4609_v62, 0.0 }
 0x96f   : > { %3650 = vpow2.f32 %v2167_v15  ;;  %2182 = vadd.xlane.f32.xlu1 %v2181_v17 }
 0x972   : > { %v2141_v6 = vpop.xlane.xlu2 %2140 }
 0x973   : > { %v2159_v9 = vsub.f32 %v2115_v54, %v2141_v6 }
 0x975   : > { %v4613_v23 = vpop.eup %3650  ;;  %v2169_v19 = vmul.f32 1.442695, %v2159_v9 }
 0x976   : > { %v2184_v11 = vsel %vm931_vm0, %v4613_v23, 0.0 }
 0x977   : > { %3652 = vpow2.f32 %v2169_v19  ;;  %2185 = vadd.xlane.f32.xlu0 %v2184_v11 }
 0x97a   : > { %v2144_v16 = vpop.xlane.xlu0 %2143 }
 0x97b   : > { %v2160_v1 = vsub.f32 %v2118_v48, %v2144_v16 }
 0x97d   : > { %v4617_v20 = vpop.eup %3652  ;;  %v2171_v33 = vmul.f32 1.442695, %v2160_v1 }
 0x97e   : > { %v2187_v32 = vsel %vm931_vm0, %v4617_v20, 0.0 }
 0x97f   : > { %3654 = vpow2.f32 %v2171_v33  ;;  %2188 = vadd.xlane.f32.xlu1 %v2187_v32 }
 0x982   : > { %v2147_v30 = vpop.xlane.xlu1 %2146 }
 0x983   : > { %v2161_v43 = vsub.f32 %v2121_v61, %v2147_v30 }
 0x985   : > { %v4621_v52 = vpop.eup %3654  ;;  %v2173_v26 = vmul.f32 1.442695, %v2161_v43 }
 0x986   : > { %v2190_v27 = vsel %vm931_vm0, %v4621_v52, 0.0 }
 0x987   : > { %3656 = vpow2.f32 %v2173_v26  ;;  %2191 = vadd.xlane.f32.xlu2 %v2190_v27 }
 0x98a   : > { %v2150_v29 = vpop.xlane.xlu2 %2149 }
 0x98b   : > { %v2162_v0 = vsub.f32 %v2124_v2, %v2150_v29 }
 0x98d   : > { %v4625_v34 = vpop.eup %3656  ;;  %v2175_v41 = vmul.f32 1.442695, %v2162_v0 }
 0x98e   : > { %v2193_v8 = vsel %vm931_vm0, %v4625_v34, 0.0 }
 0x98f   : > { %3658 = vpow2.f32 %v2175_v41  ;;  %2194 = vadd.xlane.f32.xlu0 %v2193_v8 }
 0x992   : > { %v2153_v12 = vpop.xlane.xlu0 %2152 }
 0x993   : > { %v2163_v45 = vsub.f32 %v2127_v4, %v2153_v12 }
 0x995   : > { %v4629_v37 = vpop.eup %3658  ;;  %v2177_v35 = vmul.f32 1.442695, %v2163_v45 }
 0x996   : > { %v2196_v36 = vsel %vm931_vm0, %v4629_v37, 0.0 }
 0x997   : > { %3660 = vpow2.f32 %v2177_v35  ;;  %2197 = vadd.xlane.f32.xlu1 %v2196_v36 }
 0x99a   : > { %v2156_v44 = vpop.xlane.xlu2 %2155 }
 0x99b   : > { %v2164_v49 = vsub.f32 %v2130_v10, %v2156_v44 }
 0x99d   : > { %v4633_v51 = vpop.eup %3660  ;;  %v2179_v55 = vmul.f32 1.442695, %v2164_v49 }
 0x99e   : > { %v2199_v57 = vsel %vm931_vm0, %v4633_v51, 0.0 }
 0x99f   : > { %3662 = vpow2.f32 %v2179_v55  ;;  %2200 = vadd.xlane.f32.xlu2 %v2199_v57 }
 0x9a5   : > { %v4637_v22 = vpop.eup %3662 }
 0x9a6   : > { %v2202_v7 = vsel %vm931_vm0, %v4637_v22, 0.0 }
 0x9a7   : > { %2203 = vadd.xlane.f32.xlu0 %v2202_v7 }
 0x9e2   : > { %v2183_v50 = vpop.xlane.xlu1 %2182 }
 0x9e3   : > { %3664 = vrcp.f32 %v2183_v50  ;;  %v2216_v48 = vand.u32 2147483648, %v2183_v50  ;;  %v2214_v61 = vand.u32 2147483647, %v2183_v50  ;;  %vm2210_vm8 = vweird.f32 %v2183_v50 }
 0x9e5   : > { %v2217_v3 = vor.u32 1.1754944e-38, %v2216_v48  ;;  %vm2215_vm10 = vcmp.eq.f32.partialorder %v2214_v61, 8.507059e+37  ;;  %v3449_v61 = vld [vmem:[%s5135_s6 + $0xf0] sm:$0xff] }
 0x9e9   : > { %v3665_v59 = vpop.eup %3664 }
 0x9ea   : > { %v2206_v63 = vmul.f32 %v3665_v59, %v2183_v50  ;;  %v2186_v54 = vpop.xlane.xlu0 %2185  ;;  %vm2211_vm7 = vweird.f32 %v3665_v59 }
 0x9eb   : > { %3666 = vrcp.f32 %v2186_v54  ;;  %vm2212_vm9 = vmor %vm2210_vm8, %vm2211_vm7  ;;  %v2231_v38 = vand.u32 2147483648, %v2186_v54  ;;  %v2229_v14 = vand.u32 2147483647, %v2186_v54  ;;  %vm2225_vm12 = vweird.f32 %v2186_v54 }
 0x9ec   : > { %v2207_v39 = vsub.f32 1.0, %v2206_v63 }
 0x9ed   : > { %v2232_v6 = vor.u32 1.1754944e-38, %v2231_v38  ;;  %vm2230_vm14 = vcmp.eq.f32.partialorder %v2229_v14, 8.507059e+37  ;;  %v3446_v38 = vld [vmem:[%s5135_s6 + $0xd8] sm:$0xff] }
 0x9ee   : > { %v2208_v53 = vmul.f32 %v3665_v59, %v2207_v39 }
 0x9f0   : > { %v2209_v56 = vadd.f32 %v3665_v59, %v2208_v53  ;;  %v3450_v53 = vld [vmem:[%s5135_s6 + $0xf8] sm:$0xff] }
 0x9f1   : > { %v3667_v2 = vpop.eup %3666  ;;  %2420 = vmatpush.msra.mxu0 %v3450_v53 }
 0x9f2   : > { %v2213_v4 = vsel %vm2212_vm9, %v3665_v59, %v2209_v56  ;;  %v2221_v5 = vmul.f32 %v3667_v2, %v2186_v54  ;;  %v2189_v10 = vpop.xlane.xlu1 %2188  ;;  %vm2226_vm11 = vweird.f32 %v3667_v2 }
 0x9f3   : > { %v2218_v42 = vsel %vm2215_vm10, %v2217_v3, %v2213_v4  ;;  %3668 = vrcp.f32 %v2189_v10  ;;  %vm2227_vm13 = vmor %vm2225_vm12, %vm2226_vm11  ;;  %v2246_v32 = vand.u32 2147483648, %v2189_v10  ;;  %v2244_v30 = vand.u32 2147483647, %v2189_v10  ;;  %2421 = vmatpush.msra.mxu0 %v3449_v61  ;;  %v3435_v61 = vld [vmem:[%s5135_s6 + $0x80] sm:$0xff] }
 0x9f4   : > { %v2325_v13 = vmul.f32 %v4609_v62, %v2218_v42  ;;  %v2222_v60 = vsub.f32 1.0, %v2221_v5  ;;  %vm2240_vm1 = vweird.f32 %v2189_v10  ;;  %v3447_v42 = vld [vmem:[%s5135_s6 + $0xe0] sm:$0xff] }
 0x9f5   : > { %v2247_v27 = vor.u32 1.1754944e-38, %v2246_v32  ;;  %vm2245_vm3 = vcmp.eq.f32.partialorder %v2244_v30, 8.507059e+37 }
 0x9f6   : > { %v2223_v31 = vmul.f32 %v3667_v2, %v2222_v60  ;;  %3427 = vmatmul.msk.f32.vlgmr.msra.gmra.mxu3 %vm931_vm0, %v2325_v13 }
 0x9f8   : > { %v2224_v15 = vadd.f32 %v3667_v2, %v2223_v31 }
 0x9f9   : > { %v3669_v17 = vpop.eup %3668 }
 0x9fa   : > { %v2236_v9 = vmul.f32 %v3669_v17, %v2189_v10  ;;  %v2192_v19 = vpop.xlane.xlu2 %2191  ;;  %v2228_v11 = vsel %vm2227_vm13, %v3667_v2, %v2224_v15  ;;  %vm2241_vm15 = vweird.f32 %v3669_v17 }
 0x9fb   : > { %3670 = vrcp.f32 %v2192_v19  ;;  %v2233_v1 = vsel %vm2230_vm14, %v2232_v6, %v2228_v11  ;;  %vm2242_vm2 = vmor %vm2240_vm1, %vm2241_vm15  ;;  %v2261_v35 = vand.u32 2147483648, %v2192_v19  ;;  %v2259_v36 = vand.u32 2147483647, %v2192_v19  ;;  %v3445_v6 = vld [vmem:[%s5135_s6 + $0xd0] sm:$0xff] }
 0x9fc   : > { %v2237_v16 = vsub.f32 1.0, %v2236_v9  ;;  %v2326_v62 = vmul.f32 %v4613_v23, %v2233_v1  ;;  %vm2255_vm5 = vweird.f32 %v2192_v19 }
 0x9fd   : > { %v2262_v55 = vor.u32 1.1754944e-38, %v2261_v35  ;;  %vm2260_vm7 = vcmp.eq.f32.partialorder %v2259_v36, 8.507059e+37 }
 0x9fe   : > { %v2238_v33 = vmul.f32 %v3669_v17, %v2237_v16  ;;  %3428 = vmatmul.msk.f32.gmra.mxu3 %vm931_vm0, %v2326_v62 }
 0xa00   : > { %v2239_v43 = vadd.f32 %v3669_v17, %v2238_v33  ;;  %v3443_v33 = vld [vmem:[%s5135_s6 + $0xc0] sm:$0xff] }
 0xa01   : > { %v3671_v26 = vpop.eup %3670 }
 0xa02   : > { %v2251_v29 = vmul.f32 %v3671_v26, %v2192_v19  ;;  %v2195_v0 = vpop.xlane.xlu0 %2194  ;;  %v2243_v41 = vsel %vm2242_vm2, %v3669_v17, %v2239_v43  ;;  %vm2256_vm4 = vweird.f32 %v3671_v26 }
 0xa03   : > { %3672 = vrcp.f32 %v2195_v0  ;;  %v2248_v12 = vsel %vm2245_vm3, %v2247_v27, %v2243_v41  ;;  %vm2257_vm6 = vmor %vm2255_vm5, %vm2256_vm4  ;;  %v2276_v39 = vand.u32 2147483648, %v2195_v0  ;;  %v2274_v48 = vand.u32 2147483647, %v2195_v0  ;;  %v3442_v27 = vld [vmem:[%s5135_s6 + $0xb8] sm:$0xff]  ;;  %v3441_v41 = vld [vmem:[%s5135_s6 + $0xb0] sm:$0xff] }
 0xa04   : > { %v2252_v8 = vsub.f32 1.0, %v2251_v29  ;;  %v2327_v23 = vmul.f32 %v4617_v20, %v2248_v12  ;;  %vm2270_vm9 = vweird.f32 %v2195_v0 }
 0xa05   : > { %v2277_v3 = vor.u32 1.1754944e-38, %v2276_v39  ;;  %vm2275_vm11 = vcmp.eq.f32.partialorder %v2274_v48, 8.507059e+37 }
 0xa06   : > { %v2253_v45 = vmul.f32 %v3671_v26, %v2252_v8  ;;  %3429 = vmatmul.msk.f32.gmra.mxu3 %vm931_vm0, %v2327_v23  ;;  %v3440_v23 = vld [vmem:[%s5135_s6 + $0xa8] sm:$0xff] }
 0xa08   : > { %v2254_v44 = vadd.f32 %v3671_v26, %v2253_v45 }
 0xa09   : > { %v3673_v49 = vpop.eup %3672 }
 0xa0a   : > { %v2266_v57 = vmul.f32 %v3673_v49, %v2195_v0  ;;  %v2198_v7 = vpop.xlane.xlu1 %2197  ;;  %v2258_v50 = vsel %vm2257_vm6, %v3671_v26, %v2254_v44  ;;  %vm2271_vm8 = vweird.f32 %v3673_v49  ;;  %v3439_v44 = vld [vmem:[%s5135_s6 + $0xa0] sm:$0xff] }
 0xa0b   : > { %3674 = vrcp.f32 %v2198_v7  ;;  %v2263_v63 = vsel %vm2260_vm7, %v2262_v55, %v2258_v50  ;;  %vm2272_vm10 = vmor %vm2270_vm9, %vm2271_vm8  ;;  %v2291_v15 = vand.u32 2147483648, %v2198_v7  ;;  %v2289_v17 = vand.u32 2147483647, %v2198_v7 }
 0xa0c   : > { %v2267_v59 = vsub.f32 1.0, %v2266_v57  ;;  %v2328_v20 = vmul.f32 %v4621_v52, %v2263_v63  ;;  %v3448_v52 = vld [vmem:[%s5135_s6 + $0xe8] sm:$0xff]  ;;  %vm2285_vm13 = vweird.f32 %v2198_v7  ;;  %v3437_v63 = vld [vmem:[%s5135_s6 + $0x90] sm:$0xff] }
 0xa0d   : > { %2422 = vmatpush.msra.mxu0 %v3448_v52  ;;  %v2292_v11 = vor.u32 1.1754944e-38, %v2291_v15  ;;  %vm2290_vm15 = vcmp.eq.f32.partialorder %v2289_v17, 8.507059e+37 }
 0xa0e   : > { %v2268_v54 = vmul.f32 %v3673_v49, %v2267_v59  ;;  %3430 = vmatmul.msk.f32.gmra.mxu3 %vm931_vm0, %v2328_v20 }
 0xa0f   : > { %2423 = vmatpush.msra.mxu0 %v3447_v42  ;;  %v3575_v42 = vld [vmem:[%s5136_s7 + $0x1] ss:$0 sm:$0xff] }
 0xa10   : > { %v2269_v56 = vadd.f32 %v3673_v49, %v2268_v54  ;;  %v3436_v54 = vld [vmem:[%s5135_s6 + $0x88] sm:$0xff] }
 0xa11   : > { %v3675_v2 = vpop.eup %3674  ;;  %2424 = vmatpush.msra.mxu0 %v3446_v38 }
 0xa12   : > { %v2281_v4 = vmul.f32 %v3675_v2, %v2198_v7  ;;  %v2201_v5 = vpop.xlane.xlu2 %2200  ;;  %v2273_v10 = vsel %vm2272_vm10, %v3673_v49, %v2269_v56  ;;  %vm2286_vm12 = vweird.f32 %v3675_v2  ;;  %v3438_v7 = vld [vmem:[%s5135_s6 + $0x98] sm:$0xff] }
 0xa13   : > { %3676 = vrcp.f32 %v2201_v5  ;;  %v2278_v60 = vsel %vm2275_vm11, %v2277_v3, %v2273_v10  ;;  %vm2287_vm14 = vmor %vm2285_vm13, %vm2286_vm12  ;;  %2425 = vmatpush.msra.mxu0 %v3445_v6  ;;  %v2306_v43 = vand.u32 2147483648, %v2201_v5  ;;  %v2304_v0 = vand.u32 2147483647, %v2201_v5 }
 0xa14   : > { %v2282_v13 = vsub.f32 1.0, %v2281_v4  ;;  %v2329_v31 = vmul.f32 %v4625_v34, %v2278_v60  ;;  %v3444_v34 = vld [vmem:[%s5135_s6 + $0xc8] sm:$0xff]  ;;  %vm2300_vm2 = vweird.f32 %v2201_v5 }
 0xa15   : > { %2426 = vmatpush.msra.mxu0 %v3444_v34  ;;  %vm2305_vm4 = vcmp.eq.f32.partialorder %v2304_v0, 8.507059e+37 }
 0xa16   : > { %v2283_v14 = vmul.f32 %v3675_v2, %v2282_v13  ;;  %3431 = vmatmul.msk.f32.gmra.mxu3 %vm931_vm0, %v2329_v31 }
 0xa17   : > { %2427 = vmatpush.msra.mxu0 %v3443_v33 }
 0xa18   : > { %v2284_v9 = vadd.f32 %v3675_v2, %v2283_v14 }
 0xa19   : > { %v3677_v19 = vpop.eup %3676  ;;  %2428 = vmatpush.msra.mxu0 %v3442_v27 }
 0xa1a   : > { %v2296_v16 = vmul.f32 %v3677_v19, %v2201_v5  ;;  %v2204_v1 = vpop.xlane.xlu0 %2203  ;;  %v2288_v62 = vsel %vm2287_vm14, %v3675_v2, %v2284_v9  ;;  %vm2301_vm1 = vweird.f32 %v3677_v19 }
 0xa1b   : > { %3678 = vrcp.f32 %v2204_v1  ;;  %v2293_v30 = vsel %vm2290_vm15, %v2292_v11, %v2288_v62  ;;  %vm2302_vm3 = vmor %vm2300_vm2, %vm2301_vm1  ;;  %2429 = vmatpush.msra.mxu0 %v3441_v41  ;;  %v2321_v57 = vand.u32 2147483648, %v2204_v1  ;;  %v2319_v59 = vand.u32 2147483647, %v2204_v1 }
 0xa1c   : > { %v2297_v32 = vsub.f32 1.0, %v2296_v16  ;;  %v2330_v26 = vmul.f32 %v4629_v37, %v2293_v30  ;;  %v2307_v37 = vor.u32 1.1754944e-38, %v2306_v43  ;;  %vm2315_vm6 = vweird.f32 %v2204_v1 }
 0xa1d   : > { %2430 = vmatpush.msra.mxu0 %v3440_v23  ;;  %vm2320_vm8 = vcmp.eq.f32.partialorder %v2319_v59, 8.507059e+37 }
 0xa1e   : > { %v2298_v29 = vmul.f32 %v3677_v19, %v2297_v32  ;;  %3432 = vmatmul.msk.f32.gmra.mxu3 %vm931_vm0, %v2330_v26 }
 0xa1f   : > { %2431 = vmatpush.msra.mxu0 %v3439_v44 }
 0xa20   : > { %v2299_v8 = vadd.f32 %v3677_v19, %v2298_v29 }
 0xa21   : > { %v3679_v12 = vpop.eup %3678  ;;  %2432 = vmatpush.msra.mxu0 %v3438_v7 }
 0xa22   : > { %v2311_v45 = vmul.f32 %v3679_v12, %v2204_v1  ;;  %v2303_v35 = vsel %vm2302_vm3, %v3677_v19, %v2299_v8  ;;  %vm2316_vm5 = vweird.f32 %v3679_v12 }
 0xa23   : > { %v2308_v36 = vsel %vm2305_vm4, %v2307_v37, %v2303_v35  ;;  %vm2317_vm7 = vmor %vm2315_vm6, %vm2316_vm5  ;;  %2433 = vmatpush.msra.mxu0 %v3437_v63  ;;  %v3485_v35 = vld [vmem:[%s5139_s10 + $0x1f8] sm:$0xff] }
 0xa24   : > { %v2312_v49 = vsub.f32 1.0, %v2311_v45  ;;  %v2331_v55 = vmul.f32 %v4633_v51, %v2308_v36  ;;  %v2322_v51 = vor.u32 1.1754944e-38, %v2321_v57  ;;  %v3482_v36 = vld [vmem:[%s5139_s10 + $0x1e0] sm:$0xff]  ;;  %2736 = vmatpush.msrb.mxu2 %v3485_v35 }
 0xa25   : > { %2434 = vmatpush.msra.mxu0 %v3436_v54 }
 0xa26   : > { %v2313_v50 = vmul.f32 %v3679_v12, %v2312_v49  ;;  %3433 = vmatmul.msk.f32.gmra.mxu3 %vm931_vm0, %v2331_v55  ;;  %v3483_v49 = vld [vmem:[%s5139_s10 + $0x1e8] sm:$0xff] }
 0xa27   : > { %2435 = vmatpush.msra.mxu0 %v3435_v61  ;;  %2737 = vmatpush.msrb.mxu2 %v3483_v49 }
 0xa28   : > { %v2314_v20 = vadd.f32 %v3679_v12, %v2313_v50 }
 0xa2a   : > { %v2318_v39 = vsel %vm2317_vm7, %v3679_v12, %v2314_v20 }
 0xa2b   : > { %v2323_v48 = vsel %vm2320_vm8, %v2322_v51, %v2318_v39 }
 0xa2c   : > { %v2332_v53 = vmul.f32 %v4637_v22, %v2323_v48 }
 0xa2e   : > { %3434 = vmatmul.msk.f32.gmra.mxu3 %vm931_vm0, %v2332_v53 }
 0xa79   : > { %v2374_v56 = vpop.f32.mrf.mxu3 }
 0xa7a   : > { %2436 = vmatmul.f32.vlgmr.msra.gmra.mxu0 %v2374_v56 }
 0xa81   : > { %v2377_v2 = vpop.f32.mrf.mxu3 }
 0xa82   : > { %2439 = vmatmul.f32.gmra.mxu0 %v2377_v2 }
 0xa89   : > { %v2380_v52 = vpop.f32.mrf.mxu3 }
 0xa8a   : > { %2442 = vmatmul.f32.gmra.mxu0 %v2380_v52  ;;  %v3480_v52 = vld [vmem:[%s5139_s10 + $0x1d0] sm:$0xff] }
 0xa91   : > { %v2383_v3 = vpop.f32.mrf.mxu3 }
 0xa92   : > { %2445 = vmatmul.f32.gmra.mxu0 %v2383_v3  ;;  %v3481_v3 = vld [vmem:[%s5139_s10 + $0x1d8] sm:$0xff] }
 0xa93   : > { %2738 = vmatpush.msrb.mxu2 %v3481_v3 }
 0xa99   : > { %v2386_v4 = vpop.f32.mrf.mxu3 }
 0xa9a   : > { %2448 = vmatmul.f32.gmra.mxu0 %v2386_v4  ;;  %v3478_v4 = vld [vmem:[%s5139_s10 + $0x1c0] sm:$0xff] }
 0xaa1   : > { %v2389_v5 = vpop.f32.mrf.mxu3 }
 0xaa2   : > { %2451 = vmatmul.f32.gmra.mxu0 %v2389_v5  ;;  %v3479_v5 = vld [vmem:[%s5139_s10 + $0x1c8] sm:$0xff] }
 0xaa3   : > { %2739 = vmatpush.msrb.mxu2 %v3479_v5 }
 0xaa9   : > { %v2392_v22 = vpop.f32.mrf.mxu3 }
 0xaaa   : > { %2454 = vmatmul.f32.gmra.mxu0 %v2392_v22  ;;  %v3476_v22 = vld [vmem:[%s5139_s10 + $0x1b0] sm:$0xff] }
 0xab1   : > { %v2395_v10 = vpop.f32.mrf.mxu3 }
 0xab2   : > { %2457 = vmatmul.f32.gmra.mxu0 %v2395_v10  ;;  %v3477_v10 = vld [vmem:[%s5139_s10 + $0x1b8] sm:$0xff] }
 0xab3   : > { %2740 = vmatpush.msrb.mxu2 %v3477_v10 }
 0xaf7   : > { %v2437_v13 = vpop.f32.mrf.mxu0 }
 0xaf8   : > { %v2438_v60 = vadd.f32 %v3575_v42, %v2437_v13  ;;  %v3475_v13 = vld [vmem:[%s5139_s10 + $0x1a8] sm:$0xff] }
 0xaf9   : > { %2741 = vmatpush.msrb.mxu2 %v3475_v13 }
 0xafa   : > { %v2461_v31 = vadd.f32 %v2438_v60, %v4533_v24  ;;  %v3472_v60 = vld [vmem:[%s5139_s10 + $0x190] sm:$0xff] }
 0xafc   : > { %2473 = vadd.xlane.f32.xlu1 %v2461_v31 }
 0xaff   : > { %v2440_v38 = vpop.f32.mrf.mxu0 }
 0xb00   : > { %v2441_v14 = vadd.f32 %v3575_v42, %v2440_v38  ;;  %v3470_v38 = vld [vmem:[%s5139_s10 + $0x180] sm:$0xff] }
 0xb02   : > { %v2462_v15 = vadd.f32 %v2441_v14, %v4542_v40  ;;  %v3471_v14 = vld [vmem:[%s5139_s10 + $0x188] sm:$0xff] }
 0xb04   : > { %2475 = vadd.xlane.f32.xlu2 %v2462_v15 }
 0xb07   : > { %v2443_v17 = vpop.f32.mrf.mxu0 }
 0xb08   : > { %v2444_v6 = vadd.f32 %v3575_v42, %v2443_v17  ;;  %v3469_v17 = vld [vmem:[%s5139_s10 + $0x178] sm:$0xff] }
 0xb0a   : > { %v2463_v9 = vadd.f32 %v2444_v6, %v4551_v47  ;;  %v3466_v6 = vld [vmem:[%s5139_s10 + $0x160] sm:$0xff] }
 0xb0c   : > { %2477 = vadd.xlane.f32.xlu0 %v2463_v9 }
 0xb0f   : > { %v2446_v19 = vpop.f32.mrf.mxu0 }
 0xb10   : > { %v2447_v34 = vadd.f32 %v3575_v42, %v2446_v19  ;;  %v3464_v19 = vld [vmem:[%s5139_s10 + $0x150] sm:$0xff] }
 0xb12   : > { %v2464_v11 = vadd.f32 %v2447_v34, %v4560_v28  ;;  %v3465_v34 = vld [vmem:[%s5139_s10 + $0x158] sm:$0xff] }
 0xb14   : > { %2479 = vadd.xlane.f32.xlu1 %v2464_v11 }
 0xb17   : > { %v2449_v16 = vpop.f32.mrf.mxu0 }
 0xb18   : > { %v2450_v1 = vadd.f32 %v3575_v42, %v2449_v16  ;;  %v3463_v16 = vld [vmem:[%s5139_s10 + $0x148] sm:$0xff] }
 0xb1a   : > { %v2465_v24 = vadd.f32 %v2450_v1, %v4568_v18  ;;  %v3460_v1 = vld [vmem:[%s5139_s10 + $0x130] sm:$0xff] }
 0xb1c   : > { %2481 = vadd.xlane.f32.xlu2 %v2465_v24 }
 0xb1f   : > { %v2452_v62 = vpop.f32.mrf.mxu0 }
 0xb20   : > { %v2453_v33 = vadd.f32 %v3575_v42, %v2452_v62  ;;  %v3458_v62 = vld [vmem:[%s5139_s10 + $0x120] sm:$0xff] }
 0xb22   : > { %v2466_v40 = vadd.f32 %v2453_v33, %v4576_v25  ;;  %v3459_v33 = vld [vmem:[%s5139_s10 + $0x128] sm:$0xff] }
 0xb24   : > { %2483 = vadd.xlane.f32.xlu0 %v2466_v40 }
 0xb27   : > { %v2455_v32 = vpop.f32.mrf.mxu0 }
 0xb28   : > { %v2456_v30 = vadd.f32 %v3575_v42, %v2455_v32  ;;  %v3457_v32 = vld [vmem:[%s5139_s10 + $0x118] sm:$0xff] }
 0xb2a   : > { %v2467_v47 = vadd.f32 %v2456_v30, %v4584_v58  ;;  %v3454_v30 = vld [vmem:[%s5139_s10 + $0x100] sm:$0xff] }
 0xb2c   : > { %2485 = vadd.xlane.f32.xlu2 %v2467_v47 }
 0xb2f   : > { %v2458_v18 = vpop.f32.mrf.mxu0 }
 0xb30   : > { %v2459_v29 = vadd.f32 %v3575_v42, %v2458_v18  ;;  %v3474_v42 = vld [vmem:[%s5139_s10 + $0x1a0] sm:$0xff] }
 0xb32   : > { %v4724_v8 = vadd.f32 %v2459_v29, %v4593_v46  ;;  %v3484_v46 = vld [vmem:[%s5139_s10 + $0x1f0] sm:$0xff] }
 0xb33   : > { %2695 = vmatpush.msra.mxu1 %v3484_v46 }
 0xb35   : > { %2696 = vmatpush.msra.mxu1 %v3482_v36 }
 0xb37   : > { %2697 = vmatpush.msra.mxu1 %v3480_v52 }
 0xb39   : > { %2698 = vmatpush.msra.mxu1 %v3478_v4 }
 0xb3b   : > { %2699 = vmatpush.msra.mxu1 %v3476_v22 }
 0xb3d   : > { %2700 = vmatpush.msra.mxu1 %v3474_v42 }
 0xb3f   : > { %2701 = vmatpush.msra.mxu1 %v3472_v60 }
 0xb41   : > { %2702 = vmatpush.msra.mxu1 %v3470_v38 }
 0xb6f   : > { %v2474_v43 = vpop.xlane.xlu1 %2473 }
 0xb70   : > { %v2489_v26 = vmul.f32 %v2474_v43, %v4221_v21 }
 0xb72   : > { %v4716_v28 = vsub.f32 %v2461_v31, %v2489_v26  ;;  %v3473_v31 = vld [vmem:[%s5139_s10 + $0x198] sm:$0xff] }
 0xb73   : > { %2742 = vmatpush.msrb.mxu2 %v3473_v31 }
 0xb74   : > { %v2505_v27 = vmul.f32 %v4716_v28, %v4716_v28 }
 0xb75   : > { %2743 = vmatpush.msrb.mxu2 %v3471_v14 }
 0xb76   : > { %2513 = vadd.xlane.f32.xlu1 %v2505_v27 }
 0xb77   : > { %v2476_v0 = vpop.xlane.xlu2 %2475  ;;  %2744 = vmatpush.msrb.mxu2 %v3469_v17 }
 0xb78   : > { %v2490_v25 = vmul.f32 %v2476_v0, %v4221_v21 }
 0xb7a   : > { %v4721_v41 = vsub.f32 %v2462_v15, %v2490_v25  ;;  %v3468_v15 = vld [vmem:[%s5139_s10 + $0x170] sm:$0xff] }
 0xb7b   : > { %2703 = vmatpush.msra.mxu1 %v3468_v15 }
 0xb7c   : > { %v2506_v58 = vmul.f32 %v4721_v41, %v4721_v41 }
 0xb7d   : > { %2704 = vmatpush.msra.mxu1 %v3466_v6 }
 0xb7e   : > { %2487 = vadd.xlane.f32.xlu1 %v4724_v8  ;;  %2515 = vadd.xlane.f32.xlu0 %v2506_v58 }
 0xb7f   : > { %v2478_v12 = vpop.xlane.xlu0 %2477  ;;  %2705 = vmatpush.msra.mxu1 %v3464_v19 }
 0xb80   : > { %v2491_v37 = vmul.f32 %v2478_v12, %v4221_v21 }
 0xb82   : > { %v4730_v23 = vsub.f32 %v2463_v9, %v2491_v37  ;;  %v3467_v9 = vld [vmem:[%s5139_s10 + $0x168] sm:$0xff] }
 0xb83   : > { %2745 = vmatpush.msrb.mxu2 %v3467_v9 }
 0xb84   : > { %v2507_v45 = vmul.f32 %v4730_v23, %v4730_v23 }
 0xb85   : > { %2746 = vmatpush.msrb.mxu2 %v3465_v34 }
 0xb86   : > { %2517 = vadd.xlane.f32.xlu2 %v2507_v45 }
 0xb87   : > { %v2480_v44 = vpop.xlane.xlu1 %2479  ;;  %2747 = vmatpush.msrb.mxu2 %v3463_v16 }
 0xb88   : > { %v2492_v55 = vmul.f32 %v2480_v44, %v4221_v21 }
 0xb8a   : > { %v4747_v57 = vsub.f32 %v2464_v11, %v2492_v55  ;;  %v3462_v11 = vld [vmem:[%s5139_s10 + $0x140] sm:$0xff] }
 0xb8b   : > { %2706 = vmatpush.msra.mxu1 %v3462_v11 }
 0xb8c   : > { %v2508_v7 = vmul.f32 %v4747_v57, %v4747_v57 }
 0xb8d   : > { %2707 = vmatpush.msra.mxu1 %v3460_v1 }
 0xb8e   : > { %2519 = vadd.xlane.f32.xlu0 %v2508_v7 }
 0xb8f   : > { %v2482_v50 = vpop.xlane.xlu2 %2481  ;;  %2708 = vmatpush.msra.mxu1 %v3458_v62 }
 0xb90   : > { %v2493_v59 = vmul.f32 %v2482_v50, %v4221_v21 }
 0xb92   : > { %v4752_v63 = vsub.f32 %v2465_v24, %v2493_v59  ;;  %v3461_v24 = vld [vmem:[%s5139_s10 + $0x138] sm:$0xff] }
 0xb93   : > { %2748 = vmatpush.msrb.mxu2 %v3461_v24 }
 0xb94   : > { %v2509_v20 = vmul.f32 %v4752_v63, %v4752_v63 }
 0xb95   : > { %2749 = vmatpush.msrb.mxu2 %v3459_v33 }
 0xb96   : > { %2521 = vadd.xlane.f32.xlu1 %v2509_v20 }
 0xb97   : > { %v2484_v51 = vpop.xlane.xlu0 %2483  ;;  %2750 = vmatpush.msrb.mxu2 %v3457_v32 }
 0xb98   : > { %v2494_v54 = vmul.f32 %v2484_v51, %v4221_v21 }
 0xb9a   : > { %v4757_v39 = vsub.f32 %v2466_v40, %v2494_v54  ;;  %v3456_v40 = vld [vmem:[%s5139_s10 + $0x110] sm:$0xff] }
 0xb9b   : > { %2709 = vmatpush.msra.mxu1 %v3456_v40 }
 0xb9c   : > { %v2510_v48 = vmul.f32 %v4757_v39, %v4757_v39 }
 0xb9d   : > { %2710 = vmatpush.msra.mxu1 %v3454_v30 }
 0xb9e   : > { %2523 = vadd.xlane.f32.xlu2 %v2510_v48 }
 0xb9f   : > { %v2486_v53 = vpop.xlane.xlu2 %2485 }
 0xba0   : > { %v2495_v61 = vmul.f32 %v2486_v53, %v4221_v21  ;;  %v4868_v53 = vld [vmem:[%s5138_s9 + $0x1] ss:$0 sm:$0xff] }
 0xba2   : > { %v4762_v56 = vsub.f32 %v2467_v47, %v2495_v61  ;;  %v3455_v47 = vld [vmem:[%s5139_s10 + $0x108] sm:$0xff] }
 0xba3   : > { %2751 = vmatpush.msrb.mxu2 %v3455_v47 }
 0xba4   : > { %v2511_v2 = vmul.f32 %v4762_v56, %v4762_v56 }
 0xba6   : > { %2525 = vadd.xlane.f32.xlu0 %v2511_v2 }
 0xbe9   : > { %v2514_v43 = vpop.xlane.xlu1 %2513 }
 0xbea   : > { %v2529_v26 = vmul.f32 %v2514_v43, %v4221_v21 }
 0xbec   : > { %v2537_v27 = vadd.f32 1e-05, %v2529_v26 }
 0xbee   : > { %3680 = vrsqrt.f32 %v2537_v27  ;;  %vm2551_vm9 = vweird.f32 %v2537_v27 }
 0xbf1   : > { %v2488_v18 = vpop.xlane.xlu1 %2487  ;;  %v2516_v0 = vpop.xlane.xlu0 %2515 }
 0xbf2   : > { %v2496_v29 = vmul.f32 %v2488_v18, %v4221_v21  ;;  %v2530_v25 = vmul.f32 %v2516_v0, %v4221_v21 }
 0xbf4   : > { %v3681_v58 = vpop.eup %3680  ;;  %v4854_v12 = vsub.f32 %v4724_v8, %v2496_v29  ;;  %v2538_v45 = vadd.f32 1e-05, %v2530_v25  ;;  %v4862_v8 = vld [vmem:[%s5137_s8 + $0x1] ss:$0 sm:$0xff]  ;;  %v2808_v29 = vld [vmem:[#allocation4 + $0x170] sm:$0xff] }
 0xbf5   : > { %v2546_v37 = vmul.f32 %v3681_v58, %v2537_v27  ;;  %vm2552_vm0 = vweird.f32 %v3681_v58 }
 0xbf6   : > { %v2512_v46 = vmul.f32 %v4854_v12, %v4854_v12  ;;  %3682 = vrsqrt.f32 %v2538_v45  ;;  %vm2553_vm10 = vmor %vm2551_vm9, %vm2552_vm0  ;;  %vm2561_vm12 = vweird.f32 %v2538_v45 }
 0xbf7   : > { %v2547_v35 = vmul.f32 %v3681_v58, %v2546_v37 }
 0xbf8   : > { %2527 = vadd.xlane.f32.xlu1 %v2512_v46 }
 0xbf9   : > { %v2548_v36 = vmul.f32 0.5, %v2547_v35  ;;  %v2518_v44 = vpop.xlane.xlu2 %2517 }
 0xbfa   : > { %v2531_v55 = vmul.f32 %v2518_v44, %v4221_v21 }
 0xbfb   : > { %v2549_v49 = vsub.f32 1.5, %v2548_v36 }
 0xbfc   : > { %v3683_v7 = vpop.eup %3682  ;;  %v2539_v59 = vadd.f32 1e-05, %v2531_v55 }
 0xbfd   : > { %v2550_v50 = vmul.f32 %v3681_v58, %v2549_v49  ;;  %v2556_v20 = vmul.f32 %v3683_v7, %v2538_v45  ;;  %vm2562_vm11 = vweird.f32 %v3683_v7 }
 0xbfe   : > { %3684 = vrsqrt.f32 %v2539_v59  ;;  %vm2563_vm13 = vmor %vm2561_vm12, %vm2562_vm11  ;;  %vm2571_vm15 = vweird.f32 %v2539_v59 }
 0xbff   : > { %v2554_v51 = vsel %vm2553_vm10, %v3681_v58, %v2550_v50  ;;  %v2557_v48 = vmul.f32 %v3683_v7, %v2556_v20 }
 0xc00   : > { %v2625_v54 = vmul.f32 %v2554_v51, %v4716_v28 }
 0xc01   : > { %v2558_v2 = vmul.f32 0.5, %v2557_v48  ;;  %v2520_v52 = vpop.xlane.xlu0 %2519 }
 0xc02   : > { %v2636_v61 = vmul.f32 %v4862_v8, %v2625_v54  ;;  %v2532_v3 = vmul.f32 %v2520_v52, %v4221_v21 }
 0xc03   : > { %v2559_v4 = vsub.f32 1.5, %v2558_v2 }
 0xc04   : > { %v4873_v5 = vadd.f32 %v4868_v53, %v2636_v61  ;;  %v3685_v22 = vpop.eup %3684  ;;  %v2540_v10 = vadd.f32 1e-05, %v2532_v3 }
 0xc05   : > { %v2560_v28 = vmul.f32 %v3683_v7, %v2559_v4  ;;  %v2566_v42 = vmul.f32 %v3685_v22, %v2539_v59  ;;  %vm2572_vm14 = vweird.f32 %v3685_v22 }
 0xc06   : > { %2711 = vmatmul.f32.vlgmr.msra.gmra.mxu1 %v4873_v5  ;;  %2752 = vmatmul.f32.vlgmr.msrb.gmra.mxu2 %v4873_v5  ;;  %3686 = vrsqrt.f32 %v2540_v10  ;;  %vm2573_vm1 = vmor %vm2571_vm15, %vm2572_vm14  ;;  %vm2581_vm3 = vweird.f32 %v2540_v10 }
 0xc07   : > { %v2564_v13 = vsel %vm2563_vm13, %v3683_v7, %v2560_v28  ;;  %v2567_v60 = vmul.f32 %v3685_v22, %v2566_v42 }
 0xc08   : > { %v2626_v31 = vmul.f32 %v2564_v13, %v4721_v41 }
 0xc09   : > { %v2568_v38 = vmul.f32 0.5, %v2567_v60  ;;  %v2522_v14 = vpop.xlane.xlu1 %2521 }
 0xc0a   : > { %v2533_v15 = vmul.f32 %v2522_v14, %v4221_v21  ;;  %v2637_v17 = vmul.f32 %v4862_v8, %v2626_v31 }
 0xc0b   : > { %v2569_v6 = vsub.f32 1.5, %v2568_v38 }
 0xc0c   : > { %v3687_v9 = vpop.eup %3686  ;;  %v2541_v19 = vadd.f32 1e-05, %v2533_v15  ;;  %v4881_v34 = vadd.f32 %v4868_v53, %v2637_v17  ;;  %v2807_v15 = vld [vmem:[#allocation4 + $0x168] sm:$0xff]  ;;  %v2806_v17 = vld [vmem:[#allocation4 + $0x160] sm:$0xff] }
 0xc0d   : > { %v2570_v11 = vmul.f32 %v3685_v22, %v2569_v6  ;;  %v2576_v16 = vmul.f32 %v3687_v9, %v2540_v10  ;;  %vm2582_vm2 = vweird.f32 %v3687_v9  ;;  %v2825_v6 = vld [vmem:[#allocation4 + $0x1f8] sm:$0xff] }
 0xc0e   : > { %3688 = vrsqrt.f32 %v2541_v19  ;;  %2714 = vmatmul.f32.gmra.mxu1 %v4881_v34  ;;  %2755 = vmatmul.f32.gmra.mxu2 %v4881_v34  ;;  %vm2583_vm4 = vmor %vm2581_vm3, %vm2582_vm2  ;;  %vm2591_vm6 = vweird.f32 %v2541_v19 }
 0xc0f   : > { %v2574_v41 = vsel %vm2573_vm1, %v3685_v22, %v2570_v11  ;;  %v2577_v1 = vmul.f32 %v3687_v9, %v2576_v16  ;;  %2872 = vmatpush.msrb.mxu0 %v2825_v6  ;;  %v2823_v11 = vld [vmem:[#allocation4 + $0x1e8] sm:$0xff] }
 0xc10   : > { %v2627_v24 = vmul.f32 %v2574_v41, %v4730_v23  ;;  %v2809_v23 = vld [vmem:[#allocation4 + $0x178] sm:$0xff]  ;;  %v2803_v16 = vld [vmem:[#allocation4 + $0x148] sm:$0xff]  ;;  %v2822_v41 = vld [vmem:[#allocation4 + $0x1e0] sm:$0xff] }
 0xc11   : > { %v2578_v62 = vmul.f32 0.5, %v2577_v1  ;;  %v2524_v33 = vpop.xlane.xlu2 %2523  ;;  %2831 = vmatpush.msrb.mxu3 %v2809_v23  ;;  %v2802_v1 = vld [vmem:[#allocation4 + $0x140] sm:$0xff]  ;;  %v2816_v23 = vld [vmem:[#allocation4 + $0x1b0] sm:$0xff] }
 0xc12   : > { %v2534_v40 = vmul.f32 %v2524_v33, %v4221_v21  ;;  %v2638_v32 = vmul.f32 %v4862_v8, %v2627_v24  ;;  %v2821_v24 = vld [vmem:[#allocation4 + $0x1d8] sm:$0xff]  ;;  %v2820_v33 = vld [vmem:[#allocation4 + $0x1d0] sm:$0xff] }
 0xc13   : > { %v2579_v30 = vsub.f32 1.5, %v2578_v62  ;;  %2832 = vmatpush.msrb.mxu3 %v2808_v29  ;;  %v2801_v62 = vld [vmem:[#allocation4 + $0x138] sm:$0xff]  ;;  %v2796_v29 = vld [vmem:[#allocation4 + $0x110] sm:$0xff] }
 0xc14   : > { %v3689_v47 = vpop.eup %3688  ;;  %v2542_v43 = vadd.f32 1e-05, %v2534_v40  ;;  %v4889_v26 = vadd.f32 %v4868_v53, %v2638_v32  ;;  %v2800_v40 = vld [vmem:[#allocation4 + $0x130] sm:$0xff]  ;;  %v2819_v32 = vld [vmem:[#allocation4 + $0x1c8] sm:$0xff] }
 0xc15   : > { %v2580_v27 = vmul.f32 %v3687_v9, %v2579_v30  ;;  %v2586_v18 = vmul.f32 %v3689_v47, %v2541_v19  ;;  %vm2592_vm5 = vweird.f32 %v3689_v47  ;;  %2833 = vmatpush.msrb.mxu3 %v2807_v15  ;;  %v2824_v19 = vld [vmem:[#allocation4 + $0x1f0] sm:$0xff]  ;;  %v2799_v30 = vld [vmem:[#allocation4 + $0x128] sm:$0xff] }
 0xc16   : > { %3690 = vrsqrt.f32 %v2542_v43  ;;  %2717 = vmatmul.f32.gmra.mxu1 %v4889_v26  ;;  %2758 = vmatmul.f32.gmra.mxu2 %v4889_v26  ;;  %vm2593_vm7 = vmor %vm2591_vm6, %vm2592_vm5  ;;  %vm2601_vm0 = vweird.f32 %v2542_v43 }
 0xc17   : > { %v2584_v0 = vsel %vm2583_vm4, %v3687_v9, %v2580_v27  ;;  %v2587_v25 = vmul.f32 %v3689_v47, %v2586_v18  ;;  %2834 = vmatpush.msrb.mxu3 %v2806_v17  ;;  %v2805_v9 = vld [vmem:[#allocation4 + $0x158] sm:$0xff]  ;;  %2873 = vmatpush.msrb.mxu0 %v2824_v19 }
 0xc18   : > { %v2628_v58 = vmul.f32 %v2584_v0, %v4747_v57  ;;  %v2817_v27 = vld [vmem:[#allocation4 + $0x1b8] sm:$0xff]  ;;  %v2815_v0 = vld [vmem:[#allocation4 + $0x1a8] sm:$0xff] }
 0xc19   : > { %v2588_v37 = vmul.f32 0.5, %v2587_v25  ;;  %v2526_v45 = vpop.xlane.xlu0 %2525  ;;  %2835 = vmatpush.msrb.mxu3 %v2805_v9  ;;  %2874 = vmatpush.msrb.mxu0 %v2823_v11  ;;  %v2797_v18 = vld [vmem:[#allocation4 + $0x118] sm:$0xff]  ;;  %v2795_v25 = vld [vmem:[#allocation4 + $0x108] sm:$0xff] }
 0xc1a   : > { %v2535_v46 = vmul.f32 %v2526_v45, %v4221_v21  ;;  %v2639_v35 = vmul.f32 %v4862_v8, %v2628_v58  ;;  %v2814_v58 = vld [vmem:[#allocation4 + $0x1a0] sm:$0xff]  ;;  %v2813_v45 = vld [vmem:[#allocation4 + $0x198] sm:$0xff] }
 0xc1b   : > { %v2589_v36 = vsub.f32 1.5, %v2588_v37  ;;  %2875 = vmatpush.msrb.mxu0 %v2822_v41  ;;  %v2794_v37 = vld [vmem:[#allocation4 + $0x100] sm:$0xff] }
 0xc1c   : > { %v3691_v44 = vpop.eup %3690  ;;  %v2543_v49 = vadd.f32 1e-05, %v2535_v46  ;;  %v4897_v55 = vadd.f32 %v4868_v53, %v2639_v35  ;;  %v2812_v46 = vld [vmem:[#allocation4 + $0x190] sm:$0xff] }
 0xc1d   : > { %v2590_v7 = vmul.f32 %v3689_v47, %v2589_v36  ;;  %v2596_v50 = vmul.f32 %v3691_v44, %v2542_v43  ;;  %vm2602_vm8 = vweird.f32 %v3691_v44  ;;  %2876 = vmatpush.msrb.mxu0 %v2821_v24  ;;  %v2798_v43 = vld [vmem:[#allocation4 + $0x120] sm:$0xff]  ;;  %v2811_v36 = vld [vmem:[#allocation4 + $0x188] sm:$0xff] }
 0xc1e   : > { %3692 = vrsqrt.f32 %v2543_v49  ;;  %2720 = vmatmul.f32.gmra.mxu1 %v4897_v55  ;;  %2761 = vmatmul.f32.gmra.mxu2 %v4897_v55  ;;  %vm2603_vm9 = vmor %vm2601_vm0, %vm2602_vm8  ;;  %vm2611_vm11 = vweird.f32 %v2543_v49 }
 0xc1f   : > { %v2594_v57 = vsel %vm2593_vm7, %v3689_v47, %v2590_v7  ;;  %v2597_v59 = vmul.f32 %v3691_v44, %v2596_v50  ;;  %2877 = vmatpush.msrb.mxu0 %v2820_v33  ;;  %v2818_v47 = vld [vmem:[#allocation4 + $0x1c0] sm:$0xff] }
 0xc20   : > { %v2629_v20 = vmul.f32 %v2594_v57, %v4752_v63 }
 0xc21   : > { %v2598_v51 = vmul.f32 0.5, %v2597_v59  ;;  %2878 = vmatpush.msrb.mxu0 %v2819_v32 }
 0xc22   : > { %v2640_v54 = vmul.f32 %v4862_v8, %v2629_v20 }
 0xc23   : > { %v2599_v48 = vsub.f32 1.5, %v2598_v51  ;;  %2879 = vmatpush.msrb.mxu0 %v2818_v47 }
 0xc24   : > { %v3693_v61 = vpop.eup %3692  ;;  %v4904_v2 = vadd.f32 %v4868_v53, %v2640_v54  ;;  %v3486_v54 = vld [vmem:[%s5140_s11 + $0x2] sm:$0x3] }
 0xc25   : > { %v2600_v52 = vmul.f32 %v3691_v44, %v2599_v48  ;;  %v2606_v3 = vmul.f32 %v3693_v61, %v2543_v49  ;;  %vm2612_vm10 = vweird.f32 %v3693_v61  ;;  %2880 = vmatpush.msrb.mxu0 %v2817_v27  ;;  %v2810_v49 = vld [vmem:[#allocation4 + $0x180] sm:$0xff] }
 0xc26   : > { %2723 = vmatmul.f32.gmra.mxu1 %v4904_v2  ;;  %2764 = vmatmul.f32.gmra.mxu2 %v4904_v2  ;;  %vm2613_vm12 = vmor %vm2611_vm11, %vm2612_vm10 }
 0xc27   : > { %v2604_v4 = vsel %vm2603_vm9, %v3691_v44, %v2600_v52  ;;  %v2607_v22 = vmul.f32 %v3693_v61, %v2606_v3  ;;  %2881 = vmatpush.msrb.mxu0 %v2816_v23 }
 0xc28   : > { %v2630_v63 = vmul.f32 %v2604_v4, %v4757_v39 }
 0xc29   : > { %v2608_v10 = vmul.f32 0.5, %v2607_v22  ;;  %2882 = vmatpush.msrb.mxu0 %v2815_v0 }
 0xc2a   : > { %v2641_v28 = vmul.f32 %v4862_v8, %v2630_v63 }
 0xc2b   : > { %v2609_v42 = vsub.f32 1.5, %v2608_v10  ;;  %2883 = vmatpush.msrb.mxu0 %v2814_v58 }
 0xc2c   : > { %v4911_v13 = vadd.f32 %v4868_v53, %v2641_v28 }
 0xc2d   : > { %v2610_v60 = vmul.f32 %v3693_v61, %v2609_v42  ;;  %2884 = vmatpush.msrb.mxu0 %v2813_v45  ;;  %v4934_v42 = vperm.slane %v3486_v54, 1 }
 0xc2e   : > { %2726 = vmatmul.f32.gmra.mxu1 %v4911_v13  ;;  %2767 = vmatmul.f32.gmra.mxu2 %v4911_v13 }
 0xc2f   : > { %v2614_v31 = vsel %vm2613_vm12, %v3693_v61, %v2610_v60  ;;  %2885 = vmatpush.msrb.mxu0 %v2812_v46  ;;  %v4926_v61 = vperm.slane %v3486_v54, 0 }
 0xc30   : > { %v2631_v38 = vmul.f32 %v2614_v31, %v4762_v56  ;;  %v2804_v56 = vld [vmem:[#allocation4 + $0x150] sm:$0xff] }
 0xc31   : > { %2836 = vmatpush.msrb.mxu3 %v2804_v56  ;;  %2886 = vmatpush.msrb.mxu0 %v2811_v36 }
 0xc32   : > { %v2642_v39 = vmul.f32 %v4862_v8, %v2631_v38 }
 0xc33   : > { %2837 = vmatpush.msrb.mxu3 %v2803_v16  ;;  %2887 = vmatpush.msrb.mxu0 %v2810_v49 }
 0xc34   : > { %v4918_v14 = vadd.f32 %v4868_v53, %v2642_v39 }
 0xc35   : > { %2838 = vmatpush.msrb.mxu3 %v2802_v1 }
 0xc36   : > { %2729 = vmatmul.f32.gmra.mxu1 %v4918_v14  ;;  %2770 = vmatmul.f32.gmra.mxu2 %v4918_v14 }
 0xc37   : > { %2839 = vmatpush.msrb.mxu3 %v2801_v62 }
 0xc39   : > { %2840 = vmatpush.msrb.mxu3 %v2800_v40 }
 0xc3b   : > { %2841 = vmatpush.msrb.mxu3 %v2799_v30 }
 0xc3d   : > { %2842 = vmatpush.msrb.mxu3 %v2798_v43 }
 0xc3f   : > { %2843 = vmatpush.msrb.mxu3 %v2797_v18 }
 0xc41   : > { %2844 = vmatpush.msrb.mxu3 %v2796_v29 }
 0xc43   : > { %2845 = vmatpush.msrb.mxu3 %v2795_v25 }
 0xc45   : > { %2846 = vmatpush.msrb.mxu3 %v2794_v37 }
 0xc6b   : > { %v2528_v35 = vpop.xlane.xlu1 %2527 }
 0xc6c   : > { %v2536_v44 = vmul.f32 %v2528_v35, %v4221_v21 }
 0xc6e   : > { %v2544_v7 = vadd.f32 1e-05, %v2536_v44 }
 0xc70   : > { %3694 = vrsqrt.f32 %v2544_v7  ;;  %vm2621_vm14 = vweird.f32 %v2544_v7 }
 0xc76   : > { %v3695_v50 = vpop.eup %3694 }
 0xc77   : > { %v2616_v57 = vmul.f32 %v3695_v50, %v2544_v7  ;;  %vm2622_vm13 = vweird.f32 %v3695_v50 }
 0xc78   : > { %vm2623_vm15 = vmor %vm2621_vm14, %vm2622_vm13 }
 0xc79   : > { %v2617_v59 = vmul.f32 %v3695_v50, %v2616_v57 }
 0xc7b   : > { %v2618_v20 = vmul.f32 0.5, %v2617_v59  ;;  %v3578_v59 = vld [vmem:[%s5142_s13 + $0x1] ss:$0 sm:$0xff] }
 0xc7d   : > { %v2619_v51 = vsub.f32 1.5, %v2618_v20 }
 0xc7f   : > { %v2620_v48 = vmul.f32 %v3695_v50, %v2619_v51 }
 0xc81   : > { %v2624_v52 = vsel %vm2623_vm15, %v3695_v50, %v2620_v48 }
 0xc82   : > { %v2632_v3 = vmul.f32 %v2624_v52, %v4854_v12 }
 0xc83   : > { %v2712_v4 = vpop.f32.mrf.mxu1 }
 0xc84   : > { %v2713_v22 = vadd.f32 %v2712_v4, %v4926_v61  ;;  %v2643_v63 = vmul.f32 %v4862_v8, %v2632_v3 }
 0xc86   : > { %v2777_v10 = vmax.f32 %v2713_v22, 0.0  ;;  %v4932_v28 = vadd.f32 %v4868_v53, %v2643_v63 }
 0xc88   : > { %2732 = vmatmul.f32.gmra.mxu1 %v4932_v28  ;;  %2773 = vmatmul.f32.gmra.mxu2 %v4932_v28 }
 0xc89   : > { %2847 = vmatmul.f32.vlgmr.msrb.gmra.mxu3 %v2777_v10  ;;  %v2753_v60 = vpop.f32.mrf.mxu2 }
 0xc8a   : > { %v2754_v31 = vadd.f32 %v2753_v60, %v4934_v42 }
 0xc8b   : > { %v2715_v38 = vpop.f32.mrf.mxu1 }
 0xc8c   : > { %v2778_v12 = vmax.f32 %v2754_v31, 0.0  ;;  %v2716_v39 = vadd.f32 %v2715_v38, %v4926_v61 }
 0xc8e   : > { %2888 = vmatmul.f32.vlgmr.msrb.gmra.mxu0 %v2778_v12  ;;  %v2779_v8 = vmax.f32 %v2716_v39, 0.0 }
 0xc91   : > { %2850 = vmatmul.f32.gmra.mxu3 %v2779_v8  ;;  %v2756_v15 = vpop.f32.mrf.mxu2 }
 0xc92   : > { %v2757_v53 = vadd.f32 %v2756_v15, %v4934_v42 }
 0xc93   : > { %v2718_v17 = vpop.f32.mrf.mxu1 }
 0xc94   : > { %v2780_v6 = vmax.f32 %v2757_v53, 0.0  ;;  %v2719_v9 = vadd.f32 %v2718_v17, %v4926_v61 }
 0xc96   : > { %v2781_v19 = vmax.f32 %v2719_v9, 0.0  ;;  %2891 = vmatmul.f32.gmra.mxu0 %v2780_v6 }
 0xc99   : > { %2853 = vmatmul.f32.gmra.mxu3 %v2781_v19  ;;  %v2759_v56 = vpop.f32.mrf.mxu2 }
 0xc9a   : > { %v2760_v11 = vadd.f32 %v2759_v56, %v4934_v42 }
 0xc9b   : > { %v2721_v16 = vpop.f32.mrf.mxu1 }
 0xc9c   : > { %v2782_v41 = vmax.f32 %v2760_v11, 0.0  ;;  %v2722_v1 = vadd.f32 %v2721_v16, %v4926_v61 }
 0xc9e   : > { %v2783_v24 = vmax.f32 %v2722_v1, 0.0  ;;  %2894 = vmatmul.f32.gmra.mxu0 %v2782_v41 }
 0xca1   : > { %2856 = vmatmul.f32.gmra.mxu3 %v2783_v24  ;;  %v2762_v62 = vpop.f32.mrf.mxu2 }
 0xca2   : > { %v2763_v33 = vadd.f32 %v2762_v62, %v4934_v42 }
 0xca3   : > { %v2724_v40 = vpop.f32.mrf.mxu1 }
 0xca4   : > { %v2784_v32 = vmax.f32 %v2763_v33, 0.0  ;;  %v2725_v30 = vadd.f32 %v2724_v40, %v4926_v61 }
 0xca6   : > { %v2785_v47 = vmax.f32 %v2725_v30, 0.0  ;;  %2897 = vmatmul.f32.gmra.mxu0 %v2784_v32 }
 0xca9   : > { %2859 = vmatmul.f32.gmra.mxu3 %v2785_v47  ;;  %v2765_v43 = vpop.f32.mrf.mxu2 }
 0xcaa   : > { %v2766_v27 = vadd.f32 %v2765_v43, %v4934_v42 }
 0xcab   : > { %v2727_v18 = vpop.f32.mrf.mxu1 }
 0xcac   : > { %v2786_v23 = vmax.f32 %v2766_v27, 0.0  ;;  %v2728_v29 = vadd.f32 %v2727_v18, %v4926_v61 }
 0xcae   : > { %v2787_v0 = vmax.f32 %v2728_v29, 0.0  ;;  %2900 = vmatmul.f32.gmra.mxu0 %v2786_v23 }
 0xcb1   : > { %2862 = vmatmul.f32.gmra.mxu3 %v2787_v0  ;;  %v2768_v25 = vpop.f32.mrf.mxu2 }
 0xcb2   : > { %v2769_v58 = vadd.f32 %v2768_v25, %v4934_v42 }
 0xcb3   : > { %v2730_v37 = vpop.f32.mrf.mxu1 }
 0xcb4   : > { %v2788_v45 = vmax.f32 %v2769_v58, 0.0  ;;  %v2731_v46 = vadd.f32 %v2730_v37, %v4926_v61 }
 0xcb6   : > { %v2789_v35 = vmax.f32 %v2731_v46, 0.0  ;;  %2903 = vmatmul.f32.gmra.mxu0 %v2788_v45 }
 0xcb9   : > { %2865 = vmatmul.f32.gmra.mxu3 %v2789_v35  ;;  %v2771_v36 = vpop.f32.mrf.mxu2 }
 0xcba   : > { %v2772_v44 = vadd.f32 %v2771_v36, %v4934_v42  ;;  %v3121_v36 = vld [vmem:[%s5145_s16 + $0x70] sm:$0xff] }
 0xcbc   : > { %v2790_v49 = vmax.f32 %v2772_v44, 0.0 }
 0xcbe   : > { %2906 = vmatmul.f32.gmra.mxu0 %v2790_v49 }
 0xd05   : > { %v2733_v7 = vpop.f32.mrf.mxu1 }
 0xd06   : > { %v2734_v50 = vadd.f32 %v2733_v7, %v4926_v61 }
 0xd08   : > { %v2791_v57 = vmax.f32 %v2734_v50, 0.0 }
 0xd0a   : > { %2868 = vmatmul.f32.gmra.mxu3 %v2791_v57 }
 0xd0b   : > { %v2774_v20 = vpop.f32.mrf.mxu2  ;;  %v2889_v51 = vpop.f32.mrf.mxu0 }
 0xd0c   : > { %v2775_v54 = vadd.f32 %v2774_v20, %v4934_v42  ;;  %v2848_v48 = vpop.f32.mrf.mxu3 }
 0xd0d   : > { %v2849_v52 = vadd.f32 %v3578_v59, %v2848_v48 }
 0xd0e   : > { %v2792_v3 = vmax.f32 %v2775_v54, 0.0 }
 0xd0f   : > { %v2890_v4 = vadd.f32 %v2889_v51, %v2849_v52 }
 0xd10   : > { %2909 = vmatmul.f32.gmra.mxu0 %v2792_v3 }
 0xd11   : > { %v2913_v22 = vadd.f32 %v2890_v4, %v4873_v5 }
 0xd13   : > { %2925 = vadd.xlane.f32.xlu2 %v2913_v22  ;;  %v2892_v61 = vpop.f32.mrf.mxu0 }
 0xd14   : > { %v2851_v63 = vpop.f32.mrf.mxu3 }
 0xd15   : > { %v2852_v10 = vadd.f32 %v3578_v59, %v2851_v63 }
 0xd17   : > { %v2893_v60 = vadd.f32 %v2892_v61, %v2852_v10  ;;  %v3120_v10 = vld [vmem:[%s5145_s16 + $0x68] sm:$0xff] }
 0xd19   : > { %v2914_v31 = vadd.f32 %v2893_v60, %v4881_v34  ;;  %v3119_v60 = vld [vmem:[%s5145_s16 + $0x60] sm:$0xff] }
 0xd1b   : > { %2927 = vadd.xlane.f32.xlu0 %v2914_v31  ;;  %v2895_v38 = vpop.f32.mrf.mxu0 }
 0xd1c   : > { %v2854_v12 = vpop.f32.mrf.mxu3 }
 0xd1d   : > { %v2855_v39 = vadd.f32 %v3578_v59, %v2854_v12  ;;  %v3117_v12 = vld [vmem:[%s5145_s16 + $0x50] sm:$0xff] }
 0xd1f   : > { %v2896_v8 = vadd.f32 %v2895_v38, %v2855_v39  ;;  %v3116_v38 = vld [vmem:[%s5145_s16 + $0x48] sm:$0xff]  ;;  %v3115_v39 = vld [vmem:[%s5145_s16 + $0x40] sm:$0xff] }
 0xd21   : > { %v2915_v42 = vadd.f32 %v2896_v8, %v4889_v26  ;;  %v3114_v8 = vld [vmem:[%s5145_s16 + $0x38] sm:$0xff] }
 0xd23   : > { %2929 = vadd.xlane.f32.xlu1 %v2915_v42  ;;  %v2898_v53 = vpop.f32.mrf.mxu0 }
 0xd24   : > { %v2857_v15 = vpop.f32.mrf.mxu3 }
 0xd25   : > { %v2858_v17 = vadd.f32 %v3578_v59, %v2857_v15  ;;  %v3112_v15 = vld [vmem:[%s5145_s16 + $0x28] sm:$0xff] }
 0xd27   : > { %v2899_v6 = vadd.f32 %v2898_v53, %v2858_v17  ;;  %v3111_v53 = vld [vmem:[%s5145_s16 + $0x20] sm:$0xff]  ;;  %v3110_v17 = vld [vmem:[%s5145_s16 + $0x18] sm:$0xff] }
 0xd29   : > { %v2916_v5 = vadd.f32 %v2899_v6, %v4897_v55  ;;  %v3109_v6 = vld [vmem:[%s5145_s16 + $0x10] sm:$0xff] }
 0xd2b   : > { %2931 = vadd.xlane.f32.xlu2 %v2916_v5  ;;  %v2901_v19 = vpop.f32.mrf.mxu0 }
 0xd2c   : > { %v2860_v9 = vpop.f32.mrf.mxu3 }
 0xd2d   : > { %v2861_v56 = vadd.f32 %v3578_v59, %v2860_v9  ;;  %v3107_v9 = vld [vmem:[%s5145_s16] sm:$0xff] }
 0xd2f   : > { %v2902_v11 = vadd.f32 %v2901_v19, %v2861_v56 }
 0xd31   : > { %v2917_v34 = vadd.f32 %v2902_v11, %v4904_v2 }
 0xd33   : > { %2933 = vadd.xlane.f32.xlu0 %v2917_v34  ;;  %v2904_v41 = vpop.f32.mrf.mxu0 }
 0xd34   : > { %v2863_v16 = vpop.f32.mrf.mxu3 }
 0xd35   : > { %v2864_v1 = vadd.f32 %v3578_v59, %v2863_v16 }
 0xd37   : > { %v2905_v24 = vadd.f32 %v2904_v41, %v2864_v1 }
 0xd39   : > { %v2918_v26 = vadd.f32 %v2905_v24, %v4911_v13 }
 0xd3b   : > { %2935 = vadd.xlane.f32.xlu1 %v2918_v26  ;;  %v2907_v40 = vpop.f32.mrf.mxu0 }
 0xd3c   : > { %v2866_v62 = vpop.f32.mrf.mxu3 }
 0xd3d   : > { %v2867_v33 = vadd.f32 %v3578_v59, %v2866_v62 }
 0xd3f   : > { %v2908_v32 = vadd.f32 %v2907_v40, %v2867_v33 }
 0xd41   : > { %v2919_v55 = vadd.f32 %v2908_v32, %v4918_v14 }
 0xd43   : > { %2937 = vadd.xlane.f32.xlu0 %v2919_v55 }
 0xd86   : > { %v2926_v30 = vpop.xlane.xlu2 %2925 }
 0xd87   : > { %v2941_v47 = vmul.f32 %v2926_v30, %v4221_v21 }
 0xd89   : > { %v4964_v43 = vsub.f32 %v2913_v22, %v2941_v47 }
 0xd8b   : > { %v2957_v2 = vmul.f32 %v4964_v43, %v4964_v43 }
 0xd8d   : > { %2965 = vadd.xlane.f32.xlu2 %v2957_v2  ;;  %v2869_v27 = vpop.f32.mrf.mxu3  ;;  %v2910_v29 = vpop.f32.mrf.mxu0 }
 0xd8e   : > { %v2928_v18 = vpop.xlane.xlu0 %2927  ;;  %v2870_v13 = vadd.f32 %v3578_v59, %v2869_v27 }
 0xd8f   : > { %v2942_v23 = vmul.f32 %v2928_v18, %v4221_v21 }
 0xd90   : > { %v2911_v0 = vadd.f32 %v2910_v29, %v2870_v13  ;;  %v5062_v29 = vld [vmem:[%s5143_s14 + $0x1] ss:$0 sm:$0xff] }
 0xd91   : > { %v4969_v25 = vsub.f32 %v2914_v31, %v2942_v23  ;;  %v3118_v31 = vld [vmem:[%s5145_s16 + $0x58] sm:$0xff] }
 0xd92   : > { %v4972_v14 = vadd.f32 %v2911_v0, %v4932_v28  ;;  %v3122_v28 = vld [vmem:[%s5145_s16 + $0x78] sm:$0xff] }
 0xd93   : > { %v2958_v58 = vmul.f32 %v4969_v25, %v4969_v25  ;;  %3127 = vmatpush.msrb.mxu1 %v3122_v28 }
 0xd95   : > { %2967 = vadd.xlane.f32.xlu1 %v2958_v58  ;;  %2939 = vadd.xlane.f32.xlu2 %v4972_v14 }
 0xd96   : > { %v2930_v37 = vpop.xlane.xlu1 %2929  ;;  %3128 = vmatpush.msrb.mxu1 %v3121_v36 }
 0xd97   : > { %v2943_v45 = vmul.f32 %v2930_v37, %v4221_v21  ;;  %v5068_v37 = vld [vmem:[%s5144_s15 + $0x1] ss:$0 sm:$0xff] }
 0xd98   : > { %3129 = vmatpush.msrb.mxu1 %v3120_v10 }
 0xd99   : > { %v4978_v46 = vsub.f32 %v2915_v42, %v2943_v45  ;;  %v3113_v42 = vld [vmem:[%s5145_s16 + $0x30] sm:$0xff] }
 0xd9a   : > { %3130 = vmatpush.msrb.mxu1 %v3119_v60 }
 0xd9b   : > { %v2959_v35 = vmul.f32 %v4978_v46, %v4978_v46 }
 0xd9c   : > { %3131 = vmatpush.msrb.mxu1 %v3118_v31 }
 0xd9d   : > { %2969 = vadd.xlane.f32.xlu0 %v2959_v35 }
 0xd9e   : > { %v2932_v44 = vpop.xlane.xlu2 %2931  ;;  %3132 = vmatpush.msrb.mxu1 %v3117_v12 }
 0xd9f   : > { %v2944_v49 = vmul.f32 %v2932_v44, %v4221_v21 }
 0xda0   : > { %3133 = vmatpush.msrb.mxu1 %v3116_v38 }
 0xda1   : > { %v4989_v7 = vsub.f32 %v2916_v5, %v2944_v49  ;;  %v3108_v5 = vld [vmem:[%s5145_s16 + $0x8] sm:$0xff] }
 0xda2   : > { %3134 = vmatpush.msrb.mxu1 %v3115_v39 }
 0xda3   : > { %v2960_v50 = vmul.f32 %v4989_v7, %v4989_v7 }
 0xda4   : > { %3135 = vmatpush.msrb.mxu1 %v3114_v8 }
 0xda5   : > { %2971 = vadd.xlane.f32.xlu1 %v2960_v50 }
 0xda6   : > { %v2934_v57 = vpop.xlane.xlu0 %2933  ;;  %3136 = vmatpush.msrb.mxu1 %v3113_v42 }
 0xda7   : > { %v2945_v59 = vmul.f32 %v2934_v57, %v4221_v21 }
 0xda8   : > { %3137 = vmatpush.msrb.mxu1 %v3112_v15 }
 0xda9   : > { %v4994_v20 = vsub.f32 %v2917_v34, %v2945_v59 }
 0xdaa   : > { %3138 = vmatpush.msrb.mxu1 %v3111_v53 }
 0xdab   : > { %v2961_v51 = vmul.f32 %v4994_v20, %v4994_v20 }
 0xdac   : > { %3139 = vmatpush.msrb.mxu1 %v3110_v17 }
 0xdad   : > { %2973 = vadd.xlane.f32.xlu2 %v2961_v51 }
 0xdae   : > { %v2936_v54 = vpop.xlane.xlu1 %2935  ;;  %3140 = vmatpush.msrb.mxu1 %v3109_v6 }
 0xdaf   : > { %v2946_v48 = vmul.f32 %v2936_v54, %v4221_v21 }
 0xdb0   : > { %3141 = vmatpush.msrb.mxu1 %v3108_v5 }
 0xdb1   : > { %v4999_v52 = vsub.f32 %v2918_v26, %v2946_v48 }
 0xdb2   : > { %3142 = vmatpush.msrb.mxu1 %v3107_v9 }
 0xdb3   : > { %v2962_v3 = vmul.f32 %v4999_v52, %v4999_v52 }
 0xdb5   : > { %2975 = vadd.xlane.f32.xlu0 %v2962_v3 }
 0xdb6   : > { %v2938_v4 = vpop.xlane.xlu0 %2937 }
 0xdb7   : > { %v2947_v22 = vmul.f32 %v2938_v4, %v4221_v21 }
 0xdb9   : > { %v5004_v63 = vsub.f32 %v2919_v55, %v2947_v22 }
 0xdbb   : > { %v2963_v61 = vmul.f32 %v5004_v63, %v5004_v63 }
 0xdbd   : > { %2977 = vadd.xlane.f32.xlu1 %v2963_v61 }
 0xe00   : > { %v2966_v19 = vpop.xlane.xlu2 %2965 }
 0xe01   : > { %v2981_v56 = vmul.f32 %v2966_v19, %v4221_v21 }
 0xe03   : > { %v2989_v11 = vadd.f32 1e-05, %v2981_v56 }
 0xe05   : > { %3696 = vrsqrt.f32 %v2989_v11  ;;  %vm3003_vm2 = vweird.f32 %v2989_v11 }
 0xe08   : > { %v2968_v34 = vpop.xlane.xlu1 %2967  ;;  %v2940_v16 = vpop.xlane.xlu2 %2939 }
 0xe09   : > { %v2982_v41 = vmul.f32 %v2968_v34, %v4221_v21  ;;  %v2948_v1 = vmul.f32 %v2940_v16, %v4221_v21 }
 0xe0b   : > { %v3697_v24 = vpop.eup %3696  ;;  %v2990_v26 = vadd.f32 1e-05, %v2982_v41  ;;  %v5054_v62 = vsub.f32 %v4972_v14, %v2948_v1 }
 0xe0c   : > { %v2998_v33 = vmul.f32 %v3697_v24, %v2989_v11  ;;  %vm3004_vm1 = vweird.f32 %v3697_v24 }
 0xe0d   : > { %3698 = vrsqrt.f32 %v2990_v26  ;;  %v2964_v40 = vmul.f32 %v5054_v62, %v5054_v62  ;;  %vm3005_vm3 = vmor %vm3003_vm2, %vm3004_vm1  ;;  %vm3013_vm5 = vweird.f32 %v2990_v26 }
 0xe0e   : > { %v2999_v32 = vmul.f32 %v3697_v24, %v2998_v33 }
 0xe0f   : > { %2979 = vadd.xlane.f32.xlu2 %v2964_v40 }
 0xe10   : > { %v3000_v55 = vmul.f32 0.5, %v2999_v32  ;;  %v2970_v30 = vpop.xlane.xlu0 %2969 }
 0xe11   : > { %v2983_v47 = vmul.f32 %v2970_v30, %v4221_v21 }
 0xe12   : > { %v3001_v2 = vsub.f32 1.5, %v3000_v55 }
 0xe13   : > { %v3699_v27 = vpop.eup %3698  ;;  %v2991_v18 = vadd.f32 1e-05, %v2983_v47 }
 0xe14   : > { %v3002_v13 = vmul.f32 %v3697_v24, %v3001_v2  ;;  %v3008_v23 = vmul.f32 %v3699_v27, %v2990_v26  ;;  %vm3014_vm4 = vweird.f32 %v3699_v27 }
 0xe15   : > { %3700 = vrsqrt.f32 %v2991_v18  ;;  %vm3015_vm6 = vmor %vm3013_vm5, %vm3014_vm4  ;;  %vm3023_vm8 = vweird.f32 %v2991_v18 }
 0xe16   : > { %v3006_v0 = vsel %vm3005_vm3, %v3697_v24, %v3002_v13  ;;  %v3009_v14 = vmul.f32 %v3699_v27, %v3008_v23 }
 0xe17   : > { %v3077_v58 = vmul.f32 %v3006_v0, %v4964_v43 }
 0xe18   : > { %v3010_v45 = vmul.f32 0.5, %v3009_v14  ;;  %v2972_v35 = vpop.xlane.xlu1 %2971 }
 0xe19   : > { %v3088_v28 = vmul.f32 %v5062_v29, %v3077_v58  ;;  %v2984_v36 = vmul.f32 %v2972_v35, %v4221_v21 }
 0xe1a   : > { %v3011_v44 = vsub.f32 1.5, %v3010_v45 }
 0xe1b   : > { %v3701_v49 = vpop.eup %3700  ;;  %v2992_v50 = vadd.f32 1e-05, %v2984_v36  ;;  %v3099_v57 = vadd.f32 %v5068_v37, %v3088_v28 }
 0xe1c   : > { %v3012_v59 = vmul.f32 %v3699_v27, %v3011_v44  ;;  %v3018_v43 = vmul.f32 %v3701_v49, %v2991_v18  ;;  %vm3024_vm7 = vweird.f32 %v3701_v49 }
 0xe1d   : > { %3702 = vrsqrt.f32 %v2992_v50  ;;  %3143 = vmatmul.f32.vlgmr.msrb.gmra.mxu1 %v3099_v57  ;;  %vm3025_vm0 = vmor %vm3023_vm8, %vm3024_vm7  ;;  %vm3033_vm10 = vweird.f32 %v2992_v50 }
 0xe1e   : > { %v3016_v51 = vsel %vm3015_vm6, %v3699_v27, %v3012_v59  ;;  %v3019_v54 = vmul.f32 %v3701_v49, %v3018_v43 }
 0xe1f   : > { %v3078_v48 = vmul.f32 %v3016_v51, %v4969_v25 }
 0xe20   : > { %v3020_v3 = vmul.f32 0.5, %v3019_v54  ;;  %v2974_v4 = vpop.xlane.xlu2 %2973 }
 0xe21   : > { %v2985_v22 = vmul.f32 %v2974_v4, %v4221_v21  ;;  %v3089_v61 = vmul.f32 %v5062_v29, %v3078_v48 }
 0xe22   : > { %v3021_v10 = vsub.f32 1.5, %v3020_v3 }
 0xe23   : > { %v3703_v60 = vpop.eup %3702  ;;  %v2993_v31 = vadd.f32 1e-05, %v2985_v22  ;;  %v3100_v12 = vadd.f32 %v5068_v37, %v3089_v61 }
 0xe24   : > { %v3022_v38 = vmul.f32 %v3701_v49, %v3021_v10  ;;  %v3028_v39 = vmul.f32 %v3703_v60, %v2992_v50  ;;  %vm3034_vm9 = vweird.f32 %v3703_v60 }
 0xe25   : > { %3704 = vrsqrt.f32 %v2993_v31  ;;  %3146 = vmatmul.f32.gmra.mxu1 %v3100_v12  ;;  %vm3035_vm11 = vmor %vm3033_vm10, %vm3034_vm9  ;;  %vm3043_vm13 = vweird.f32 %v2993_v31 }
 0xe26   : > { %v3026_v8 = vsel %vm3025_vm0, %v3701_v49, %v3022_v38  ;;  %v3029_v25 = vmul.f32 %v3703_v60, %v3028_v39 }
 0xe27   : > { %v3079_v42 = vmul.f32 %v3026_v8, %v4978_v46 }
 0xe28   : > { %v3030_v15 = vmul.f32 0.5, %v3029_v25  ;;  %v2976_v53 = vpop.xlane.xlu0 %2975 }
 0xe29   : > { %v2986_v17 = vmul.f32 %v2976_v53, %v4221_v21  ;;  %v3090_v6 = vmul.f32 %v5062_v29, %v3079_v42 }
 0xe2a   : > { %v3031_v5 = vsub.f32 1.5, %v3030_v15 }
 0xe2b   : > { %v3705_v9 = vpop.eup %3704  ;;  %v2994_v19 = vadd.f32 1e-05, %v2986_v17  ;;  %v3101_v56 = vadd.f32 %v5068_v37, %v3090_v6 }
 0xe2c   : > { %v3032_v11 = vmul.f32 %v3703_v60, %v3031_v5  ;;  %v3038_v34 = vmul.f32 %v3705_v9, %v2993_v31  ;;  %vm3044_vm12 = vweird.f32 %v3705_v9 }
 0xe2d   : > { %3706 = vrsqrt.f32 %v2994_v19  ;;  %3149 = vmatmul.f32.gmra.mxu1 %v3101_v56  ;;  %vm3045_vm14 = vmor %vm3043_vm13, %vm3044_vm12  ;;  %vm3053_vm1 = vweird.f32 %v2994_v19 }
 0xe2e   : > { %v3036_v16 = vsel %vm3035_vm11, %v3703_v60, %v3032_v11  ;;  %v3039_v46 = vmul.f32 %v3705_v9, %v3038_v34 }
 0xe2f   : > { %v3080_v41 = vmul.f32 %v3036_v16, %v4989_v7 }
 0xe30   : > { %v3040_v1 = vmul.f32 0.5, %v3039_v46  ;;  %v2978_v24 = vpop.xlane.xlu1 %2977 }
 0xe31   : > { %v2987_v26 = vmul.f32 %v2978_v24, %v4221_v21  ;;  %v3091_v33 = vmul.f32 %v5062_v29, %v3080_v41 }
 0xe32   : > { %v3041_v40 = vsub.f32 1.5, %v3040_v1 }
 0xe33   : > { %v3707_v32 = vpop.eup %3706  ;;  %v2995_v55 = vadd.f32 1e-05, %v2987_v26  ;;  %v3102_v30 = vadd.f32 %v5068_v37, %v3091_v33 }
 0xe34   : > { %v3042_v47 = vmul.f32 %v3705_v9, %v3041_v40  ;;  %v3048_v2 = vmul.f32 %v3707_v32, %v2994_v19  ;;  %vm3054_vm15 = vweird.f32 %v3707_v32 }
 0xe35   : > { %3708 = vrsqrt.f32 %v2995_v55  ;;  %3152 = vmatmul.f32.gmra.mxu1 %v3102_v30  ;;  %vm3055_vm2 = vmor %vm3053_vm1, %vm3054_vm15  ;;  %vm3063_vm4 = vweird.f32 %v2995_v55 }
 0xe36   : > { %v3046_v27 = vsel %vm3045_vm14, %v3705_v9, %v3042_v47  ;;  %v3049_v7 = vmul.f32 %v3707_v32, %v3048_v2 }
 0xe37   : > { %v3081_v18 = vmul.f32 %v3046_v27, %v4994_v20 }
 0xe38   : > { %v3050_v13 = vmul.f32 0.5, %v3049_v7 }
 0xe39   : > { %v3092_v23 = vmul.f32 %v5062_v29, %v3081_v18 }
 0xe3a   : > { %v3051_v0 = vsub.f32 1.5, %v3050_v13 }
 0xe3b   : > { %v3709_v14 = vpop.eup %3708  ;;  %v3103_v58 = vadd.f32 %v5068_v37, %v3092_v23 }
 0xe3c   : > { %v3052_v45 = vmul.f32 %v3707_v32, %v3051_v0  ;;  %v3058_v35 = vmul.f32 %v3709_v14, %v2995_v55  ;;  %vm3064_vm3 = vweird.f32 %v3709_v14 }
 0xe3d   : > { %3155 = vmatmul.f32.gmra.mxu1 %v3103_v58  ;;  %vm3065_vm5 = vmor %vm3063_vm4, %vm3064_vm3 }
 0xe3e   : > { %v3056_v28 = vsel %vm3055_vm2, %v3707_v32, %v3052_v45  ;;  %v3059_v36 = vmul.f32 %v3709_v14, %v3058_v35 }
 0xe3f   : > { %v3082_v44 = vmul.f32 %v3056_v28, %v4999_v52 }
 0xe40   : > { %v3060_v49 = vmul.f32 0.5, %v3059_v36 }
 0xe41   : > { %v3093_v20 = vmul.f32 %v5062_v29, %v3082_v44 }
 0xe42   : > { %v3061_v50 = vsub.f32 1.5, %v3060_v49 }
 0xe43   : > { %v3104_v57 = vadd.f32 %v5068_v37, %v3093_v20 }
 0xe44   : > { %v3062_v59 = vmul.f32 %v3709_v14, %v3061_v50 }
 0xe45   : > { %3158 = vmatmul.f32.gmra.mxu1 %v3104_v57 }
 0xe46   : > { %v3066_v43 = vsel %vm3065_vm5, %v3709_v14, %v3062_v59 }
 0xe47   : > { %v3083_v51 = vmul.f32 %v3066_v43, %v5004_v63  ;;  %v5098_v63 = vld [vmem:[%s5146_s17] ss:$0 sm:$0xff] }
 0xe49   : > { %v3094_v54 = vmul.f32 %v5062_v29, %v3083_v51 }
 0xe4b   : > { %v3105_v48 = vadd.f32 %v5068_v37, %v3094_v54 }
 0xe4d   : > { %3161 = vmatmul.f32.gmra.mxu1 %v3105_v48 }
 0xe82   : > { %v2980_v52 = vpop.xlane.xlu2 %2979 }
 0xe83   : > { %v2988_v3 = vmul.f32 %v2980_v52, %v4221_v21 }
 0xe85   : > { %v2996_v4 = vadd.f32 1e-05, %v2988_v3 }
 0xe87   : > { %3710 = vrsqrt.f32 %v2996_v4  ;;  %vm3073_vm7 = vweird.f32 %v2996_v4 }
 0xe8d   : > { %v3711_v22 = vpop.eup %3710 }
 0xe8e   : > { %v3068_v61 = vmul.f32 %v3711_v22, %v2996_v4  ;;  %vm3074_vm6 = vweird.f32 %v3711_v22 }
 0xe8f   : > { %vm3075_vm8 = vmor %vm3073_vm7, %vm3074_vm6 }
 0xe90   : > { %v3069_v10 = vmul.f32 %v3711_v22, %v3068_v61 }
 0xe92   : > { %v3070_v60 = vmul.f32 0.5, %v3069_v10 }
 0xe94   : > { %v3071_v31 = vsub.f32 1.5, %v3070_v60 }
 0xe96   : > { %v3072_v12 = vmul.f32 %v3711_v22, %v3071_v31 }
 0xe98   : > { %v3076_v38 = vsel %vm3075_vm8, %v3711_v22, %v3072_v12 }
 0xe99   : > { %v3084_v39 = vmul.f32 %v3076_v38, %v5054_v62 }
 0xe9a   : > { %v3144_v21 = vpop.f32.mrf.mxu1 }
 0xe9b   : > { %v3145_v8 = vadd.f32 %v5098_v63, %v3144_v21  ;;  %v3095_v25 = vmul.f32 %v5062_v29, %v3084_v39 }
 0xe9d   : > { %v3490_v42 = vmul.f32 -1.442695, %v3145_v8  ;;  %v3106_v15 = vadd.f32 %v5068_v37, %v3095_v25 }
 0xe9f   : > { %3712 = vpow2.f32 %v3490_v42  ;;  %3164 = vmatmul.f32.gmra.mxu1 %v3106_v15 }
 0xea2   : > { %v3147_v53 = vpop.f32.mrf.mxu1 }
 0xea3   : > { %v3148_v17 = vadd.f32 %v5098_v63, %v3147_v53 }
 0xea5   : > { %v3713_v6 = vpop.eup %3712  ;;  %v3491_v5 = vmul.f32 -1.442695, %v3148_v17 }
 0xea6   : > { %v3192_v9 = vadd.f32 1.0, %v3713_v6 }
 0xea7   : > { %3714 = vpow2.f32 %v3491_v5 }
 0xea8   : > { %3716 = vrcp.f32 %v3192_v9  ;;  %v3211_v46 = vand.u32 2147483648, %v3192_v9  ;;  %v3209_v24 = vand.u32 2147483647, %v3192_v9  ;;  %vm3205_vm9 = vweird.f32 %v3192_v9 }
 0xeaa   : > { %v3150_v19 = vpop.f32.mrf.mxu1  ;;  %v3212_v30 = vor.u32 1.1754944e-38, %v3211_v46  ;;  %vm3210_vm11 = vcmp.eq.f32.partialorder %v3209_v24, 8.507059e+37 }
 0xeab   : > { %v3151_v62 = vadd.f32 %v5098_v63, %v3150_v19 }
 0xead   : > { %v3715_v56 = vpop.eup %3714  ;;  %v3492_v11 = vmul.f32 -1.442695, %v3151_v62 }
 0xeae   : > { %v3717_v34 = vpop.eup %3716  ;;  %v3193_v29 = vadd.f32 1.0, %v3715_v56 }
 0xeaf   : > { %v3201_v16 = vmul.f32 %v3717_v34, %v3192_v9  ;;  %3718 = vpow2.f32 %v3492_v11  ;;  %vm3206_vm0 = vweird.f32 %v3717_v34 }
 0xeb0   : > { %3720 = vrcp.f32 %v3193_v29  ;;  %vm3207_vm10 = vmor %vm3205_vm9, %vm3206_vm0  ;;  %v3226_v13 = vand.u32 2147483648, %v3193_v29  ;;  %v3224_v14 = vand.u32 2147483647, %v3193_v29  ;;  %vm3220_vm13 = vweird.f32 %v3193_v29 }
 0xeb1   : > { %v3202_v37 = vsub.f32 1.0, %v3201_v16 }
 0xeb2   : > { %v3153_v41 = vpop.f32.mrf.mxu1  ;;  %v3227_v44 = vor.u32 1.1754944e-38, %v3226_v13  ;;  %vm3225_vm15 = vcmp.eq.f32.partialorder %v3224_v14, 8.507059e+37 }
 0xeb3   : > { %v3203_v1 = vmul.f32 %v3717_v34, %v3202_v37  ;;  %v3154_v26 = vadd.f32 %v5098_v63, %v3153_v41 }
 0xeb5   : > { %v3719_v33 = vpop.eup %3718  ;;  %v3204_v40 = vadd.f32 %v3717_v34, %v3203_v1  ;;  %v3493_v32 = vmul.f32 -1.442695, %v3154_v26 }
 0xeb6   : > { %v3721_v55 = vpop.eup %3720  ;;  %v3194_v47 = vadd.f32 1.0, %v3719_v33 }
 0xeb7   : > { %v3208_v2 = vsel %vm3207_vm10, %v3717_v34, %v3204_v40  ;;  %v3216_v27 = vmul.f32 %v3721_v55, %v3193_v29  ;;  %3722 = vpow2.f32 %v3493_v32  ;;  %vm3221_vm12 = vweird.f32 %v3721_v55 }
 0xeb8   : > { %v3213_v7 = vsel %vm3210_vm11, %v3212_v30, %v3208_v2  ;;  %3724 = vrcp.f32 %v3194_v47  ;;  %vm3222_vm14 = vmor %vm3220_vm13, %vm3221_vm12  ;;  %v3241_v43 = vand.u32 2147483648, %v3194_v47  ;;  %v3239_v48 = vand.u32 2147483647, %v3194_v47 }
 0xeb9   : > { %3320 = vst [vmem:[%s5112_s23] sm:$0xff] %v3213_v7  ;;  %v3217_v18 = vsub.f32 1.0, %v3216_v27  ;;  %vm3235_vm2 = vweird.f32 %v3194_v47 }
 0xeba   : > { %v3156_v23 = vpop.f32.mrf.mxu1  ;;  %v3242_v10 = vor.u32 1.1754944e-38, %v3241_v43  ;;  %vm3240_vm4 = vcmp.eq.f32.partialorder %v3239_v48, 8.507059e+37 }
 0xebb   : > { %v3218_v0 = vmul.f32 %v3721_v55, %v3217_v18  ;;  %v3157_v58 = vadd.f32 %v5098_v63, %v3156_v23 }
 0xebd   : > { %v3723_v45 = vpop.eup %3722  ;;  %v3219_v35 = vadd.f32 %v3721_v55, %v3218_v0  ;;  %v3494_v28 = vmul.f32 -1.442695, %v3157_v58 }
 0xebe   : > { %v3725_v36 = vpop.eup %3724  ;;  %v3195_v49 = vadd.f32 1.0, %v3723_v45 }
 0xebf   : > { %v3223_v20 = vsel %vm3222_vm14, %v3721_v55, %v3219_v35  ;;  %v3231_v50 = vmul.f32 %v3725_v36, %v3194_v47  ;;  %3726 = vpow2.f32 %v3494_v28  ;;  %vm3236_vm1 = vweird.f32 %v3725_v36 }
 0xec0   : > { %v3228_v57 = vsel %vm3225_vm15, %v3227_v44, %v3223_v20  ;;  %3728 = vrcp.f32 %v3195_v49  ;;  %vm3237_vm3 = vmor %vm3235_vm2, %vm3236_vm1  ;;  %v3256_v21 = vand.u32 2147483648, %v3195_v49  ;;  %v3254_v42 = vand.u32 2147483647, %v3195_v49 }
 0xec1   : > { %3321 = vst [vmem:[%s5112_s23 + $0x8] sm:$0xff] %v3228_v57  ;;  %v3232_v59 = vsub.f32 1.0, %v3231_v50  ;;  %vm3250_vm6 = vweird.f32 %v3195_v49 }
 0xec2   : > { %v3159_v51 = vpop.f32.mrf.mxu1  ;;  %v3257_v9 = vor.u32 1.1754944e-38, %v3256_v21  ;;  %vm3255_vm8 = vcmp.eq.f32.partialorder %v3254_v42, 8.507059e+37 }
 0xec3   : > { %v3233_v54 = vmul.f32 %v3725_v36, %v3232_v59  ;;  %v3160_v52 = vadd.f32 %v5098_v63, %v3159_v51 }
 0xec5   : > { %v3727_v3 = vpop.eup %3726  ;;  %v3234_v4 = vadd.f32 %v3725_v36, %v3233_v54  ;;  %v3495_v22 = vmul.f32 -1.442695, %v3160_v52 }
 0xec6   : > { %v3729_v61 = vpop.eup %3728  ;;  %v3196_v60 = vadd.f32 1.0, %v3727_v3 }
 0xec7   : > { %v3238_v31 = vsel %vm3237_vm3, %v3725_v36, %v3234_v4  ;;  %v3246_v12 = vmul.f32 %v3729_v61, %v3195_v49  ;;  %3730 = vpow2.f32 %v3495_v22  ;;  %vm3251_vm5 = vweird.f32 %v3729_v61 }
 0xec8   : > { %v3243_v38 = vsel %vm3240_vm4, %v3242_v10, %v3238_v31  ;;  %3732 = vrcp.f32 %v3196_v60  ;;  %vm3252_vm7 = vmor %vm3250_vm6, %vm3251_vm5  ;;  %v3271_v29 = vand.u32 2147483648, %v3196_v60  ;;  %v3269_v37 = vand.u32 2147483647, %v3196_v60 }
 0xec9   : > { %3322 = vst [vmem:[%s5112_s23 + $0x10] sm:$0xff] %v3243_v38  ;;  %v3247_v39 = vsub.f32 1.0, %v3246_v12  ;;  %vm3265_vm9 = vweird.f32 %v3196_v60 }
 0xeca   : > { %v3162_v8 = vpop.f32.mrf.mxu1  ;;  %v3272_v24 = vor.u32 1.1754944e-38, %v3271_v29  ;;  %vm3270_vm11 = vcmp.eq.f32.partialorder %v3269_v37, 8.507059e+37 }
 0xecb   : > { %v3248_v25 = vmul.f32 %v3729_v61, %v3247_v39  ;;  %v3163_v15 = vadd.f32 %v5098_v63, %v3162_v8 }
 0xecd   : > { %v3731_v53 = vpop.eup %3730  ;;  %v3249_v17 = vadd.f32 %v3729_v61, %v3248_v25  ;;  %v3496_v6 = vmul.f32 -1.442695, %v3163_v15 }
 0xece   : > { %v3733_v5 = vpop.eup %3732  ;;  %v3197_v19 = vadd.f32 1.0, %v3731_v53 }
 0xecf   : > { %v3253_v62 = vsel %vm3252_vm7, %v3729_v61, %v3249_v17  ;;  %v3261_v56 = vmul.f32 %v3733_v5, %v3196_v60  ;;  %3734 = vpow2.f32 %v3496_v6  ;;  %vm3266_vm0 = vweird.f32 %v3733_v5 }
 0xed0   : > { %v3258_v11 = vsel %vm3255_vm8, %v3257_v9, %v3253_v62  ;;  %3736 = vrcp.f32 %v3197_v19  ;;  %vm3267_vm10 = vmor %vm3265_vm9, %vm3266_vm0  ;;  %v3286_v30 = vand.u32 2147483648, %v3197_v19  ;;  %v3284_v2 = vand.u32 2147483647, %v3197_v19 }
 0xed1   : > { %3323 = vst [vmem:[%s5112_s23 + $0x18] sm:$0xff] %v3258_v11  ;;  %v3262_v34 = vsub.f32 1.0, %v3261_v56  ;;  %vm3280_vm13 = vweird.f32 %v3197_v19 }
 0xed2   : > { %v3287_v18 = vor.u32 1.1754944e-38, %v3286_v30  ;;  %vm3285_vm15 = vcmp.eq.f32.partialorder %v3284_v2, 8.507059e+37 }
 0xed3   : > { %v3263_v16 = vmul.f32 %v3733_v5, %v3262_v34 }
 0xed5   : > { %v3735_v46 = vpop.eup %3734  ;;  %v3264_v41 = vadd.f32 %v3733_v5, %v3263_v16 }
 0xed6   : > { %v3737_v1 = vpop.eup %3736  ;;  %v3198_v26 = vadd.f32 1.0, %v3735_v46 }
 0xed7   : > { %v3268_v33 = vsel %vm3267_vm10, %v3733_v5, %v3264_v41  ;;  %v3276_v40 = vmul.f32 %v3737_v1, %v3197_v19  ;;  %vm3281_vm12 = vweird.f32 %v3737_v1 }
 0xed8   : > { %v3273_v32 = vsel %vm3270_vm11, %v3272_v24, %v3268_v33  ;;  %3738 = vrcp.f32 %v3198_v26  ;;  %vm3282_vm14 = vmor %vm3280_vm13, %vm3281_vm12  ;;  %v3301_v58 = vand.u32 2147483648, %v3198_v26  ;;  %v3299_v35 = vand.u32 2147483647, %v3198_v26 }
 0xed9   : > { %3324 = vst [vmem:[%s5112_s23 + $0x20] sm:$0xff] %v3273_v32  ;;  %v3277_v55 = vsub.f32 1.0, %v3276_v40  ;;  %vm3295_vm2 = vweird.f32 %v3198_v26 }
 0xeda   : > { %v3302_v36 = vor.u32 1.1754944e-38, %v3301_v58  ;;  %vm3300_vm4 = vcmp.eq.f32.partialorder %v3299_v35, 8.507059e+37 }
 0xedb   : > { %v3278_v47 = vmul.f32 %v3737_v1, %v3277_v55 }
 0xedd   : > { %v3279_v27 = vadd.f32 %v3737_v1, %v3278_v47 }
 0xede   : > { %v3739_v7 = vpop.eup %3738 }
 0xedf   : > { %v3283_v13 = vsel %vm3282_vm14, %v3737_v1, %v3279_v27  ;;  %v3291_v23 = vmul.f32 %v3739_v7, %v3198_v26  ;;  %vm3296_vm1 = vweird.f32 %v3739_v7 }
 0xee0   : > { %v3288_v0 = vsel %vm3285_vm15, %v3287_v18, %v3283_v13  ;;  %vm3297_vm3 = vmor %vm3295_vm2, %vm3296_vm1 }
 0xee1   : > { %3325 = vst [vmem:[%s5112_s23 + $0x28] sm:$0xff] %v3288_v0  ;;  %v3292_v14 = vsub.f32 1.0, %v3291_v23 }
 0xee3   : > { %v3293_v45 = vmul.f32 %v3739_v7, %v3292_v14 }
 0xee5   : > { %v3294_v28 = vadd.f32 %v3739_v7, %v3293_v45 }
 0xee7   : > { %v3298_v44 = vsel %vm3297_vm3, %v3739_v7, %v3294_v28 }
 0xee8   : > { %v3303_v49 = vsel %vm3300_vm4, %v3302_v36, %v3298_v44 }
 0xee9   : > { %3326 = vst [vmem:[%s5112_s23 + $0x30] sm:$0xff] %v3303_v49 }
 0xf1c   : > { %v3165_v20 = vpop.f32.mrf.mxu1 }
 0xf1d   : > { %v3166_v50 = vadd.f32 %v5098_v63, %v3165_v20 }
 0xf1f   : > { %v3497_v57 = vmul.f32 -1.442695, %v3166_v50 }
 0xf21   : > { %3740 = vpow2.f32 %v3497_v57 }
 0xf27   : > { %v3741_v59 = vpop.eup %3740 }
 0xf28   : > { %v3199_v43 = vadd.f32 1.0, %v3741_v59 }
 0xf2a   : > { %3742 = vrcp.f32 %v3199_v43  ;;  %v3316_v52 = vand.u32 2147483648, %v3199_v43  ;;  %v3314_v4 = vand.u32 2147483647, %v3199_v43  ;;  %vm3310_vm6 = vweird.f32 %v3199_v43 }
 0xf2c   : > { %v3317_v61 = vor.u32 1.1754944e-38, %v3316_v52  ;;  %vm3315_vm8 = vcmp.eq.f32.partialorder %v3314_v4, 8.507059e+37 }
 0xf30   : > { %v3743_v51 = vpop.eup %3742 }
 0xf31   : > { %v3306_v54 = vmul.f32 %v3743_v51, %v3199_v43  ;;  %vm3311_vm5 = vweird.f32 %v3743_v51 }
 0xf32   : > { %vm3312_vm7 = vmor %vm3310_vm6, %vm3311_vm5 }
 0xf33   : > { %v3307_v48 = vsub.f32 1.0, %v3306_v54 }
 0xf35   : > { %v3308_v3 = vmul.f32 %v3743_v51, %v3307_v48 }
 0xf37   : > { %v3309_v22 = vadd.f32 %v3743_v51, %v3308_v3 }
 0xf39   : > { %v3313_v10 = vsel %vm3312_vm7, %v3743_v51, %v3309_v22 }
 0xf3a   : > { %v3318_v63 = vsel %vm3315_vm8, %v3317_v61, %v3313_v10 }
 0xf3b   : > { %3327 = vst [vmem:[%s5112_s23 + $0x38] sm:$0xff] %v3318_v63 }
 0xf3c PF: > { %s30_s27 = sadd.s32 1, %s3818_s27  }
 0xf3d   : > { %p27_p7 = scmp.ge.s32.totalorder %s30_s27, 4  }
 0xf3f   :  { %29 = sbr.rel (!%p27_p7) target bundleno = 6 (0x6), region = 143 }
 0xf44   :  { %3349 = vsyncpa [#allocation3], 1 }
 0xf45   :  { %3351 = vsyncpa [#allocation3 + $0x1], 1 }
 0xf46   :  { %3352 = vsyncpa [#allocation5], 1 }

</bundles_post_ra>
